<compile_context>
chip_gen: v5e
topology: v5e:2x2
jax: 0.10.0
libtpu: 0.0.40
codegen_flags: <defaults>
</compile_context>

<pallas_src>
import jax
import jax.numpy as jnp
from jax.experimental import pallas as pl
from jax.experimental.pallas import tpu as pltpu

B = 2
CIN = 1
H = W = 32
COUT = 16
HP = WP = 16                     # pooled spatial
POOLED = HP * WP                 # 256 pooled pixels per (b, c)
FLAT = COUT * POOLED             # 16 * 16 * 16 = 4096
HIDDEN = 256
NUM_CLASSES = 10
BN_EPS = 1e-5

KTAPS = 16                       # 9 conv taps zero-padded to 16 (MXU-friendly K)
LANES = B * 4 * POOLED           # 2048 im2col columns: (b, 2x2 pool pos, pixel)

KC = 2                           # fc1 K-chunks streamed over the grid
KCH = FLAT // KC                 # 2048 rows of w1 per chunk (1 MiB in bf16)


# --------------------------------------------------------------------------
# Fused kernel: conv+BN+ReLU+pool at grid step 0 (into VMEM scratch),
# fc1 accumulated one bf16 K-chunk per grid step, fc2 at the last step.
# --------------------------------------------------------------------------
def fused_kernel(im_ref, wc_ref, bi_ref, w1_ref, b1_ref, w2_ref, b2_ref,
                 o_ref, pooled_ref, acc_ref):
    # im_ref:     (16, 2048)   im2col patches, lane = b*1024 + q*256 + p
    #                          (q = 2x2 pool position, p = hp*16 + wp)
    # wc_ref:     (16, 16)     conv taps (BN scale folded in), zero-padded K
    # bi_ref:     (16, 1)      folded BN bias
    # w1_ref:     (2048, 256)  current bf16 K-chunk of fc1 weight (pre-T)
    # b1_ref:     (1, 256)
    # w2_ref:     (256, 10)    fc2 weight (pre-transposed)
    # b2_ref:     (1, 10)
    # o_ref:      (B, 10)      logits
    # pooled_ref: (B, 4096)    VMEM scratch: pooled activations (bf16)
    # acc_ref:    (B, 256)     VMEM scratch: fc1 accumulator (f32)
    k = pl.program_id(0)

    @pl.when(k == 0)
    def _conv_bn_relu_pool():
        # conv as ONE MXU matmul covering both batch elements.
        y = jnp.dot(wc_ref[...], im_ref[...],
                    preferred_element_type=jnp.float32,
                    precision=jax.lax.Precision.HIGHEST)            # (16, 2048)
        # folded BN bias + ReLU (scale already folded into the taps)
        y = jnp.maximum(y + bi_ref[...], 0.0)
        # 2x2 max-pool: the four pool positions of every output pixel sit in
        # four aligned 256-lane blocks (per batch element) -> elementwise max,
        # zero cross-lane relayout.
        rows = []
        for b in range(B):                                           # B=2, static
            o = b * 4 * POOLED
            p = jnp.maximum(
                jnp.maximum(y[:, o:o + POOLED],
                            y[:, o + POOLED:o + 2 * POOLED]),
                jnp.maximum(y[:, o + 2 * POOLED:o + 3 * POOLED],
                            y[:, o + 3 * POOLED:o + 4 * POOLED]))    # (16, 256)
            # PyTorch (C, H', W') flatten -> one lane-dense 4096-wide row.
            rows.append(p.reshape(1, FLAT))
        pooled_ref[...] = jnp.concatenate(rows, axis=0).astype(pooled_ref.dtype)
        acc_ref[...] = jnp.zeros_like(acc_ref)

    # fc1: accumulate one bf16 K-chunk of (B,4096) @ (4096,256) per grid step
    # (single-pass MXU, f32 accumulation); the next 1 MiB chunk of w1 is DMA'd
    # in the background by the BlockSpec pipeline.
    start = pl.multiple_of(k * KCH, KCH)
    acc_ref[...] += jnp.dot(pooled_ref[:, pl.ds(start, KCH)], w1_ref[...],
                            preferred_element_type=jnp.float32)      # (B, 256)

    @pl.when(k == KC - 1)
    def _fc1_relu_fc2():
        h = jnp.maximum(acc_ref[...] + b1_ref[...], 0.0)              # (B, 256)
        o_ref[...] = (jnp.dot(h, w2_ref[...],
                              preferred_element_type=jnp.float32,
                              precision=jax.lax.Precision.HIGHEST)
                      + b2_ref[...])                                  # (B, 10)


def fused_forward(im, wc, bias, w1t, b1, w2t, b2):
    return pl.pallas_call(
        fused_kernel,
        out_shape=jax.ShapeDtypeStruct((B, NUM_CLASSES), jnp.float32),
        grid_spec=pltpu.PrefetchScalarGridSpec(
            num_scalar_prefetch=0,
            grid=(KC,),
            in_specs=[
                pl.BlockSpec((KTAPS, LANES), lambda k: (0, 0)),
                pl.BlockSpec((COUT, KTAPS), lambda k: (0, 0)),
                pl.BlockSpec((COUT, 1), lambda k: (0, 0)),
                pl.BlockSpec((KCH, HIDDEN), lambda k: (k, 0)),   # streamed bf16 w1
                pl.BlockSpec((1, HIDDEN), lambda k: (0, 0)),
                pl.BlockSpec((HIDDEN, NUM_CLASSES), lambda k: (0, 0)),
                pl.BlockSpec((1, NUM_CLASSES), lambda k: (0, 0)),
            ],
            out_specs=pl.BlockSpec((B, NUM_CLASSES), lambda k: (0, 0)),
            scratch_shapes=[
                pltpu.VMEM((B, FLAT), jnp.bfloat16),   # pooled activations
                pltpu.VMEM((B, HIDDEN), jnp.float32),  # fc1 accumulator
            ],
        ),
        compiler_params=pltpu.CompilerParams(
            dimension_semantics=("arbitrary",)),          # fc1 reduction axis
    )(im, wc, bias, w1t, b1, w2t, b2)


def im2col(x):
    """(B, 1, 32, 32) -> (16, 2048) lane-dense, pool-friendly im2col.

    Column lane index = b*1024 + (dh*2+dw)*256 + hp*16 + wp,
    where the conv output pixel is (h, w) = (2*hp+dh, 2*wp+dw).  Rows are the
    9 conv taps (kh*3+kw), zero-padded to 16.  Pure XLA layout plumbing
    (~72 KiB) done once per forward, outside the kernel.
    """
    x_pad = jnp.pad(x[:, 0], ((0, 0), (1, 1), (1, 1)))               # (B, 34, 34)
    cols = []
    for kh in range(3):
        for kw in range(3):
            win = x_pad[:, kh:kh + H, kw:kw + W]                      # (B, 32, 32)
            win = win.reshape(B, HP, 2, WP, 2).transpose(0, 2, 4, 1, 3)
            cols.append(win.reshape(1, LANES))
    im = jnp.concatenate(cols, axis=0)                                # (9, 2048)
    return jnp.pad(im, ((0, KTAPS - 9), (0, 0)))                      # (16, 2048)


def forward(x, kparams):
    wc, bias, w1t, b1, w2t, b2 = kparams
    return fused_forward(im2col(x), wc, bias, w1t, b1, w2t, b2)


# --------------------------------------------------------------------------
# Plain-JAX reference (PyTorch-layout weights, f32 conv, bf16 fc1 weights to
# mirror the kernel's quantization).
# --------------------------------------------------------------------------
def reference(x, conv_w, bn_scale, bn_bias, w1t_bf16, b1, w2, b2):
    y = jax.lax.conv_general_dilated(
        x, conv_w, window_strides=(1, 1), padding=((1, 1), (1, 1)),
        dimension_numbers=("NCHW", "OIHW", "NCHW"),
        precision=jax.lax.Precision.HIGHEST)
    y = jnp.maximum(y * bn_scale[None, :, None, None]
                    + bn_bias[None, :, None, None], 0.0)
    y = y.reshape(B, COUT, HP, 2, WP, 2).max(axis=(3, 5))
    xf = y.reshape(B, FLAT).astype(jnp.bfloat16)
    h = jnp.maximum(
        jnp.dot(xf, w1t_bf16, preferred_element_type=jnp.float32) + b1, 0.0)
    return (jnp.dot(h, w2.T, preferred_element_type=jnp.float32,
                    precision=jax.lax.Precision.HIGHEST) + b2)


if __name__ == "__main__":
    key = jax.random.PRNGKey(0)
    ks = jax.random.split(key, 10)

    # deterministic synthetic parameters (shapes from the nn.Module __init__)
    conv_w = 0.3 * jax.random.normal(ks[0], (COUT, CIN, 3, 3), jnp.float32)
    gamma = 1.0 + 0.1 * jax.random.normal(ks[1], (COUT,), jnp.float32)
    beta = 0.1 * jax.random.normal(ks[2], (COUT,), jnp.float32)
    run_mean = 0.05 * jax.random.normal(ks[3], (COUT,), jnp.float32)
    run_var = jnp.abs(1.0 + 0.1 * jax.random.normal(ks[4], (COUT,), jnp.float32))
    # folded inference-mode BN affine
    bn_scale = gamma / jnp.sqrt(run_var + BN_EPS)
    bn_bias = beta - run_mean * bn_scale

    w1 = jax.random.normal(ks[5], (HIDDEN, FLAT), jnp.float32) / jnp.sqrt(FLAT)
    b1 = 0.01 * jax.random.normal(ks[6], (HIDDEN,), jnp.float32)
    w2 = jax.random.normal(ks[7], (NUM_CLASSES, HIDDEN), jnp.float32) / jnp.sqrt(HIDDEN)
    b2 = 0.01 * jax.random.normal(ks[8], (NUM_CLASSES,), jnp.float32)

    x = jax.random.normal(ks[9], (B, CIN, H, W), jnp.float32)

    # Kernel-layout params, prepared ONCE outside the jitted forward:
    # BN scale folded into the conv taps, taps zero-padded 9->16, w1 pre-T'd
    # and stored bf16, w2 pre-T'd, biases as broadcastable rows.
    wc_folded = bn_scale[:, None] * conv_w[:, 0].reshape(COUT, 9)     # (16, 9)
    wc_folded = jnp.pad(wc_folded, ((0, 0), (0, KTAPS - 9)))          # (16, 16)
    w1t_bf16 = jnp.asarray(w1.T).astype(jnp.bfloat16)                 # (4096, 256)
    kparams = (
        wc_folded,
        bn_bias.reshape(COUT, 1),
        w1t_bf16,
        b1.reshape(1, HIDDEN),
        jnp.asarray(w2.T),                                            # (256, 10)
        b2.reshape(1, NUM_CLASSES),
    )

    out = jax.jit(forward)(x, kparams)
    out = jax.block_until_ready(out)
    assert out.shape == (B, NUM_CLASSES), out.shape

    ref = reference(x, conv_w, bn_scale, bn_bias, w1t_bf16, b1, w2, b2)
    max_err = float(jnp.max(jnp.abs(out - ref)))
    assert jnp.allclose(out, ref, rtol=2e-3, atol=2e-3), (
        f"mismatch vs plain-JAX reference, max abs err = {max_err}")

    print("KERNEL_OK")
</pallas_src>

<mosaic_0001>
module attributes {stable_mosaic.version = 11 : i64} {
  func.func @fused_kernel(%arg0: i32, %arg1: memref<16x2048xf32, #tpu.memory_space<vmem>>, %arg2: memref<16x16xf32, #tpu.memory_space<vmem>>, %arg3: memref<16x1xf32, #tpu.memory_space<vmem>>, %arg4: memref<2048x256xbf16, #tpu.memory_space<vmem>>, %arg5: memref<1x256xf32, #tpu.memory_space<vmem>>, %arg6: memref<256x10xf32, #tpu.memory_space<vmem>>, %arg7: memref<1x10xf32, #tpu.memory_space<vmem>>, %arg8: memref<2x10xf32, #tpu.memory_space<vmem>>, %arg9: memref<2x4096xbf16, #tpu.memory_space<vmem>>, %arg10: memref<2x256xf32, #tpu.memory_space<vmem>>) attributes {dimension_semantics = [#tpu.dimension_semantics<arbitrary>], iteration_bounds = array<i64: 2>, scalar_prefetch = 0 : i64, scratch_operands = 2 : i64, tpu.core_type = #tpu.core_type<tc>, window_params = [{pipeline_mode = #tpu.pipeline_mode<synchronous>, transform_indices = @transform_0, window_bounds = array<i64: 16, 2048>}, {pipeline_mode = #tpu.pipeline_mode<synchronous>, transform_indices = @transform_1, window_bounds = array<i64: 16, 16>}, {pipeline_mode = #tpu.pipeline_mode<synchronous>, transform_indices = @transform_2, window_bounds = array<i64: 16, 1>}, {transform_indices = @transform_3, window_bounds = array<i64: 2048, 256>}, {pipeline_mode = #tpu.pipeline_mode<synchronous>, transform_indices = @transform_4, window_bounds = array<i64: 1, 256>}, {pipeline_mode = #tpu.pipeline_mode<synchronous>, transform_indices = @transform_5, window_bounds = array<i64: 256, 10>}, {pipeline_mode = #tpu.pipeline_mode<synchronous>, transform_indices = @transform_6, window_bounds = array<i64: 1, 10>}, {pipeline_mode = #tpu.pipeline_mode<synchronous>, transform_indices = @transform_7, window_bounds = array<i64: 2, 10>}]} {
    %c0_i32 = arith.constant 0 : i32
    %0 = arith.cmpi eq, %arg0, %c0_i32 : i32
    %1 = arith.extui %0 : i1 to i32
    %c0_i32_0 = arith.constant 0 : i32
    %2 = arith.cmpi ne, %1, %c0_i32_0 : i32
    scf.if %2 {
      %c0_8 = arith.constant 0 : index
      %c0_9 = arith.constant 0 : index
      %15 = vector.load %arg2[%c0_8, %c0_9] : memref<16x16xf32, #tpu.memory_space<vmem>>, vector<16x16xf32>
      %c0_10 = arith.constant 0 : index
      %c0_11 = arith.constant 0 : index
      %16 = vector.load %arg1[%c0_10, %c0_11] : memref<16x2048xf32, #tpu.memory_space<vmem>>, vector<16x2048xf32>
      %cst_12 = arith.constant dense<0.000000e+00> : vector<16x2048xf32>
      %17 = tpu.matmul %15, %16, %cst_12 {dimension_numbers = #tpu.dot_dimension_numbers<[1], [0], [0], [1], [0, 0, 1, 1], [], []>, precision = #tpu.contract_precision<fp32>} : vector<16x16xf32>, vector<16x2048xf32>, vector<16x2048xf32> -> vector<16x2048xf32>
      %c0_13 = arith.constant 0 : index
      %c0_14 = arith.constant 0 : index
      %18 = vector.load %arg3[%c0_13, %c0_14] : memref<16x1xf32, #tpu.memory_space<vmem>>, vector<16x1xf32>
      %19 = vector.broadcast %18 : vector<16x1xf32> to vector<16x2048xf32>
      %20 = arith.addf %17, %19 : vector<16x2048xf32>
      %cst_15 = arith.constant 0.000000e+00 : f32
      %21 = vector.broadcast %cst_15 : f32 to vector<16x2048xf32>
      %22 = arith.maximumf %20, %21 : vector<16x2048xf32>
      %23 = vector.extract_strided_slice %22 {offsets = [0, 0], sizes = [16, 256], strides = [1, 1]} : vector<16x2048xf32> to vector<16x256xf32>
      %24 = vector.extract_strided_slice %22 {offsets = [0, 256], sizes = [16, 256], strides = [1, 1]} : vector<16x2048xf32> to vector<16x256xf32>
      %25 = arith.maximumf %23, %24 : vector<16x256xf32>
      %26 = vector.extract_strided_slice %22 {offsets = [0, 512], sizes = [16, 256], strides = [1, 1]} : vector<16x2048xf32> to vector<16x256xf32>
      %27 = vector.extract_strided_slice %22 {offsets = [0, 768], sizes = [16, 256], strides = [1, 1]} : vector<16x2048xf32> to vector<16x256xf32>
      %28 = arith.maximumf %26, %27 : vector<16x256xf32>
      %29 = arith.maximumf %25, %28 : vector<16x256xf32>
      %30 = vector.shape_cast %29 : vector<16x256xf32> to vector<1x4096xf32>
      %31 = vector.extract_strided_slice %22 {offsets = [0, 1024], sizes = [16, 256], strides = [1, 1]} : vector<16x2048xf32> to vector<16x256xf32>
      %32 = vector.extract_strided_slice %22 {offsets = [0, 1280], sizes = [16, 256], strides = [1, 1]} : vector<16x2048xf32> to vector<16x256xf32>
      %33 = arith.maximumf %31, %32 : vector<16x256xf32>
      %34 = vector.extract_strided_slice %22 {offsets = [0, 1536], sizes = [16, 256], strides = [1, 1]} : vector<16x2048xf32> to vector<16x256xf32>
      %35 = vector.extract_strided_slice %22 {offsets = [0, 1792], sizes = [16, 256], strides = [1, 1]} : vector<16x2048xf32> to vector<16x256xf32>
      %36 = arith.maximumf %34, %35 : vector<16x256xf32>
      %37 = arith.maximumf %33, %36 : vector<16x256xf32>
      %38 = vector.shape_cast %37 : vector<16x256xf32> to vector<1x4096xf32>
      %39 = tpu.concatenate %30, %38 in 0 : vector<1x4096xf32>, vector<1x4096xf32> -> vector<2x4096xf32>
      %40 = arith.truncf %39 : vector<2x4096xf32> to vector<2x4096xbf16>
      %c0_16 = arith.constant 0 : index
      %c0_17 = arith.constant 0 : index
      %41 = vector.load %arg9[%c0_16, %c0_17] : memref<2x4096xbf16, #tpu.memory_space<vmem>>, vector<2x4096xbf16>
      tpu.vector_store %arg9[%c0_16, %c0_17], %40 {strides = array<i32>} : memref<2x4096xbf16, #tpu.memory_space<vmem>>, vector<2x4096xbf16>,
      %cst_18 = arith.constant 0.000000e+00 : f32
      %42 = vector.broadcast %cst_18 : f32 to vector<2x256xf32>
      %c0_19 = arith.constant 0 : index
      %c0_20 = arith.constant 0 : index
      %43 = vector.load %arg10[%c0_19, %c0_20] : memref<2x256xf32, #tpu.memory_space<vmem>>, vector<2x256xf32>
      tpu.vector_store %arg10[%c0_19, %c0_20], %42 {strides = array<i32>} : memref<2x256xf32, #tpu.memory_space<vmem>>, vector<2x256xf32>,
    } else {
    }
    %c2048_i32 = arith.constant 2048 : i32
    %3 = arith.muli %arg0, %c2048_i32 : i32
    %4 = tpu.assume_multiple %3, 2048 : i32
    %c0 = arith.constant 0 : index
    %c0_1 = arith.constant 0 : index
    %5 = vector.load %arg10[%c0, %c0_1] : memref<2x256xf32, #tpu.memory_space<vmem>>, vector<2x256xf32>
    %c0_2 = arith.constant 0 : index
    %6 = arith.index_cast %4 : i32 to index
    %7 = vector.load %arg9[%c0_2, %6] : memref<2x4096xbf16, #tpu.memory_space<vmem>>, vector<2x2048xbf16>
    %c0_3 = arith.constant 0 : index
    %c0_4 = arith.constant 0 : index
    %8 = vector.load %arg4[%c0_3, %c0_4] : memref<2048x256xbf16, #tpu.memory_space<vmem>>, vector<2048x256xbf16>
    %cst = arith.constant dense<0.000000e+00> : vector<2x256xf32>
    %9 = tpu.matmul %7, %8, %cst {dimension_numbers = #tpu.dot_dimension_numbers<[1], [0], [0], [1], [0, 0, 1, 1], [], []>} : vector<2x2048xbf16>, vector<2048x256xbf16>, vector<2x256xf32> -> vector<2x256xf32>
    %10 = arith.addf %5, %9 : vector<2x256xf32>
    %c0_5 = arith.constant 0 : index
    %c0_6 = arith.constant 0 : index
    %11 = vector.load %arg10[%c0_5, %c0_6] : memref<2x256xf32, #tpu.memory_space<vmem>>, vector<2x256xf32>
    tpu.vector_store %arg10[%c0_5, %c0_6], %10 {strides = array<i32>} : memref<2x256xf32, #tpu.memory_space<vmem>>, vector<2x256xf32>,
    %c1_i32 = arith.constant 1 : i32
    %12 = arith.cmpi eq, %arg0, %c1_i32 : i32
    %13 = arith.extui %12 : i1 to i32
    %c0_i32_7 = arith.constant 0 : i32
    %14 = arith.cmpi ne, %13, %c0_i32_7 : i32
    scf.if %14 {
      %c0_8 = arith.constant 0 : index
      %c0_9 = arith.constant 0 : index
      %15 = vector.load %arg10[%c0_8, %c0_9] : memref<2x256xf32, #tpu.memory_space<vmem>>, vector<2x256xf32>
      %c0_10 = arith.constant 0 : index
      %c0_11 = arith.constant 0 : index
      %16 = vector.load %arg5[%c0_10, %c0_11] : memref<1x256xf32, #tpu.memory_space<vmem>>, vector<1x256xf32>
      %17 = vector.broadcast %16 : vector<1x256xf32> to vector<2x256xf32>
      %18 = arith.addf %15, %17 : vector<2x256xf32>
      %cst_12 = arith.constant 0.000000e+00 : f32
      %19 = vector.broadcast %cst_12 : f32 to vector<2x256xf32>
      %20 = arith.maximumf %18, %19 : vector<2x256xf32>
      %c0_13 = arith.constant 0 : index
      %c0_14 = arith.constant 0 : index
      %21 = vector.load %arg6[%c0_13, %c0_14] : memref<256x10xf32, #tpu.memory_space<vmem>>, vector<256x10xf32>
      %cst_15 = arith.constant dense<0.000000e+00> : vector<2x10xf32>
      %22 = tpu.matmul %20, %21, %cst_15 {dimension_numbers = #tpu.dot_dimension_numbers<[1], [0], [0], [1], [0, 0, 1, 1], [], []>, precision = #tpu.contract_precision<fp32>} : vector<2x256xf32>, vector<256x10xf32>, vector<2x10xf32> -> vector<2x10xf32>
      %c0_16 = arith.constant 0 : index
      %c0_17 = arith.constant 0 : index
      %23 = vector.load %arg7[%c0_16, %c0_17] : memref<1x10xf32, #tpu.memory_space<vmem>>, vector<1x10xf32>
      %24 = vector.broadcast %23 : vector<1x10xf32> to vector<2x10xf32>
      %25 = arith.addf %22, %24 : vector<2x10xf32>
      %c0_18 = arith.constant 0 : index
      %c0_19 = arith.constant 0 : index
      %26 = vector.load %arg8[%c0_18, %c0_19] : memref<2x10xf32, #tpu.memory_space<vmem>>, vector<2x10xf32>
      tpu.vector_store %arg8[%c0_18, %c0_19], %25 {strides = array<i32>} : memref<2x10xf32, #tpu.memory_space<vmem>>, vector<2x10xf32>,
    } else {
    }
    return
  }
  func.func @transform_0(%arg0: i32) -> (i32, i32) {
    %c0_i32 = arith.constant 0 : i32
    %c0_i32_0 = arith.constant 0 : i32
    %c0_i32_1 = arith.constant 0 : i32
    return %c0_i32, %c0_i32_0 : i32, i32
  }
  func.func @transform_1(%arg0: i32) -> (i32, i32) {
    %c0_i32 = arith.constant 0 : i32
    %c0_i32_0 = arith.constant 0 : i32
    %c0_i32_1 = arith.constant 0 : i32
    return %c0_i32, %c0_i32_0 : i32, i32
  }
  func.func @transform_2(%arg0: i32) -> (i32, i32) {
    %c0_i32 = arith.constant 0 : i32
    %c0_i32_0 = arith.constant 0 : i32
    %c0_i32_1 = arith.constant 0 : i32
    return %c0_i32, %c0_i32_0 : i32, i32
  }
  func.func @transform_3(%arg0: i32) -> (i32, i32) {
    %c0_i32 = arith.constant 0 : i32
    %c0_i32_0 = arith.constant 0 : i32
    return %arg0, %c0_i32 : i32, i32
  }
  func.func @transform_4(%arg0: i32) -> (i32, i32) {
    %c0_i32 = arith.constant 0 : i32
    %c0_i32_0 = arith.constant 0 : i32
    %c0_i32_1 = arith.constant 0 : i32
    return %c0_i32, %c0_i32_0 : i32, i32
  }
  func.func @transform_5(%arg0: i32) -> (i32, i32) {
    %c0_i32 = arith.constant 0 : i32
    %c0_i32_0 = arith.constant 0 : i32
    %c0_i32_1 = arith.constant 0 : i32
    return %c0_i32, %c0_i32_0 : i32, i32
  }
  func.func @transform_6(%arg0: i32) -> (i32, i32) {
    %c0_i32 = arith.constant 0 : i32
    %c0_i32_0 = arith.constant 0 : i32
    %c0_i32_1 = arith.constant 0 : i32
    return %c0_i32, %c0_i32_0 : i32, i32
  }
  func.func @transform_7(%arg0: i32) -> (i32, i32) {
    %c0_i32 = arith.constant 0 : i32
    %c0_i32_0 = arith.constant 0 : i32
    %c0_i32_1 = arith.constant 0 : i32
    return %c0_i32, %c0_i32_0 : i32, i32
  }
}

</mosaic_0001>

<bundles_post_ra>
// kernel: forward.1
= control target key start
LH: loop header
LB: loop body
LE: loop exit
PB: predicated region body
PF: predicated region fallthrough
CT: control target
= control target key end

     0   :  { %12 = vsyncpa [#allocation5], 0  ;;  %s7990_s24 = smov 0   ;;  %s10027_s0 = inlined_call_operand.vmem [shape: f32[16,2048], index: 0, kind: input, shape index: {}]   ;;  %s10028_s1 = inlined_call_operand.vmem [shape: f32[16,16], index: 1, kind: input, shape index: {}]   ;;  %s10029_s2 = inlined_call_operand.vmem [shape: f32[16,1], index: 2, kind: input, shape index: {}]   ;;  %s10030_s3 = inlined_call_operand.vmem [shape: bf16[4096,256], index: 3, kind: input, shape index: {}]   ;;  %s10031_s4 = inlined_call_operand.vmem [shape: f32[1,256], index: 4, kind: input, shape index: {}]   ;;  %s10032_s5 = inlined_call_operand.vmem [shape: f32[256,10], index: 5, kind: input, shape index: {}]   ;;  %s10033_s6 = inlined_call_operand.vmem [shape: f32[1,10], index: 6, kind: input, shape index: {}]   ;;  %s10034_s7 = inlined_call_operand.hbm [shape: f32[2,10], index: 7, kind: output, shape index: {}]  }
   0x1 LB: > { %s7996_s25 = sadd.s32 4294967295, %s7944_s24   ;;  %p6586_p0 = scmp.ge.s32.totalorder %s7944_s24, 1  ;;  %s7944_s24 = sphi %s7990_s24, %s18_s24  }
   0x2   : > { %p235_p1 = scmp.lt.s32.totalorder %s7944_s24, 3 }
   0x4   : > { %p236_p2 = pnand %p6586_p0, %p235_p1 }
   0x5   : > { %s6587_s26 = sshll.u32 (!%p236_p2), %s7996_s25, 8  ;;  %p6590_p4 = scmp.ne.s32.totalorder (!%p236_p2), %s7996_s25, 0 }
   0x6   : > { %239 = sbr.rel (%p236_p2) target bundleno = 1235 (0x4d3), region = 48  ;;  %p264_p3 = scmp.lt.s32.totalorder (!%p236_p2), %s6587_s26, 511 }
   0xb   : > { %s10098_s26 = smov (!%p264_p3, %s6587_s26), 511  ;;  %273 = sbr.rel (%p6590_p4) target bundleno = 586 (0x24a), region = 52 }
   0xc   : > { %s7621_s27 = sshll.u32 %s10098_s26, 3 }
   0xd   : > { %s8004_s30 = scalar_lea.vmem %s10030_s3, %s7621_s27 }
  0x10   : > { %v292_v0 = vld [vmem:[%s10027_s0 + $0x80] sm:$0xff]  ;;  %vm320_vm0 = vcmask 130048   ;;  %v293_v6 = vld [vmem:[%s10027_s0 + $0x88] sm:$0xff]  ;;  %v7946_v9 = vmov 0   ;;  %v294_v33 = vld [vmem:[%s10027_s0 + $0x90] sm:$0xff]  ;;  %vm3417_vm1 = vcmask 1043456  }
  0x11   : > { %v276_v1 = vld [vmem:[%s10027_s0] sm:$0xff]  ;;  %v341_v3 = vand.u32 4294901760, %v292_v0  ;;  %v275_v7 = vld [vmem:[%s10028_s1 + $0x8] sm:$0xff]  ;;  %7896 = vset.pattern.permute.xlu0 %v7946_v9  ;;  %v531_v11 = vand.u32 4294901760, %v293_v6  ;;  %v8062_v39 = vand.u32 4294901760, %v294_v33  ;;  %v278_v44 = vld [vmem:[%s10027_s0 + $0x10] sm:$0xff] }
  0x12   : > { %v274_v2 = vld [vmem:[%s10028_s1] sm:$0xff]  ;;  %v8016_v4 = vand.u32 4294901760, %v276_v1  ;;  %v277_v8 = vld [vmem:[%s10027_s0 + $0x8] sm:$0xff]  ;;  %v325_v12 = vsel %vm320_vm0, %v275_v7, 0  ;;  %v723_v45 = vand.u32 4294901760, %v278_v44  ;;  %v295_v50 = vld [vmem:[%s10027_s0 + $0x98] sm:$0xff] }
  0x13   : > { %v322_v5 = vsel %vm320_vm0, %v274_v2, 0  ;;  %v8029_v13 = vand.u32 4294901760, %v277_v8  ;;  %v308_v14 = vld [vmem:[%s10029_s2] sm:$0xff]  ;;  %v377_v15 = vsub.f32 %v292_v0, %v341_v3  ;;  %342 = vmatpush.msra.mxu0 %v341_v3  ;;  %443 = vmatpush.msra.mxu3 %v341_v3  ;;  %v8035_v17 = vand.u32 4294901760, %v325_v12  ;;  %v309_v41 = vld [vmem:[%s10029_s2 + $0x8] sm:$0xff]  ;;  %v279_v57 = vld [vmem:[%s10027_s0 + $0x18] sm:$0xff] }
  0x14   : > { %v8027_v10 = vand.u32 4294901760, %v322_v5  ;;  %v383_v16 = vsub.f32 %v276_v1, %v8016_v4  ;;  %v567_v19 = vsub.f32 %v293_v6, %v531_v11  ;;  %312 = vperm.xlu0 %7896, %v308_v14   ;;  %v757_v42 = vsub.f32 %v294_v33, %v8062_v39  ;;  %v296_v1 = vld [vmem:[%s10027_s0 + $0xa0] sm:$0xff] }
  0x15   : > { %v573_v20 = vsub.f32 %v277_v8, %v8029_v13  ;;  %413 = vmatpush.msra.mxu2 %v377_v15  ;;  %344 = vmatpush.msra.mxu0 %v8016_v4  ;;  %v378_v21 = vand.u32 4294901760, %v377_v15  ;;  %v8043_v23 = vsub.f32 %v325_v12, %v8035_v17  ;;  %v763_v47 = vsub.f32 %v278_v44, %v723_v45 }
  0x16   : > { %v8038_v18 = vsub.f32 %v322_v5, %v8027_v10  ;;  %v384_v22 = vand.u32 4294901760, %v383_v16  ;;  %445 = vmatpush.msra.mxu3 %v8016_v4  ;;  %v568_v25 = vand.u32 4294901760, %v567_v19  ;;  %v758_v46 = vand.u32 4294901760, %v757_v42 }
  0x17   : > { %v574_v26 = vand.u32 4294901760, %v573_v20  ;;  %416 = vmatpush.msra.mxu2 %v383_v16  ;;  %v379_v27 = vsub.f32 %v377_v15, %v378_v21  ;;  %476 = vmatpush.msrb.mxu0 %v378_v21  ;;  %v8054_v31 = vand.u32 4294901760, %v8043_v23  ;;  %v764_v48 = vand.u32 4294901760, %v763_v47 }
  0x18   : > { %v8047_v24 = vand.u32 4294901760, %v8038_v18  ;;  %v385_v28 = vsub.f32 %v383_v16, %v384_v22  ;;  %419 = vmatmul.f32.vlgmr.msra.gmra.mxu2 %v8038_v18  ;;  %v569_v30 = vsub.f32 %v567_v19, %v568_v25  ;;  %v759_v49 = vsub.f32 %v757_v42, %v758_v46 }
  0x19   : > { %v575_v32 = vsub.f32 %v573_v20, %v574_v26  ;;  %532 = vmatpush.msrb.mxu2 %v531_v11  ;;  %v380_v34 = vand.u32 4294901760, %v379_v27  ;;  %480 = vmatpush.msrb.mxu0 %v384_v22  ;;  %v356_v40 = vsub.f32 %v8043_v23, %v8054_v31  ;;  %v765_v51 = vsub.f32 %v763_v47, %v764_v48 }
  0x1a   : > { %v348_v29 = vsub.f32 %v8038_v18, %v8047_v24  ;;  %449 = vmatmul.f32.vlgmr.msra.gmra.mxu3 %v8047_v24  ;;  %v386_v35 = vand.u32 4294901760, %v385_v28  ;;  %v570_v37 = vand.u32 4294901760, %v569_v30  ;;  %v911_v52 = vand.u32 4294901760, %v295_v50  ;;  %v298_v30 = vld [vmem:[%s10027_s0 + $0xb0] sm:$0xff] }
  0x1b   : > { %v576_v38 = vand.u32 4294901760, %v575_v32  ;;  %381 = vmatpush.msra.mxu1 %v380_v34  ;;  %534 = vmatpush.msrb.mxu2 %v8029_v13  ;;  %v8073_v43 = vand.u32 4294901760, %v356_v40  ;;  %v760_v53 = vand.u32 4294901760, %v759_v49  ;;  %v766_v55 = vand.u32 4294901760, %v765_v51  ;;  %v282_v34 = vld [vmem:[%s10027_s0 + $0x30] sm:$0xff]  ;;  %v283_v49 = vld [vmem:[%s10027_s0 + $0x38] sm:$0xff] }
  0x1c   : > { %v8059_v36 = vand.u32 4294901760, %v348_v29  ;;  %571 = vmatpush.msrb.mxu3 %v570_v37  ;;  %317 = vperm.xlu0 %7896, %v309_v41   ;;  %v947_v54 = vsub.f32 %v295_v50, %v911_v52  ;;  %v913_v59 = vand.u32 4294901760, %v279_v57  ;;  %v1101_v2 = vand.u32 4294901760, %v296_v1 }
  0x1d   : > { %387 = vmatpush.msra.mxu1 %v386_v35  ;;  %666 = vmatpush.msra.mxu2 %v568_v25  ;;  %v8150_v32 = vand.u32 4294901760, %v298_v30  ;;  %v1483_v37 = vand.u32 4294901760, %v282_v34  ;;  %v8183_v51 = vand.u32 4294901760, %v283_v49  ;;  %vm3624_vm2 = vcmask 1040384  }
  0x1e   : > { %350 = vmatmul.f32.vlgmr.msra.gmra.mxu0 %v8059_v36  ;;  %389 = vmatmul.f32.vlgmr.msra.gmra.mxu1 %v8027_v10  ;;  %v948_v56 = vand.u32 4294901760, %v947_v54  ;;  %v953_v60 = vsub.f32 %v279_v57, %v913_v59  ;;  %vm3720_vm3 = vcmask 1042434   ;;  %vm3726_vm4 = vcmask 1044484  }
  0x1f   : > { %577 = vmatpush.msrb.mxu3 %v576_v38  ;;  %505 = vmatpush.msrb.mxu1 %v341_v3  ;;  %v1137_v3 = vsub.f32 %v296_v1, %v1101_v2  ;;  %v1517_v33 = vsub.f32 %v298_v30, %v8150_v32  ;;  %v1523_v38 = vsub.f32 %v282_v34, %v1483_v37  ;;  %vm3730_vm5 = vcmask 1046534  }
  0x20   : > { %603 = vmatpush.msra.mxu0 %v567_v19  ;;  %424 = vmatmul.f32.gmra.mxu2 %v8043_v23  ;;  %v949_v58 = vsub.f32 %v947_v54, %v948_v56  ;;  %v954_v62 = vand.u32 4294901760, %v953_v60  ;;  %vm3724_vm6 = vcmask 1041408   ;;  %vm3734_vm7 = vcmask 1045508  }
  0x21   : > { %507 = vmatpush.msrb.mxu1 %v8016_v4  ;;  %695 = vmatpush.msra.mxu3 %v531_v11  ;;  %v280_v4 = vld [vmem:[%s10027_s0 + $0x20] sm:$0xff]  ;;  %v1138_v6 = vand.u32 4294901760, %v1137_v3  ;;  %v1518_v35 = vand.u32 4294901760, %v1517_v33  ;;  %v1524_v40 = vand.u32 4294901760, %v1523_v38 }
  0x22   : > { %455 = vmatmul.f32.gmra.mxu3 %v8054_v31  ;;  %670 = vmatpush.msra.mxu2 %v574_v26  ;;  %v950_v61 = vand.u32 4294901760, %v949_v58  ;;  %v955_v63 = vsub.f32 %v953_v60, %v954_v62  ;;  %v1103_v5 = vand.u32 4294901760, %v280_v4 }
  0x23   : > { %633 = vmatpush.msra.mxu1 %v531_v11  ;;  %606 = vmatpush.msra.mxu0 %v573_v20  ;;  %v1139_v9 = vsub.f32 %v1137_v3, %v1138_v6  ;;  %v297_v11 = vld [vmem:[%s10027_s0 + $0xa8] sm:$0xff]  ;;  %v1525_v41 = vsub.f32 %v1523_v38, %v1524_v40 }
  0x24   : > { %697 = vmatpush.msra.mxu3 %v8029_v13  ;;  %v956_v0 = vand.u32 4294901760, %v955_v63  ;;  %v1143_v7 = vsub.f32 %v280_v4, %v1103_v5  ;;  %v281_v20 = vld [vmem:[%s10027_s0 + $0x28] sm:$0xff] }
  0x25   : > { %635 = vmatpush.msra.mxu1 %v8029_v13  ;;  %v1291_v13 = vand.u32 4294901760, %v297_v11  ;;  %v1140_v14 = vand.u32 4294901760, %v1139_v9  ;;  %v1293_v22 = vand.u32 4294901760, %v281_v20 }
  0x26   : > { %358 = vmatmul.f32.gmra.mxu0 %v8073_v43  ;;  %393 = vmatmul.f32.gmra.mxu1 %v8035_v17  ;;  %v1144_v8 = vand.u32 4294901760, %v1143_v7 }
  0x27   : > { %v1327_v15 = vsub.f32 %v297_v11, %v1291_v13  ;;  %v1333_v25 = vsub.f32 %v281_v20, %v1293_v22 }
  0x28   : > { %540 = vmatmul.f32.vlgmr.msrb.gmra.mxu2 %v8059_v36  ;;  %v1145_v12 = vsub.f32 %v1143_v7, %v1144_v8 }
  0x29   : > { %793 = vmatpush.msrb.mxu2 %v757_v42  ;;  %v1328_v19 = vand.u32 4294901760, %v1327_v15  ;;  %v1334_v27 = vand.u32 4294901760, %v1333_v25  ;;  %v299_v42 = vld [vmem:[%s10027_s0 + $0xb8] sm:$0xff] }
  0x2a   : > { %579 = vmatmul.f32.vlgmr.msrb.gmra.mxu3 %v8027_v10  ;;  %v1146_v16 = vand.u32 4294901760, %v1145_v12 }
  0x2b   : > { %823 = vmatpush.msrb.mxu3 %v8062_v39  ;;  %796 = vmatpush.msrb.mxu2 %v763_v47  ;;  %v1329_v21 = vsub.f32 %v1327_v15, %v1328_v19  ;;  %v1335_v28 = vsub.f32 %v1333_v25, %v1334_v27 }
  0x2d   : > { %825 = vmatpush.msrb.mxu3 %v723_v45  ;;  %v1330_v26 = vand.u32 4294901760, %v1329_v21  ;;  %v1336_v29 = vand.u32 4294901760, %v1335_v28 }
  0x2e   : > { %482 = vmatmul.f32.vlgmr.msrb.gmra.mxu0 %v8027_v10  ;;  %509 = vmatmul.f32.vlgmr.msrb.gmra.mxu1 %v8027_v10 }
  0x2f   : > { %722 = vmatpush.msrb.mxu0 %v8062_v39  ;;  %761 = vmatpush.msrb.mxu1 %v760_v53 }
  0x30   : > { %548 = vmatmul.f32.gmra.mxu2 %v8073_v43 }
  0x31   : > { %724 = vmatpush.msrb.mxu0 %v723_v45  ;;  %767 = vmatpush.msrb.mxu1 %v766_v55 }
  0x32   : > { %583 = vmatmul.f32.gmra.mxu3 %v8035_v17 }
  0x36   : > { %486 = vmatmul.f32.gmra.mxu0 %v8035_v17  ;;  %513 = vmatmul.f32.gmra.mxu1 %v8035_v17 }
  0x38   : > { %672 = vmatmul.f32.vlgmr.msra.gmra.mxu2 %v8027_v10 }
  0x39   : > { %912 = vmatpush.msra.mxu2 %v911_v52 }
  0x3a   : > { %699 = vmatmul.f32.vlgmr.msra.gmra.mxu3 %v8027_v10 }
  0x3b   : > { %951 = vmatpush.msra.mxu3 %v950_v61  ;;  %914 = vmatpush.msra.mxu2 %v913_v59 }
  0x3d   : > { %957 = vmatpush.msra.mxu3 %v956_v0 }
  0x3e   : > { %609 = vmatmul.f32.vlgmr.msra.gmra.mxu0 %v8038_v18  ;;  %639 = vmatmul.f32.vlgmr.msra.gmra.mxu1 %v8047_v24 }
  0x3f   : > { %856 = vmatpush.msra.mxu0 %v758_v46  ;;  %885 = vmatpush.msra.mxu1 %v8062_v39  ;;  %v1519_v39 = vsub.f32 %v1517_v33, %v1518_v35  ;;  %v1526_v46 = vand.u32 4294901760, %v1525_v41 }
  0x40   : > { %676 = vmatmul.f32.gmra.mxu2 %v8035_v17 }
  0x41   : > { %860 = vmatpush.msra.mxu0 %v764_v48  ;;  %887 = vmatpush.msra.mxu1 %v723_v45  ;;  %v1520_v44 = vand.u32 4294901760, %v1519_v39  ;;  %v8168_v45 = vand.u32 4294901760, %v299_v42 }
  0x42   : > { %703 = vmatmul.f32.gmra.mxu3 %v8035_v17 }
  0x43   : > { %v8173_v47 = vsub.f32 %v299_v42, %v8168_v45  ;;  %v301_v42 = vld [vmem:[%s10027_s0 + $0xc8] sm:$0xff] }
  0x45   : > { %v1708_v48 = vand.u32 4294901760, %v8173_v47 }
  0x46   : > { %614 = vmatmul.f32.gmra.mxu0 %v8043_v23  ;;  %645 = vmatmul.f32.gmra.mxu1 %v8054_v31 }
  0x47   : > { %v1709_v50 = vsub.f32 %v8173_v47, %v1708_v48 }
  0x48   : > { %799 = vmatmul.f32.vlgmr.msrb.gmra.mxu2 %v8038_v18 }
  0x49   : > { %1046 = vmatpush.msrb.mxu2 %v948_v56 }
  0x4a   : > { %829 = vmatmul.f32.vlgmr.msrb.gmra.mxu3 %v8047_v24 }
  0x4b   : > { %1075 = vmatpush.msrb.mxu3 %v911_v52  ;;  %1050 = vmatpush.msrb.mxu2 %v954_v62 }
  0x4d   : > { %1077 = vmatpush.msrb.mxu3 %v913_v59 }
  0x4e   : > { %730 = vmatmul.f32.vlgmr.msrb.gmra.mxu0 %v8059_v36  ;;  %769 = vmatmul.f32.vlgmr.msrb.gmra.mxu1 %v8027_v10 }
  0x4f   : > { %983 = vmatpush.msrb.mxu0 %v947_v54  ;;  %1013 = vmatpush.msrb.mxu1 %v911_v52  ;;  %v1713_v52 = vsub.f32 %v283_v49, %v8183_v51  ;;  %v1710_v54 = vand.u32 4294901760, %v1709_v50 }
  0x50   : > { %804 = vmatmul.f32.gmra.mxu2 %v8043_v23 }
  0x51   : > { %986 = vmatpush.msrb.mxu0 %v953_v60  ;;  %1015 = vmatpush.msrb.mxu1 %v913_v59  ;;  %v1714_v55 = vand.u32 4294901760, %v1713_v52 }
  0x52   : > { %835 = vmatmul.f32.gmra.mxu3 %v8054_v31 }
  0x53   : > { %v1715_v56 = vsub.f32 %v1713_v52, %v1714_v55 }
  0x55   : > { %v1716_v58 = vand.u32 4294901760, %v1715_v56  ;;  %v285_v56 = vld [vmem:[%s10027_s0 + $0x48] sm:$0xff] }
  0x56   : > { %738 = vmatmul.f32.gmra.mxu0 %v8073_v43  ;;  %773 = vmatmul.f32.gmra.mxu1 %v8035_v17 }
  0x58   : > { %920 = vmatmul.f32.vlgmr.msra.gmra.mxu2 %v8059_v36 }
  0x59   : > { %1173 = vmatpush.msra.mxu2 %v1137_v3 }
  0x5a   : > { %959 = vmatmul.f32.vlgmr.msra.gmra.mxu3 %v8027_v10 }
  0x5b   : > { %1203 = vmatpush.msra.mxu3 %v1101_v2  ;;  %1176 = vmatpush.msra.mxu2 %v1143_v7 }
  0x5d   : > { %1205 = vmatpush.msra.mxu3 %v1103_v5 }
  0x5e   : > { %862 = vmatmul.f32.vlgmr.msra.gmra.mxu0 %v8027_v10  ;;  %889 = vmatmul.f32.vlgmr.msra.gmra.mxu1 %v8027_v10 }
  0x5f   : > { %1102 = vmatpush.msra.mxu0 %v1101_v2  ;;  %1141 = vmatpush.msra.mxu1 %v1140_v14 }
  0x60   : > { %928 = vmatmul.f32.gmra.mxu2 %v8073_v43 }
  0x61   : > { %1104 = vmatpush.msra.mxu0 %v1103_v5  ;;  %1147 = vmatpush.msra.mxu1 %v1146_v16 }
  0x62   : > { %963 = vmatmul.f32.gmra.mxu3 %v8035_v17 }
  0x66   : > { %866 = vmatmul.f32.gmra.mxu0 %v8035_v17  ;;  %893 = vmatmul.f32.gmra.mxu1 %v8035_v17 }
  0x68   : > { %1052 = vmatmul.f32.vlgmr.msrb.gmra.mxu2 %v8027_v10 }
  0x69   : > { %1292 = vmatpush.msrb.mxu2 %v1291_v13 }
  0x6a   : > { %1079 = vmatmul.f32.vlgmr.msrb.gmra.mxu3 %v8027_v10 }
  0x6b   : > { %1331 = vmatpush.msrb.mxu3 %v1330_v26  ;;  %1294 = vmatpush.msrb.mxu2 %v1293_v22  ;;  %v284_v26 = vld [vmem:[%s10027_s0 + $0x40] sm:$0xff] }
  0x6c   : > { %v8241_v30 = vand.u32 4294901760, %v284_v26 }
  0x6d   : > { %1337 = vmatpush.msrb.mxu3 %v1336_v29 }
  0x6e   : > { %989 = vmatmul.f32.vlgmr.msrb.gmra.mxu0 %v8038_v18  ;;  %1019 = vmatmul.f32.vlgmr.msrb.gmra.mxu1 %v8047_v24  ;;  %v8246_v34 = vsub.f32 %v284_v26, %v8241_v30 }
  0x6f   : > { %1236 = vmatpush.msrb.mxu0 %v1138_v6  ;;  %1265 = vmatpush.msrb.mxu1 %v1101_v2 }
  0x70   : > { %1056 = vmatmul.f32.gmra.mxu2 %v8035_v17 }
  0x71   : > { %1240 = vmatpush.msrb.mxu0 %v1144_v8  ;;  %1267 = vmatpush.msrb.mxu1 %v1103_v5 }
  0x72   : > { %1083 = vmatmul.f32.gmra.mxu3 %v8035_v17 }
  0x76   : > { %994 = vmatmul.f32.gmra.mxu0 %v8043_v23  ;;  %1025 = vmatmul.f32.gmra.mxu1 %v8054_v31 }
  0x78   : > { %1179 = vmatmul.f32.vlgmr.msra.gmra.mxu2 %v8038_v18 }
  0x79   : > { %1426 = vmatpush.msra.mxu2 %v1328_v19 }
  0x7a   : > { %1209 = vmatmul.f32.vlgmr.msra.gmra.mxu3 %v8047_v24 }
  0x7b   : > { %1455 = vmatpush.msra.mxu3 %v1291_v13  ;;  %1430 = vmatpush.msra.mxu2 %v1334_v27 }
  0x7d   : > { %1457 = vmatpush.msra.mxu3 %v1293_v22 }
  0x7e   : > { %1110 = vmatmul.f32.vlgmr.msra.gmra.mxu0 %v8059_v36  ;;  %1149 = vmatmul.f32.vlgmr.msra.gmra.mxu1 %v8027_v10 }
  0x7f   : > { %1363 = vmatpush.msra.mxu0 %v1327_v15  ;;  %1393 = vmatpush.msra.mxu1 %v1291_v13  ;;  %v300_v13 = vld [vmem:[%s10027_s0 + $0xc0] sm:$0xff] }
  0x80   : > { %1184 = vmatmul.f32.gmra.mxu2 %v8043_v23  ;;  %v8220_v16 = vand.u32 4294901760, %v300_v13 }
  0x81   : > { %1366 = vmatpush.msra.mxu0 %v1333_v25  ;;  %1395 = vmatpush.msra.mxu1 %v1293_v22 }
  0x82   : > { %1215 = vmatmul.f32.gmra.mxu3 %v8054_v31  ;;  %v8228_v22 = vsub.f32 %v300_v13, %v8220_v16 }
  0x84   : > { %v1898_v29 = vand.u32 4294901760, %v8228_v22 }
  0x86   : > { %1118 = vmatmul.f32.gmra.mxu0 %v8073_v43  ;;  %1153 = vmatmul.f32.gmra.mxu1 %v8035_v17  ;;  %v8187_v53 = vpop.permute.xlu0 %312 }
  0x88   : > { %1300 = vmatmul.f32.vlgmr.msrb.gmra.mxu2 %v8059_v36 }
  0x89   : > { %1553 = vmatpush.msrb.mxu2 %v1517_v33 }
  0x8a   : > { %1339 = vmatmul.f32.vlgmr.msrb.gmra.mxu3 %v8027_v10 }
  0x8b   : > { %1583 = vmatpush.msrb.mxu3 %v8150_v32  ;;  %1556 = vmatpush.msrb.mxu2 %v1523_v38  ;;  %v1904_v38 = vand.u32 4294901760, %v8246_v34 }
  0x8d   : > { %1585 = vmatpush.msrb.mxu3 %v1483_v37 }
  0x8e   : > { %1242 = vmatmul.f32.vlgmr.msrb.gmra.mxu0 %v8027_v10  ;;  %1269 = vmatmul.f32.vlgmr.msrb.gmra.mxu1 %v8027_v10  ;;  %v8197_v1 = vpop.permute.xlu0 %317 }
  0x8f   : > { %1482 = vmatpush.msrb.mxu0 %v8150_v32  ;;  %1521 = vmatpush.msrb.mxu1 %v1520_v44 }
  0x90   : > { %1308 = vmatmul.f32.gmra.mxu2 %v8073_v43 }
  0x91   : > { %1484 = vmatpush.msrb.mxu0 %v1483_v37  ;;  %1527 = vmatpush.msrb.mxu1 %v1526_v46 }
  0x92   : > { %1343 = vmatmul.f32.gmra.mxu3 %v8035_v17 }
  0x96   : > { %1246 = vmatmul.f32.gmra.mxu0 %v8035_v17  ;;  %1273 = vmatmul.f32.gmra.mxu1 %v8035_v17 }
  0x98   : > { %1432 = vmatmul.f32.vlgmr.msra.gmra.mxu2 %v8027_v10 }
  0x99   : > { %1672 = vmatpush.msra.mxu2 %v8168_v45 }
  0x9a   : > { %1459 = vmatmul.f32.vlgmr.msra.gmra.mxu3 %v8027_v10 }
  0x9b   : > { %v351_v57 = vpop.f32.mrf.mxu0  ;;  %1711 = vmatpush.msra.mxu3 %v1710_v54  ;;  %v390_v60 = vpop.f32.mrf.mxu1  ;;  %1674 = vmatpush.msra.mxu2 %v8183_v51 }
  0x9c   : > { %v352_v59 = vadd.f32 %v351_v57, %v8187_v53  ;;  %v420_v61 = vpop.f32.mrf.mxu2 }
  0x9d   : > { %1717 = vmatpush.msra.mxu3 %v1716_v58  ;;  %v450_v63 = vpop.f32.mrf.mxu3  ;;  %v8282_v58 = vand.u32 4294901760, %v285_v56 }
  0x9e   : > { %v391_v62 = vadd.f32 %v390_v60, %v352_v59  ;;  %1369 = vmatmul.f32.vlgmr.msra.gmra.mxu0 %v8038_v18  ;;  %1399 = vmatmul.f32.vlgmr.msra.gmra.mxu1 %v8047_v24 }
  0x9f   : > { %1616 = vmatpush.msra.mxu0 %v1518_v35  ;;  %1645 = vmatpush.msra.mxu1 %v8150_v32 }
  0xa0   : > { %v421_v0 = vadd.f32 %v420_v61, %v391_v62  ;;  %1436 = vmatmul.f32.gmra.mxu2 %v8035_v17 }
  0xa1   : > { %1620 = vmatpush.msra.mxu0 %v1524_v40  ;;  %1647 = vmatpush.msra.mxu1 %v1483_v37  ;;  %v1899_v37 = vsub.f32 %v8228_v22, %v1898_v29  ;;  %v1905_v40 = vsub.f32 %v8246_v34, %v1904_v38 }
  0xa2   : > { %v8200_v2 = vadd.f32 %v450_v63, %v421_v0  ;;  %1463 = vmatmul.f32.gmra.mxu3 %v8035_v17  ;;  %v8286_v63 = vsub.f32 %v285_v56, %v8282_v58 }
  0xa3   : > { %v359_v3 = vpop.f32.mrf.mxu0  ;;  %v394_v5 = vpop.f32.mrf.mxu1  ;;  %v1900_v46 = vand.u32 4294901760, %v1899_v37  ;;  %v1906_v50 = vand.u32 4294901760, %v1905_v40 }
  0xa4   : > { %v360_v4 = vadd.f32 %v359_v3, %v8197_v1  ;;  %v425_v6 = vpop.f32.mrf.mxu2 }
  0xa5   : > { %v456_v8 = vpop.f32.mrf.mxu3 }
  0xa6   : > { %v395_v7 = vadd.f32 %v394_v5, %v360_v4  ;;  %1374 = vmatmul.f32.gmra.mxu0 %v8043_v23  ;;  %1405 = vmatmul.f32.gmra.mxu1 %v8054_v31  ;;  %v2094_v5 = vand.u32 4294901760, %v8286_v63 }
  0xa8   : > { %v426_v9 = vadd.f32 %v425_v6, %v395_v7  ;;  %1559 = vmatmul.f32.vlgmr.msrb.gmra.mxu2 %v8038_v18  ;;  %v2095_v7 = vsub.f32 %v8286_v63, %v2094_v5 }
  0xa9   : > { %1806 = vmatpush.msrb.mxu2 %v1708_v48 }
  0xaa   : > { %v8207_v11 = vadd.f32 %v456_v8, %v426_v9  ;;  %1589 = vmatmul.f32.vlgmr.msrb.gmra.mxu3 %v8047_v24  ;;  %v2096_v13 = vand.u32 4294901760, %v2095_v7 }
  0xab   : > { %v8211_v12 = vpop.f32.mrf.mxu0  ;;  %1835 = vmatpush.msrb.mxu3 %v8168_v45  ;;  %v8217_v14 = vpop.f32.mrf.mxu1  ;;  %1810 = vmatpush.msrb.mxu2 %v1714_v55 }
  0xac   : > { %v541_v15 = vpop.f32.mrf.mxu2 }
  0xad   : > { %1837 = vmatpush.msrb.mxu3 %v8183_v51  ;;  %v542_v19 = vadd.f32 %v541_v15, %v8187_v53  ;;  %v580_v20 = vpop.f32.mrf.mxu3 }
  0xae   : > { %1490 = vmatmul.f32.vlgmr.msrb.gmra.mxu0 %v8059_v36  ;;  %1529 = vmatmul.f32.vlgmr.msrb.gmra.mxu1 %v8027_v10 }
  0xaf   : > { %1743 = vmatpush.msrb.mxu0 %v8173_v47  ;;  %v581_v21 = vadd.f32 %v580_v20, %v542_v19  ;;  %1773 = vmatpush.msrb.mxu1 %v8168_v45  ;;  %v8265_v47 = vand.u32 4294901760, %v301_v42 }
  0xb0   : > { %1564 = vmatmul.f32.gmra.mxu2 %v8043_v23 }
  0xb1   : > { %1746 = vmatpush.msrb.mxu0 %v1713_v52  ;;  %1775 = vmatpush.msrb.mxu1 %v8183_v51  ;;  %v8270_v51 = vsub.f32 %v301_v42, %v8265_v47 }
  0xb2   : > { %1595 = vmatmul.f32.gmra.mxu3 %v8054_v31 }
  0xb3   : > { %v8232_v25 = vpop.f32.mrf.mxu0  ;;  %v8238_v27 = vpop.f32.mrf.mxu1  ;;  %v2088_v55 = vand.u32 4294901760, %v8270_v51 }
  0xb4   : > { %v549_v28 = vpop.f32.mrf.mxu2 }
  0xb5   : > { %v550_v32 = vadd.f32 %v549_v28, %v8197_v1  ;;  %v584_v33 = vpop.f32.mrf.mxu3  ;;  %v2089_v60 = vsub.f32 %v8270_v51, %v2088_v55 }
  0xb6   : > { %1498 = vmatmul.f32.gmra.mxu0 %v8073_v43  ;;  %1533 = vmatmul.f32.gmra.mxu1 %v8035_v17 }
  0xb7   : > { %v585_v35 = vadd.f32 %v584_v33, %v550_v32  ;;  %v2090_v4 = vand.u32 4294901760, %v2089_v60 }
  0xb8   : > { %1680 = vmatmul.f32.vlgmr.msra.gmra.mxu2 %v8059_v36 }
  0xb9   : > { %1933 = vmatpush.msra.mxu2 %v8228_v22 }
  0xba   : > { %1719 = vmatmul.f32.vlgmr.msra.gmra.mxu3 %v8027_v10 }
  0xbb   : > { %v610_v39 = vpop.f32.mrf.mxu0  ;;  %1963 = vmatpush.msra.mxu3 %v8220_v16  ;;  %v640_v44 = vpop.f32.mrf.mxu1  ;;  %1936 = vmatpush.msra.mxu2 %v8246_v34 }
  0xbc   : > { %v611_v41 = vadd.f32 %v610_v39, %v581_v21  ;;  %v673_v45 = vpop.f32.mrf.mxu2 }
  0xbd   : > { %1965 = vmatpush.msra.mxu3 %v8241_v30  ;;  %v700_v49 = vpop.f32.mrf.mxu3 }
  0xbe   : > { %v641_v48 = vadd.f32 %v640_v44, %v611_v41  ;;  %1622 = vmatmul.f32.vlgmr.msra.gmra.mxu0 %v8027_v10  ;;  %1649 = vmatmul.f32.vlgmr.msra.gmra.mxu1 %v8027_v10 }
  0xbf   : > { %1862 = vmatpush.msra.mxu0 %v8220_v16  ;;  %1901 = vmatpush.msra.mxu1 %v1900_v46  ;;  %v302_v46 = vld [vmem:[%s10027_s0 + $0xd0] sm:$0xff] }
  0xc0   : > { %v674_v52 = vadd.f32 %v673_v45, %v641_v48  ;;  %1688 = vmatmul.f32.gmra.mxu2 %v8073_v43  ;;  %v8325_v48 = vand.u32 4294901760, %v302_v46 }
  0xc1   : > { %1864 = vmatpush.msra.mxu0 %v8241_v30  ;;  %1907 = vmatpush.msra.mxu1 %v1906_v50 }
  0xc2   : > { %v8274_v54 = vadd.f32 %v700_v49, %v674_v52  ;;  %1723 = vmatmul.f32.gmra.mxu3 %v8035_v17  ;;  %v488_v49 = vadd.f32 %v8232_v25, %v8207_v11 }
  0xc3   : > { %v615_v57 = vpop.f32.mrf.mxu0  ;;  %v646_v61 = vpop.f32.mrf.mxu1 }
  0xc4   : > { %v616_v59 = vadd.f32 %v615_v57, %v585_v35  ;;  %v677_v62 = vpop.f32.mrf.mxu2  ;;  %v515_v11 = vadd.f32 %v8238_v27, %v488_v49 }
  0xc5   : > { %v704_v3 = vpop.f32.mrf.mxu3 }
  0xc6   : > { %v647_v0 = vadd.f32 %v646_v61, %v616_v59  ;;  %1626 = vmatmul.f32.gmra.mxu0 %v8035_v17  ;;  %1653 = vmatmul.f32.gmra.mxu1 %v8035_v17  ;;  %v3383_v27 = vmax.f32 %v515_v11, 0.0 }
  0xc8   : > { %v678_v6 = vadd.f32 %v677_v62, %v647_v0  ;;  %1812 = vmatmul.f32.vlgmr.msrb.gmra.mxu2 %v8027_v10 }
  0xc9   : > { %2052 = vmatpush.msrb.mxu2 %v8265_v47 }
  0xca   : > { %v8292_v8 = vadd.f32 %v704_v3, %v678_v6  ;;  %1839 = vmatmul.f32.vlgmr.msrb.gmra.mxu3 %v8027_v10 }
  0xcb   : > { %v731_v9 = vpop.f32.mrf.mxu0  ;;  %2091 = vmatpush.msrb.mxu3 %v2090_v4  ;;  %v770_v19 = vpop.f32.mrf.mxu1  ;;  %2054 = vmatpush.msrb.mxu2 %v8282_v58 }
  0xcc   : > { %v732_v15 = vadd.f32 %v731_v9, %v8187_v53  ;;  %v800_v20 = vpop.f32.mrf.mxu2 }
  0xcd   : > { %2097 = vmatpush.msrb.mxu3 %v2096_v13  ;;  %v830_v26 = vpop.f32.mrf.mxu3 }
  0xce   : > { %v771_v21 = vadd.f32 %v770_v19, %v732_v15  ;;  %1749 = vmatmul.f32.vlgmr.msrb.gmra.mxu0 %v8038_v18  ;;  %1779 = vmatmul.f32.vlgmr.msrb.gmra.mxu1 %v8047_v24  ;;  %v303_v19 = vld [vmem:[%s10027_s0 + $0xd8] sm:$0xff] }
  0xcf   : > { %1996 = vmatpush.msrb.mxu0 %v1898_v29  ;;  %2025 = vmatpush.msrb.mxu1 %v8220_v16  ;;  %v484_v16 = vadd.f32 %v8211_v12, %v8200_v2 }
  0xd0   : > { %v801_v28 = vadd.f32 %v800_v20, %v771_v21  ;;  %1816 = vmatmul.f32.gmra.mxu2 %v8035_v17 }
  0xd1   : > { %2000 = vmatpush.msrb.mxu0 %v1904_v38  ;;  %2027 = vmatpush.msrb.mxu1 %v8241_v30  ;;  %v511_v40 = vadd.f32 %v8217_v14, %v484_v16  ;;  %v287_v16 = vld [vmem:[%s10027_s0 + $0x58] sm:$0xff] }
  0xd2   : > { %v831_v32 = vadd.f32 %v830_v26, %v801_v28  ;;  %1843 = vmatmul.f32.gmra.mxu3 %v8035_v17  ;;  %v8371_v28 = vand.u32 4294901760, %v303_v19 }
  0xd3   : > { %v739_v33 = vpop.f32.mrf.mxu0  ;;  %v774_v22 = vpop.f32.mrf.mxu1  ;;  %v3367_v14 = vmax.f32 %v511_v40, 0.0  ;;  %v3368_v40 = vmax.f32 %v8274_v54, 0.0 }
  0xd4   : > { %v740_v35 = vadd.f32 %v739_v33, %v8197_v1  ;;  %v805_v29 = vpop.f32.mrf.mxu2 }
  0xd5   : > { %v836_v39 = vpop.f32.mrf.mxu3 }
  0xd6   : > { %v775_v37 = vadd.f32 %v774_v22, %v740_v35  ;;  %1754 = vmatmul.f32.gmra.mxu0 %v8043_v23  ;;  %1785 = vmatmul.f32.gmra.mxu1 %v8054_v31  ;;  %v8376_v22 = vsub.f32 %v303_v19, %v8371_v28 }
  0xd8   : > { %v806_v34 = vadd.f32 %v805_v29, %v775_v37  ;;  %1939 = vmatmul.f32.vlgmr.msra.gmra.mxu2 %v8038_v18  ;;  %v2468_v37 = vand.u32 4294901760, %v8376_v22 }
  0xd9   : > { %2186 = vmatpush.msra.mxu2 %v2088_v55  ;;  %v8333_v55 = vsub.f32 %v302_v46, %v8325_v48 }
  0xda   : > { %v837_v38 = vadd.f32 %v836_v39, %v806_v34  ;;  %1969 = vmatmul.f32.vlgmr.msra.gmra.mxu3 %v8047_v24 }
  0xdb   : > { %v863_v30 = vpop.f32.mrf.mxu0  ;;  %2215 = vmatpush.msra.mxu3 %v8265_v47  ;;  %v890_v42 = vpop.f32.mrf.mxu1  ;;  %2190 = vmatpush.msra.mxu2 %v2094_v5  ;;  %v2278_v60 = vand.u32 4294901760, %v8333_v55 }
  0xdc   : > { %v864_v41 = vadd.f32 %v863_v30, %v831_v32  ;;  %v921_v44 = vpop.f32.mrf.mxu2  ;;  %v8389_v30 = vand.u32 4294901760, %v287_v16 }
  0xdd   : > { %2217 = vmatpush.msra.mxu3 %v8282_v58  ;;  %v922_v12 = vadd.f32 %v921_v44, %v8187_v53  ;;  %v960_v45 = vpop.f32.mrf.mxu3  ;;  %v2279_v5 = vsub.f32 %v8333_v55, %v2278_v60 }
  0xde   : > { %v891_v2 = vadd.f32 %v890_v42, %v864_v41  ;;  %1870 = vmatmul.f32.vlgmr.msra.gmra.mxu0 %v8059_v36  ;;  %1909 = vmatmul.f32.vlgmr.msra.gmra.mxu1 %v8027_v10 }
  0xdf   : > { %2123 = vmatpush.msra.mxu0 %v8270_v51  ;;  %v961_v52 = vadd.f32 %v960_v45, %v922_v12  ;;  %2153 = vmatpush.msra.mxu1 %v8265_v47  ;;  %v286_v47 = vld [vmem:[%s10027_s0 + $0x50] sm:$0xff]  ;;  %v2280_v26 = vand.u32 4294901760, %v2279_v5  ;;  %v8393_v12 = vsub.f32 %v287_v16, %v8389_v30 }
  0xe0   : > { %v3369_v50 = vmax.f32 %v891_v2, 0.0  ;;  %1944 = vmatmul.f32.gmra.mxu2 %v8043_v23  ;;  %v8345_v61 = vand.u32 4294901760, %v286_v47 }
  0xe1   : > { %2126 = vmatpush.msra.mxu0 %v8286_v63  ;;  %2155 = vmatpush.msra.mxu1 %v8282_v58 }
  0xe2   : > { %v8335_v56 = vmax.f32 %v3367_v14, %v3369_v50  ;;  %1975 = vmatmul.f32.gmra.mxu3 %v8054_v31  ;;  %v8350_v58 = vsub.f32 %v286_v47, %v8345_v61  ;;  %v2474_v50 = vand.u32 4294901760, %v8393_v12  ;;  %v3384_v47 = vmax.f32 %v8292_v8, 0.0 }
  0xe3   : > { %v867_v51 = vpop.f32.mrf.mxu0  ;;  %v894_v57 = vpop.f32.mrf.mxu1 }
  0xe4   : > { %v868_v25 = vadd.f32 %v867_v51, %v837_v38  ;;  %v929_v59 = vpop.f32.mrf.mxu2  ;;  %v2284_v6 = vand.u32 4294901760, %v8350_v58  ;;  %v2469_v38 = vsub.f32 %v8376_v22, %v2468_v37  ;;  %v2475_v54 = vsub.f32 %v8393_v12, %v2474_v50 }
  0xe5   : > { %v930_v63 = vadd.f32 %v929_v59, %v8197_v1  ;;  %v964_v0 = vpop.f32.mrf.mxu3 }
  0xe6   : > { %v895_v62 = vadd.f32 %v894_v57, %v868_v25  ;;  %1878 = vmatmul.f32.gmra.mxu0 %v8073_v43  ;;  %1913 = vmatmul.f32.gmra.mxu1 %v8035_v17  ;;  %v2285_v13 = vsub.f32 %v8350_v58, %v2284_v6  ;;  %v2470_v49 = vand.u32 4294901760, %v2469_v38  ;;  %v2476_v25 = vand.u32 4294901760, %v2475_v54 }
  0xe7   : > { %v965_v4 = vadd.f32 %v964_v0, %v930_v63 }
  0xe8   : > { %v3385_v3 = vmax.f32 %v895_v62, 0.0  ;;  %2060 = vmatmul.f32.vlgmr.msrb.gmra.mxu2 %v8059_v36  ;;  %v2286_v35 = vand.u32 4294901760, %v2285_v13 }
  0xe9   : > { %2313 = vmatpush.msrb.mxu2 %v8333_v55 }
  0xea   : > { %v8357_v7 = vmax.f32 %v3383_v27, %v3385_v3  ;;  %2099 = vmatmul.f32.vlgmr.msrb.gmra.mxu3 %v8027_v10 }
  0xeb   : > { %v990_v9 = vpop.f32.mrf.mxu0  ;;  %2343 = vmatpush.msrb.mxu3 %v8325_v48  ;;  %v1020_v20 = vpop.f32.mrf.mxu1  ;;  %2316 = vmatpush.msrb.mxu2 %v8350_v58 }
  0xec   : > { %v991_v15 = vadd.f32 %v990_v9, %v961_v52  ;;  %v1053_v21 = vpop.f32.mrf.mxu2 }
  0xed   : > { %2345 = vmatpush.msrb.mxu3 %v8345_v61  ;;  %v1080_v33 = vpop.f32.mrf.mxu3 }
  0xee   : > { %v1021_v32 = vadd.f32 %v1020_v20, %v991_v15  ;;  %2002 = vmatmul.f32.vlgmr.msrb.gmra.mxu0 %v8027_v10  ;;  %2029 = vmatmul.f32.vlgmr.msrb.gmra.mxu1 %v8027_v10 }
  0xef   : > { %2242 = vmatpush.msrb.mxu0 %v8325_v48  ;;  %2281 = vmatpush.msrb.mxu1 %v2280_v26 }
  0xf0   : > { %v1054_v29 = vadd.f32 %v1053_v21, %v1021_v32  ;;  %2068 = vmatmul.f32.gmra.mxu2 %v8073_v43 }
  0xf1   : > { %2244 = vmatpush.msrb.mxu0 %v8345_v61  ;;  %2287 = vmatpush.msrb.mxu1 %v2286_v35 }
  0xf2   : > { %v1081_v39 = vadd.f32 %v1080_v33, %v1054_v29  ;;  %2103 = vmatmul.f32.gmra.mxu3 %v8035_v17 }
  0xf3   : > { %v995_v34 = vpop.f32.mrf.mxu0  ;;  %v1026_v44 = vpop.f32.mrf.mxu1 }
  0xf4   : > { %v3370_v41 = vmax.f32 %v1081_v39, 0.0  ;;  %v996_v42 = vadd.f32 %v995_v34, %v965_v4  ;;  %v1057_v2 = vpop.f32.mrf.mxu2 }
  0xf5   : > { %v1084_v14 = vpop.f32.mrf.mxu3 }
  0xf6   : > { %v8395_v45 = vmax.f32 %v3368_v40, %v3370_v41  ;;  %v1027_v46 = vadd.f32 %v1026_v44, %v996_v42  ;;  %2006 = vmatmul.f32.gmra.mxu0 %v8035_v17  ;;  %2033 = vmatmul.f32.gmra.mxu1 %v8035_v17 }
  0xf8   : > { %v1058_v52 = vadd.f32 %v1057_v2, %v1027_v46  ;;  %2192 = vmatmul.f32.vlgmr.msra.gmra.mxu2 %v8027_v10  ;;  %v305_v46 = vld [vmem:[%s10027_s0 + $0xe8] sm:$0xff] }
  0xf9   : > { %2432 = vmatpush.msra.mxu2 %v8371_v28 }
  0xfa   : > { %v1085_v51 = vadd.f32 %v1084_v14, %v1058_v52  ;;  %2219 = vmatmul.f32.vlgmr.msra.gmra.mxu3 %v8027_v10  ;;  %v8485_v52 = vand.u32 4294901760, %v305_v46 }
  0xfb   : > { %v1111_v11 = vpop.f32.mrf.mxu0  ;;  %2471 = vmatpush.msra.mxu3 %v2470_v49  ;;  %v1150_v62 = vpop.f32.mrf.mxu1  ;;  %2434 = vmatpush.msra.mxu2 %v8389_v30 }
  0xfc   : > { %v3386_v57 = vmax.f32 %v1085_v51, 0.0  ;;  %v1112_v59 = vadd.f32 %v1111_v11, %v8187_v53  ;;  %v1180_v63 = vpop.f32.mrf.mxu2 }
  0xfd   : > { %2477 = vmatpush.msra.mxu3 %v2476_v25  ;;  %v1210_v3 = vpop.f32.mrf.mxu3 }
  0xfe   : > { %v8407_v0 = vmax.f32 %v3384_v47, %v3386_v57  ;;  %v1151_v27 = vadd.f32 %v1150_v62, %v1112_v59  ;;  %2129 = vmatmul.f32.vlgmr.msra.gmra.mxu0 %v8038_v18  ;;  %2159 = vmatmul.f32.vlgmr.msra.gmra.mxu1 %v8047_v24  ;;  %v8491_v47 = vsub.f32 %v305_v46, %v8485_v52  ;;  %v289_v59 = vld [vmem:[%s10027_s0 + $0x68] sm:$0xff] }
  0xff   : > { %2376 = vmatpush.msra.mxu0 %v2278_v60  ;;  %2405 = vmatpush.msra.mxu1 %v8325_v48 }
 0x100   : > { %v1181_v4 = vadd.f32 %v1180_v63, %v1151_v27  ;;  %2196 = vmatmul.f32.gmra.mxu2 %v8035_v17  ;;  %v8501_v63 = vand.u32 4294901760, %v289_v59 }
 0x101   : > { %2380 = vmatpush.msra.mxu0 %v2284_v6  ;;  %2407 = vmatpush.msra.mxu1 %v8345_v61  ;;  %v304_v61 = vld [vmem:[%s10027_s0 + $0xe0] sm:$0xff] }
 0x102   : > { %v8416_v8 = vadd.f32 %v1210_v3, %v1181_v4  ;;  %2223 = vmatmul.f32.gmra.mxu3 %v8035_v17  ;;  %v8439_v21 = vand.u32 4294901760, %v304_v61  ;;  %v2848_v3 = vand.u32 4294901760, %v8491_v47 }
 0x103   : > { %v1119_v5 = vpop.f32.mrf.mxu0  ;;  %v1154_v60 = vpop.f32.mrf.mxu1 }
 0x104   : > { %v1120_v55 = vadd.f32 %v1119_v5, %v8197_v1  ;;  %v1185_v9 = vpop.f32.mrf.mxu2  ;;  %v8448_v35 = vsub.f32 %v304_v61, %v8439_v21 }
 0x105   : > { %v1216_v48 = vpop.f32.mrf.mxu3 }
 0x106   : > { %v1155_v13 = vadd.f32 %v1154_v60, %v1120_v55  ;;  %2134 = vmatmul.f32.gmra.mxu0 %v8043_v23  ;;  %2165 = vmatmul.f32.gmra.mxu1 %v8054_v31  ;;  %v2658_v39 = vand.u32 4294901760, %v8448_v35  ;;  %v8505_v55 = vsub.f32 %v289_v59, %v8501_v63 }
 0x108   : > { %v1186_v15 = vadd.f32 %v1185_v9, %v1155_v13  ;;  %2319 = vmatmul.f32.vlgmr.msrb.gmra.mxu2 %v8038_v18  ;;  %v2659_v41 = vsub.f32 %v8448_v35, %v2658_v39  ;;  %v2849_v13 = vsub.f32 %v8491_v47, %v2848_v3 }
 0x109   : > { %2566 = vmatpush.msrb.mxu2 %v2468_v37 }
 0x10a   : > { %v8424_v58 = vadd.f32 %v1216_v48, %v1186_v15  ;;  %2349 = vmatmul.f32.vlgmr.msrb.gmra.mxu3 %v8047_v24  ;;  %v2854_v48 = vand.u32 4294901760, %v8505_v55  ;;  %v2850_v61 = vand.u32 4294901760, %v2849_v13 }
 0x10b   : > { %v8428_v6 = vpop.f32.mrf.mxu0  ;;  %2595 = vmatpush.msrb.mxu3 %v8371_v28  ;;  %v8436_v19 = vpop.f32.mrf.mxu1  ;;  %2570 = vmatpush.msrb.mxu2 %v2474_v50  ;;  %v2660_v50 = vand.u32 4294901760, %v2659_v41 }
 0x10c   : > { %v1301_v20 = vpop.f32.mrf.mxu2 }
 0x10d   : > { %2597 = vmatpush.msrb.mxu3 %v8389_v30  ;;  %v1302_v26 = vadd.f32 %v1301_v20, %v8187_v53  ;;  %v1340_v32 = vpop.f32.mrf.mxu3  ;;  %v2855_v20 = vsub.f32 %v8505_v55, %v2854_v48 }
 0x10e   : > { %2250 = vmatmul.f32.vlgmr.msrb.gmra.mxu0 %v8059_v36  ;;  %2289 = vmatmul.f32.vlgmr.msrb.gmra.mxu1 %v8027_v10 }
 0x10f   : > { %2503 = vmatpush.msrb.mxu0 %v8376_v22  ;;  %v1341_v33 = vadd.f32 %v1340_v32, %v1302_v26  ;;  %2533 = vmatpush.msrb.mxu1 %v8371_v28  ;;  %v288_v22 = vld [vmem:[%s10027_s0 + $0x60] sm:$0xff] }
 0x110   : > { %2324 = vmatmul.f32.gmra.mxu2 %v8043_v23  ;;  %v8461_v16 = vand.u32 4294901760, %v288_v22 }
 0x111   : > { %2506 = vmatpush.msrb.mxu0 %v8393_v12  ;;  %2535 = vmatpush.msrb.mxu1 %v8389_v30 }
 0x112   : > { %2355 = vmatmul.f32.gmra.mxu3 %v8054_v31  ;;  %v8466_v40 = vsub.f32 %v288_v22, %v8461_v16 }
 0x113   : > { %v8452_v29 = vpop.f32.mrf.mxu0  ;;  %v8458_v37 = vpop.f32.mrf.mxu1 }
 0x114   : > { %v1309_v28 = vpop.f32.mrf.mxu2  ;;  %v2664_v42 = vand.u32 4294901760, %v8466_v40  ;;  %v1248_v59 = vadd.f32 %v8452_v29, %v8424_v58 }
 0x115   : > { %v1310_v34 = vadd.f32 %v1309_v28, %v8197_v1  ;;  %v1344_v38 = vpop.f32.mrf.mxu3 }
 0x116   : > { %2258 = vmatmul.f32.gmra.mxu0 %v8073_v43  ;;  %2293 = vmatmul.f32.gmra.mxu1 %v8035_v17  ;;  %v2665_v2 = vsub.f32 %v8466_v40, %v2664_v42 }
 0x117   : > { %v1345_v30 = vadd.f32 %v1344_v38, %v1310_v34 }
 0x118   : > { %2440 = vmatmul.f32.vlgmr.msra.gmra.mxu2 %v8059_v36  ;;  %v2666_v11 = vand.u32 4294901760, %v2665_v2 }
 0x119   : > { %2693 = vmatpush.msra.mxu2 %v8448_v35 }
 0x11a   : > { %2479 = vmatmul.f32.vlgmr.msra.gmra.mxu3 %v8027_v10 }
 0x11b   : > { %v1370_v44 = vpop.f32.mrf.mxu0  ;;  %2723 = vmatpush.msra.mxu3 %v8439_v21  ;;  %v1400_v14 = vpop.f32.mrf.mxu1  ;;  %2696 = vmatpush.msra.mxu2 %v8466_v40 }
 0x11c   : > { %v1371_v12 = vadd.f32 %v1370_v44, %v1341_v33  ;;  %v1433_v49 = vpop.f32.mrf.mxu2  ;;  %v2856_v33 = vand.u32 4294901760, %v2855_v20 }
 0x11d   : > { %2725 = vmatpush.msra.mxu3 %v8461_v16  ;;  %v1460_v51 = vpop.f32.mrf.mxu3 }
 0x11e   : > { %v1401_v54 = vadd.f32 %v1400_v14, %v1371_v12  ;;  %2382 = vmatmul.f32.vlgmr.msra.gmra.mxu0 %v8027_v10  ;;  %2409 = vmatmul.f32.vlgmr.msra.gmra.mxu1 %v8027_v10 }
 0x11f   : > { %2622 = vmatpush.msra.mxu0 %v8439_v21  ;;  %2661 = vmatpush.msra.mxu1 %v2660_v50 }
 0x120   : > { %v1434_v25 = vadd.f32 %v1433_v49, %v1401_v54  ;;  %2448 = vmatmul.f32.gmra.mxu2 %v8073_v43 }
 0x121   : > { %2624 = vmatpush.msra.mxu0 %v8461_v16  ;;  %2667 = vmatpush.msra.mxu1 %v2666_v11 }
 0x122   : > { %v8494_v57 = vadd.f32 %v1460_v51, %v1434_v25  ;;  %2483 = vmatmul.f32.gmra.mxu3 %v8035_v17 }
 0x123   : > { %v1375_v62 = vpop.f32.mrf.mxu0  ;;  %v1406_v4 = vpop.f32.mrf.mxu1 }
 0x124   : > { %v1376_v27 = vadd.f32 %v1375_v62, %v1345_v30  ;;  %v1437_v5 = vpop.f32.mrf.mxu2 }
 0x125   : > { %v1464_v9 = vpop.f32.mrf.mxu3 }
 0x126   : > { %v1407_v60 = vadd.f32 %v1406_v4, %v1376_v27  ;;  %2386 = vmatmul.f32.gmra.mxu0 %v8035_v17  ;;  %2413 = vmatmul.f32.gmra.mxu1 %v8035_v17 }
 0x128   : > { %v1438_v15 = vadd.f32 %v1437_v5, %v1407_v60  ;;  %2572 = vmatmul.f32.vlgmr.msrb.gmra.mxu2 %v8027_v10 }
 0x129   : > { %2812 = vmatpush.msrb.mxu2 %v8485_v52 }
 0x12a   : > { %v8512_v26 = vadd.f32 %v1464_v9, %v1438_v15  ;;  %2599 = vmatmul.f32.vlgmr.msrb.gmra.mxu3 %v8027_v10  ;;  %v306_v9 = vld [vmem:[%s10027_s0 + $0xf0] sm:$0xff] }
 0x12b   : > { %v1491_v32 = vpop.f32.mrf.mxu0  ;;  %2851 = vmatpush.msrb.mxu3 %v2850_v61  ;;  %v1530_v28 = vpop.f32.mrf.mxu1  ;;  %2814 = vmatpush.msrb.mxu2 %v8501_v63 }
 0x12c   : > { %v1492_v22 = vadd.f32 %v1491_v32, %v8187_v53  ;;  %v1560_v34 = vpop.f32.mrf.mxu2 }
 0x12d   : > { %2857 = vmatpush.msrb.mxu3 %v2856_v33  ;;  %v1590_v30 = vpop.f32.mrf.mxu3 }
 0x12e   : > { %v1531_v38 = vadd.f32 %v1530_v28, %v1492_v22  ;;  %2509 = vmatmul.f32.vlgmr.msrb.gmra.mxu0 %v8038_v18  ;;  %2539 = vmatmul.f32.vlgmr.msrb.gmra.mxu1 %v8047_v24 }
 0x12f   : > { %2756 = vmatpush.msrb.mxu0 %v2658_v39  ;;  %2785 = vmatpush.msrb.mxu1 %v8439_v21  ;;  %v1244_v21 = vadd.f32 %v8428_v6, %v8416_v8 }
 0x130   : > { %v1561_v41 = vadd.f32 %v1560_v34, %v1531_v38  ;;  %2576 = vmatmul.f32.gmra.mxu2 %v8035_v17 }
 0x131   : > { %2760 = vmatpush.msrb.mxu0 %v2664_v42  ;;  %2787 = vmatpush.msrb.mxu1 %v8461_v16  ;;  %v1271_v49 = vadd.f32 %v8436_v19, %v1244_v21 }
 0x132   : > { %v1591_v44 = vadd.f32 %v1590_v30, %v1561_v41  ;;  %2603 = vmatmul.f32.gmra.mxu3 %v8035_v17 }
 0x133   : > { %v1499_v2 = vpop.f32.mrf.mxu0  ;;  %v1534_v35 = vpop.f32.mrf.mxu1  ;;  %v3371_v25 = vmax.f32 %v1271_v49, 0.0 }
 0x134   : > { %v1500_v12 = vadd.f32 %v1499_v2, %v8197_v1  ;;  %v1565_v39 = vpop.f32.mrf.mxu2 }
 0x135   : > { %v1596_v14 = vpop.f32.mrf.mxu3 }
 0x136   : > { %v1535_v46 = vadd.f32 %v1534_v35, %v1500_v12  ;;  %2514 = vmatmul.f32.gmra.mxu0 %v8043_v23  ;;  %2545 = vmatmul.f32.gmra.mxu1 %v8054_v31  ;;  %v307_v12 = vld [vmem:[%s10027_s0 + $0xf8] sm:$0xff] }
 0x137   : > { %v8592_v35 = vand.u32 4294901760, %v307_v12 }
 0x138   : > { %v1566_v40 = vadd.f32 %v1565_v39, %v1535_v46  ;;  %2699 = vmatmul.f32.vlgmr.msra.gmra.mxu2 %v8038_v18 }
 0x139   : > { %2946 = vmatpush.msra.mxu2 %v2848_v3  ;;  %v8598_v21 = vsub.f32 %v307_v12, %v8592_v35 }
 0x13a   : > { %v1597_v42 = vadd.f32 %v1596_v14, %v1566_v40  ;;  %2729 = vmatmul.f32.vlgmr.msra.gmra.mxu3 %v8047_v24 }
 0x13b   : > { %v1623_v16 = vpop.f32.mrf.mxu0  ;;  %2975 = vmatpush.msra.mxu3 %v8485_v52  ;;  %v1650_v54 = vpop.f32.mrf.mxu1  ;;  %2950 = vmatpush.msra.mxu2 %v2854_v48  ;;  %v290_v48 = vld [vmem:[%s10027_s0 + $0x70] sm:$0xff]  ;;  %v3228_v49 = vand.u32 4294901760, %v8598_v21 }
 0x13c   : > { %v1624_v50 = vadd.f32 %v1623_v16, %v1591_v44  ;;  %v1681_v51 = vpop.f32.mrf.mxu2  ;;  %v8570_v20 = vand.u32 4294901760, %v290_v48 }
 0x13d   : > { %2977 = vmatpush.msra.mxu3 %v8501_v63  ;;  %v1682_v6 = vadd.f32 %v1681_v51, %v8187_v53  ;;  %v1720_v11 = vpop.f32.mrf.mxu3 }
 0x13e   : > { %v1651_v8 = vadd.f32 %v1650_v54, %v1624_v50  ;;  %2630 = vmatmul.f32.vlgmr.msra.gmra.mxu0 %v8059_v36  ;;  %2669 = vmatmul.f32.vlgmr.msra.gmra.mxu1 %v8027_v10  ;;  %v8579_v34 = vsub.f32 %v290_v48, %v8570_v20  ;;  %v3372_v50 = vmax.f32 %v8494_v57, 0.0 }
 0x13f   : > { %2883 = vmatpush.msra.mxu0 %v8491_v47  ;;  %v1721_v19 = vadd.f32 %v1720_v11, %v1682_v6  ;;  %2913 = vmatpush.msra.mxu1 %v8485_v52  ;;  %v1275_v47 = vadd.f32 %v8458_v37, %v1248_v59 }
 0x140   : > { %v3373_v62 = vmax.f32 %v1651_v8, 0.0  ;;  %2704 = vmatmul.f32.gmra.mxu2 %v8043_v23  ;;  %v3044_v2 = vand.u32 4294901760, %v8579_v34  ;;  %v291_v8 = vld [vmem:[%s10027_s0 + $0x78] sm:$0xff] }
 0x141   : > { %2886 = vmatpush.msra.mxu0 %v8505_v55  ;;  %2915 = vmatpush.msra.mxu1 %v8501_v63  ;;  %v3387_v13 = vmax.f32 %v1275_v47, 0.0  ;;  %v8610_v59 = vand.u32 4294901760, %v291_v8 }
 0x142   : > { %v3403_v27 = vmax.f32 %v3371_v25, %v3373_v62  ;;  %2735 = vmatmul.f32.gmra.mxu3 %v8054_v31  ;;  %v3045_v14 = vsub.f32 %v8579_v34, %v3044_v2  ;;  %v3229_v25 = vsub.f32 %v8598_v21, %v3228_v49 }
 0x143   : > { %v1627_v3 = vpop.f32.mrf.mxu0  ;;  %v1654_v4 = vpop.f32.mrf.mxu1 }
 0x144   : > { %v8552_v58 = vmax.f32 %v8335_v56, %v3403_v27  ;;  %v1628_v29 = vadd.f32 %v1627_v3, %v1597_v42  ;;  %v1689_v5 = vpop.f32.mrf.mxu2  ;;  %v8560_v56 = vand.u32 4294901760, %v306_v9  ;;  %v3046_v42 = vand.u32 4294901760, %v3045_v14 }
 0x145   : > { %v1690_v52 = vadd.f32 %v1689_v5, %v8197_v1  ;;  %v1724_v55 = vpop.f32.mrf.mxu3  ;;  %v3230_v27 = vand.u32 4294901760, %v3229_v25 }
 0x146   : > { %v1655_v60 = vadd.f32 %v1654_v4, %v1628_v29  ;;  %2638 = vmatmul.f32.gmra.mxu0 %v8073_v43  ;;  %2673 = vmatmul.f32.gmra.mxu1 %v8035_v17  ;;  %v8568_v61 = vsub.f32 %v306_v9, %v8560_v56  ;;  %v8616_v29 = vsub.f32 %v291_v8, %v8610_v59 }
 0x147   : > { %v1725_v37 = vadd.f32 %v1724_v55, %v1690_v52 }
 0x148   : > { %v3389_v63 = vmax.f32 %v1655_v60, 0.0  ;;  %2820 = vmatmul.f32.vlgmr.msrb.gmra.mxu2 %v8059_v36  ;;  %v3038_v28 = vand.u32 4294901760, %v8568_v61  ;;  %v3388_v60 = vmax.f32 %v8512_v26, 0.0 }
 0x149   : > { %3073 = vmatpush.msrb.mxu2 %v8568_v61 }
 0x14a   : > { %v3405_v15 = vmax.f32 %v3387_v13, %v3389_v63  ;;  %2859 = vmatmul.f32.vlgmr.msrb.gmra.mxu3 %v8027_v10 }
 0x14b   : > { %v1750_v32 = vpop.f32.mrf.mxu0  ;;  %3103 = vmatpush.msrb.mxu3 %v8560_v56  ;;  %v1780_v38 = vpop.f32.mrf.mxu1  ;;  %3076 = vmatpush.msrb.mxu2 %v8579_v34 }
 0x14c   : > { %v8574_v33 = vmax.f32 %v8357_v7, %v3405_v15  ;;  %v1751_v22 = vadd.f32 %v1750_v32, %v1721_v19  ;;  %v1813_v30 = vpop.f32.mrf.mxu2  ;;  %v3039_v7 = vsub.f32 %v8568_v61, %v3038_v28 }
 0x14d   : > { %3105 = vmatpush.msrb.mxu3 %v8570_v20  ;;  %v1840_v44 = vpop.f32.mrf.mxu3 }
 0x14e   : > { %v1781_v41 = vadd.f32 %v1780_v38, %v1751_v22  ;;  %2762 = vmatmul.f32.vlgmr.msrb.gmra.mxu0 %v8027_v10  ;;  %2789 = vmatmul.f32.vlgmr.msrb.gmra.mxu1 %v8027_v10  ;;  %v3040_v46 = vand.u32 4294901760, %v3039_v7 }
 0x14f   : > { %3002 = vmatpush.msrb.mxu0 %v8560_v56 }
 0x150   : > { %v1814_v39 = vadd.f32 %v1813_v30, %v1781_v41  ;;  %2828 = vmatmul.f32.gmra.mxu2 %v8073_v43  ;;  %3041 = vmatpush.msrb.mxu1 %v3040_v46 }
 0x151   : > { %3004 = vmatpush.msrb.mxu0 %v8570_v20 }
 0x152   : > { %v1841_v40 = vadd.f32 %v1840_v44, %v1814_v39  ;;  %2863 = vmatmul.f32.gmra.mxu3 %v8035_v17  ;;  %3047 = vmatpush.msrb.mxu1 %v3046_v42 }
 0x153   : > { %v1755_v16 = vpop.f32.mrf.mxu0  ;;  %v1786_v6 = vpop.f32.mrf.mxu1 }
 0x154   : > { %v3374_v54 = vmax.f32 %v1841_v40, 0.0  ;;  %v1756_v51 = vadd.f32 %v1755_v16, %v1725_v37  ;;  %v1817_v11 = vpop.f32.mrf.mxu2 }
 0x155   : > { %v1844_v57 = vpop.f32.mrf.mxu3 }
 0x156   : > { %v3404_v62 = vmax.f32 %v3372_v50, %v3374_v54  ;;  %v1787_v19 = vadd.f32 %v1786_v6, %v1756_v51  ;;  %2766 = vmatmul.f32.gmra.mxu0 %v8035_v17  ;;  %2793 = vmatmul.f32.gmra.mxu1 %v8035_v17 }
 0x158   : > { %v3408_v3 = vmax.f32 %v8395_v45, %v3404_v62  ;;  %v1818_v47 = vadd.f32 %v1817_v11, %v1787_v19  ;;  %2952 = vmatmul.f32.vlgmr.msra.gmra.mxu2 %v8027_v10  ;;  %v3234_v45 = vand.u32 4294901760, %v8616_v29 }
 0x159   : > { %3192 = vmatpush.msra.mxu2 %v8592_v35 }
 0x15a   : > { %v3415_v4 = vrot.slane %v3408_v3, 4  ;;  %v1845_v5 = vadd.f32 %v1844_v57, %v1818_v47  ;;  %2979 = vmatmul.f32.vlgmr.msra.gmra.mxu3 %v8027_v10  ;;  %v3235_v22 = vsub.f32 %v8616_v29, %v3234_v45 }
 0x15b   : > { %v1871_v52 = vpop.f32.mrf.mxu0  ;;  %3231 = vmatpush.msra.mxu3 %v3230_v27  ;;  %v1910_v37 = vpop.f32.mrf.mxu1  ;;  %3194 = vmatpush.msra.mxu2 %v8610_v59 }
 0x15c   : > { %v8625_v55 = vsel %vm3417_vm1, %v8552_v58, %v3415_v4  ;;  %v8629_v9 = vsel %vm3417_vm1, %v3415_v4, %v8552_v58  ;;  %v3390_v13 = vmax.f32 %v1845_v5, 0.0  ;;  %v1872_v63 = vadd.f32 %v1871_v52, %v8187_v53  ;;  %v1940_v48 = vpop.f32.mrf.mxu2 }
 0x15d   : > { %v1970_v32 = vpop.f32.mrf.mxu3  ;;  %v3236_v30 = vand.u32 4294901760, %v3235_v22 }
 0x15e   : > { %v3406_v26 = vmax.f32 %v3388_v60, %v3390_v13  ;;  %v1911_v15 = vadd.f32 %v1910_v37, %v1872_v63  ;;  %2889 = vmatmul.f32.vlgmr.msra.gmra.mxu0 %v8038_v18  ;;  %2919 = vmatmul.f32.vlgmr.msra.gmra.mxu1 %v8047_v24 }
 0x15f   : > { %3136 = vmatpush.msra.mxu0 %v3038_v28  ;;  %3165 = vmatpush.msra.mxu1 %v8560_v56 }
 0x160   : > { %2956 = vmatmul.f32.gmra.mxu2 %v8035_v17  ;;  %v3410_v58 = vmax.f32 %v8407_v0, %v3406_v26  ;;  %v1941_v34 = vadd.f32 %v1940_v48, %v1911_v15  ;;  %3237 = vmatpush.msra.mxu3 %v3236_v30 }
 0x161   : > { %3140 = vmatpush.msra.mxu0 %v3044_v2  ;;  %3167 = vmatpush.msra.mxu1 %v8570_v20 }
 0x162   : > { %2983 = vmatmul.f32.gmra.mxu3 %v8035_v17  ;;  %v3416_v28 = vrot.slane %v3410_v58, 4  ;;  %v1971_v41 = vadd.f32 %v1970_v32, %v1941_v34 }
 0x163   : > { %v1879_v38 = vpop.f32.mrf.mxu0  ;;  %v1914_v44 = vpop.f32.mrf.mxu1 }
 0x164   : > { %v1880_v61 = vadd.f32 %v1879_v38, %v8197_v1  ;;  %v1945_v7 = vpop.f32.mrf.mxu2  ;;  %v8647_v12 = vsel %vm3417_vm1, %v8574_v33, %v3416_v28  ;;  %v8651_v0 = vsel %vm3417_vm1, %v3416_v28, %v8574_v33 }
 0x165   : > { %v1976_v2 = vpop.f32.mrf.mxu3 }
 0x166   : > { %v1915_v56 = vadd.f32 %v1914_v44, %v1880_v61  ;;  %2894 = vmatmul.f32.gmra.mxu0 %v8043_v23  ;;  %2925 = vmatmul.f32.gmra.mxu1 %v8054_v31 }
 0x168   : > { %v1946_v20 = vadd.f32 %v1945_v7, %v1915_v56  ;;  %3079 = vmatmul.f32.vlgmr.msrb.gmra.mxu2 %v8038_v18 }
 0x169   : > { %3326 = vmatpush.msrb.mxu2 %v3228_v49 }
 0x16a   : > { %3109 = vmatmul.f32.vlgmr.msrb.gmra.mxu3 %v8047_v24  ;;  %v1977_v33 = vadd.f32 %v1976_v2, %v1946_v20 }
 0x16b   : > { %v2003_v39 = vpop.f32.mrf.mxu0  ;;  %3355 = vmatpush.msrb.mxu3 %v8592_v35  ;;  %v2030_v46 = vpop.f32.mrf.mxu1  ;;  %3330 = vmatpush.msrb.mxu2 %v3234_v45 }
 0x16c   : > { %v2061_v14 = vpop.f32.mrf.mxu2  ;;  %v2004_v40 = vadd.f32 %v2003_v39, %v1971_v41 }
 0x16d   : > { %3357 = vmatpush.msrb.mxu3 %v8610_v59  ;;  %v2062_v42 = vadd.f32 %v2061_v14, %v8187_v53  ;;  %v2100_v16 = vpop.f32.mrf.mxu3 }
 0x16e   : > { %3010 = vmatmul.f32.vlgmr.msrb.gmra.mxu0 %v8059_v36  ;;  %v8663_v50 = vadd.f32 %v2030_v46, %v2004_v40  ;;  %3049 = vmatmul.f32.vlgmr.msrb.gmra.mxu1 %v8027_v10 }
 0x16f   : > { %3263 = vmatpush.msrb.mxu0 %v8598_v21  ;;  %v2101_v49 = vadd.f32 %v2100_v16, %v2062_v42  ;;  %3293 = vmatpush.msrb.mxu1 %v8592_v35 }
 0x170   : > { %3084 = vmatmul.f32.gmra.mxu2 %v8043_v23  ;;  %v3375_v39 = vmax.f32 %v8663_v50, 0.0 }
 0x171   : > { %3266 = vmatpush.msrb.mxu0 %v8616_v29  ;;  %3295 = vmatpush.msrb.mxu1 %v8610_v59 }
 0x172   : > { %3115 = vmatmul.f32.gmra.mxu3 %v8054_v31 }
 0x173   : > { %v2007_v54 = vpop.f32.mrf.mxu0  ;;  %v2034_v8 = vpop.f32.mrf.mxu1 }
 0x174   : > { %v2008_v51 = vadd.f32 %v2007_v54, %v1977_v33  ;;  %v2069_v6 = vpop.f32.mrf.mxu2 }
 0x175   : > { %v2070_v11 = vadd.f32 %v2069_v6, %v8197_v1  ;;  %v2104_v25 = vpop.f32.mrf.mxu3 }
 0x176   : > { %v8671_v21 = vadd.f32 %v2034_v8, %v2008_v51  ;;  %3018 = vmatmul.f32.gmra.mxu0 %v8073_v43  ;;  %3053 = vmatmul.f32.gmra.mxu1 %v8035_v17 }
 0x177   : > { %v2105_v35 = vadd.f32 %v2104_v25, %v2070_v11 }
 0x178   : > { %3200 = vmatmul.f32.vlgmr.msra.gmra.mxu2 %v8059_v36  ;;  %v3391_v51 = vmax.f32 %v8671_v21, 0.0 }
 0x17a   : > { %3239 = vmatmul.f32.vlgmr.msra.gmra.mxu3 %v8027_v10 }
 0x17b   : > { %v2130_v62 = vpop.f32.mrf.mxu0  ;;  %v2160_v59 = vpop.f32.mrf.mxu1 }
 0x17c   : > { %v2131_v19 = vadd.f32 %v2130_v62, %v2101_v49  ;;  %v2193_v57 = vpop.f32.mrf.mxu2 }
 0x17d   : > { %v2220_v3 = vpop.f32.mrf.mxu3 }
 0x17e   : > { %v2161_v27 = vadd.f32 %v2160_v59, %v2131_v19  ;;  %3142 = vmatmul.f32.vlgmr.msra.gmra.mxu0 %v8027_v10  ;;  %3169 = vmatmul.f32.vlgmr.msra.gmra.mxu1 %v8027_v10 }
 0x180   : > { %v2194_v47 = vadd.f32 %v2193_v57, %v2161_v27  ;;  %3208 = vmatmul.f32.gmra.mxu2 %v8073_v43 }
 0x182   : > { %v8680_v29 = vadd.f32 %v2220_v3, %v2194_v47  ;;  %3243 = vmatmul.f32.gmra.mxu3 %v8035_v17 }
 0x183   : > { %v2135_v36 = vpop.f32.mrf.mxu0  ;;  %v2166_v5 = vpop.f32.mrf.mxu1 }
 0x184   : > { %v2136_v4 = vadd.f32 %v2135_v36, %v2105_v35  ;;  %v2197_v60 = vpop.f32.mrf.mxu2  ;;  %v3376_v47 = vmax.f32 %v8680_v29, 0.0 }
 0x185   : > { %v2224_v45 = vpop.f32.mrf.mxu3 }
 0x186   : > { %v2167_v52 = vadd.f32 %v2166_v5, %v2136_v4  ;;  %3146 = vmatmul.f32.gmra.mxu0 %v8035_v17  ;;  %3173 = vmatmul.f32.gmra.mxu1 %v8035_v17 }
 0x188   : > { %v2198_v13 = vadd.f32 %v2197_v60, %v2167_v52  ;;  %3332 = vmatmul.f32.vlgmr.msrb.gmra.mxu2 %v8027_v10 }
 0x18a   : > { %v8686_v63 = vadd.f32 %v2224_v45, %v2198_v13  ;;  %3359 = vmatmul.f32.vlgmr.msrb.gmra.mxu3 %v8027_v10 }
 0x18b   : > { %v2251_v43 = vpop.f32.mrf.mxu0  ;;  %v2290_v48 = vpop.f32.mrf.mxu1 }
 0x18c   : > { %v2252_v37 = vadd.f32 %v2251_v43, %v8187_v53  ;;  %v2320_v26 = vpop.f32.mrf.mxu2 }
 0x18d   : > { %v2350_v32 = vpop.f32.mrf.mxu3 }
 0x18e   : > { %v2291_v15 = vadd.f32 %v2290_v48, %v2252_v37  ;;  %3269 = vmatmul.f32.vlgmr.msrb.gmra.mxu0 %v8038_v18  ;;  %3299 = vmatmul.f32.vlgmr.msrb.gmra.mxu1 %v8047_v24  ;;  %v3392_v48 = vmax.f32 %v8686_v63, 0.0 }
 0x190   : > { %v2321_v22 = vadd.f32 %v2320_v26, %v2291_v15  ;;  %3336 = vmatmul.f32.gmra.mxu2 %v8035_v17 }
 0x192   : > { %v2351_v58 = vadd.f32 %v2350_v32, %v2321_v22  ;;  %3363 = vmatmul.f32.gmra.mxu3 %v8035_v17 }
 0x193   : > { %v2259_v34 = vpop.f32.mrf.mxu0  ;;  %v2294_v38 = vpop.f32.mrf.mxu1 }
 0x194   : > { %v2260_v10 = vadd.f32 %v2259_v34, %v8197_v1  ;;  %v2325_v30 = vpop.f32.mrf.mxu2 }
 0x195   : > { %v2356_v28 = vpop.f32.mrf.mxu3 }
 0x196   : > { %v2295_v61 = vadd.f32 %v2294_v38, %v2260_v10  ;;  %3274 = vmatmul.f32.gmra.mxu0 %v8043_v23  ;;  %3305 = vmatmul.f32.gmra.mxu1 %v8054_v31 }
 0x198   : > { %v2326_v41 = vadd.f32 %v2325_v30, %v2295_v61 }
 0x19a   : > { %v2357_v18 = vadd.f32 %v2356_v28, %v2326_v41 }
 0x19b   : > { %v2383_v44 = vpop.f32.mrf.mxu0  ;;  %v2410_v7 = vpop.f32.mrf.mxu1 }
 0x19c   : > { %v2384_v24 = vadd.f32 %v2383_v44, %v2351_v58  ;;  %v2441_v56 = vpop.f32.mrf.mxu2 }
 0x19d   : > { %v2442_v17 = vadd.f32 %v2441_v56, %v8187_v53  ;;  %v2480_v20 = vpop.f32.mrf.mxu3 }
 0x19e   : > { %v2411_v2 = vadd.f32 %v2410_v7, %v2384_v24 }
 0x19f   : > { %v2481_v14 = vadd.f32 %v2480_v20, %v2442_v17 }
 0x1a0   : > { %v3377_v46 = vmax.f32 %v2411_v2, 0.0 }
 0x1a2   : > { %v8700_v33 = vmax.f32 %v3375_v39, %v3377_v46 }
 0x1a3   : > { %v2387_v23 = vpop.f32.mrf.mxu0  ;;  %v2414_v42 = vpop.f32.mrf.mxu1 }
 0x1a4   : > { %v2388_v40 = vadd.f32 %v2387_v23, %v2357_v18  ;;  %v2449_v16 = vpop.f32.mrf.mxu2 }
 0x1a5   : > { %v2450_v49 = vadd.f32 %v2449_v16, %v8197_v1  ;;  %v2484_v54 = vpop.f32.mrf.mxu3 }
 0x1a6   : > { %v2415_v31 = vadd.f32 %v2414_v42, %v2388_v40 }
 0x1a7   : > { %v2485_v6 = vadd.f32 %v2484_v54, %v2450_v49 }
 0x1a8   : > { %v3393_v8 = vmax.f32 %v2415_v31, 0.0 }
 0x1aa   : > { %v8704_v11 = vmax.f32 %v3391_v51, %v3393_v8 }
 0x1ab   : > { %v2510_v25 = vpop.f32.mrf.mxu0  ;;  %v2540_v35 = vpop.f32.mrf.mxu1 }
 0x1ac   : > { %v2511_v50 = vadd.f32 %v2510_v25, %v2481_v14  ;;  %v2573_v62 = vpop.f32.mrf.mxu2 }
 0x1ad   : > { %v2600_v59 = vpop.f32.mrf.mxu3 }
 0x1ae   : > { %v2541_v19 = vadd.f32 %v2540_v35, %v2511_v50 }
 0x1b0   : > { %v2574_v57 = vadd.f32 %v2573_v62, %v2541_v19 }
 0x1b2   : > { %v2601_v27 = vadd.f32 %v2600_v59, %v2574_v57 }
 0x1b3   : > { %v2515_v3 = vpop.f32.mrf.mxu0  ;;  %v2546_v5 = vpop.f32.mrf.mxu1 }
 0x1b4   : > { %v3378_v36 = vmax.f32 %v2601_v27, 0.0  ;;  %v2516_v4 = vadd.f32 %v2515_v3, %v2485_v6  ;;  %v2577_v60 = vpop.f32.mrf.mxu2 }
 0x1b5   : > { %v2604_v45 = vpop.f32.mrf.mxu3 }
 0x1b6   : > { %v8707_v21 = vmax.f32 %v3376_v47, %v3378_v36  ;;  %v2547_v52 = vadd.f32 %v2546_v5, %v2516_v4 }
 0x1b8   : > { %v2578_v13 = vadd.f32 %v2577_v60, %v2547_v52 }
 0x1ba   : > { %v2605_v43 = vadd.f32 %v2604_v45, %v2578_v13 }
 0x1bb   : > { %v2631_v37 = vpop.f32.mrf.mxu0  ;;  %v2670_v32 = vpop.f32.mrf.mxu1 }
 0x1bc   : > { %v3394_v26 = vmax.f32 %v2605_v43, 0.0  ;;  %v2632_v15 = vadd.f32 %v2631_v37, %v8187_v53  ;;  %v2700_v22 = vpop.f32.mrf.mxu2 }
 0x1bd   : > { %v2730_v34 = vpop.f32.mrf.mxu3 }
 0x1be   : > { %v8711_v58 = vmax.f32 %v3392_v48, %v3394_v26  ;;  %v2671_v29 = vadd.f32 %v2670_v32, %v2632_v15 }
 0x1c0   : > { %v2701_v10 = vadd.f32 %v2700_v22, %v2671_v29 }
 0x1c2   : > { %v2731_v38 = vadd.f32 %v2730_v34, %v2701_v10 }
 0x1c3   : > { %v2639_v30 = vpop.f32.mrf.mxu0  ;;  %v2674_v28 = vpop.f32.mrf.mxu1 }
 0x1c4   : > { %v2640_v61 = vadd.f32 %v2639_v30, %v8197_v1  ;;  %v2705_v41 = vpop.f32.mrf.mxu2 }
 0x1c5   : > { %v2736_v44 = vpop.f32.mrf.mxu3 }
 0x1c6   : > { %v2675_v18 = vadd.f32 %v2674_v28, %v2640_v61 }
 0x1c8   : > { %v2706_v24 = vadd.f32 %v2705_v41, %v2675_v18 }
 0x1ca   : > { %v2737_v63 = vadd.f32 %v2736_v44, %v2706_v24 }
 0x1cb   : > { %v2763_v7 = vpop.f32.mrf.mxu0  ;;  %v2790_v2 = vpop.f32.mrf.mxu1 }
 0x1cc   : > { %v2764_v56 = vadd.f32 %v2763_v7, %v2731_v38  ;;  %v2821_v17 = vpop.f32.mrf.mxu2 }
 0x1cd   : > { %v2860_v39 = vpop.f32.mrf.mxu3  ;;  %v2822_v32 = vadd.f32 %v2821_v17, %v8187_v53 }
 0x1ce   : > { %v2791_v20 = vadd.f32 %v2790_v2, %v2764_v56 }
 0x1cf   : > { %v2861_v30 = vadd.f32 %v2860_v39, %v2822_v32  ;;  %v7947_v39 = vmov 1935823168  }
 0x1d0   : > { %v3379_v10 = vmax.f32 %v2791_v20, 0.0 }
 0x1d3   : > { %v2767_v46 = vpop.f32.mrf.mxu0  ;;  %v2794_v23 = vpop.f32.mrf.mxu1 }
 0x1d4   : > { %v2768_v14 = vadd.f32 %v2767_v46, %v2737_v63  ;;  %v2829_v40 = vpop.f32.mrf.mxu2 }
 0x1d5   : > { %v2830_v16 = vadd.f32 %v2829_v40, %v8197_v1  ;;  %v2864_v31 = vpop.f32.mrf.mxu3 }
 0x1d6   : > { %v2795_v42 = vadd.f32 %v2794_v23, %v2768_v14 }
 0x1d7   : > { %v2865_v49 = vadd.f32 %v2864_v31, %v2830_v16  ;;  %v3429_v16 = vunpack.c.l.s4 %v7947_v39 }
 0x1d8   : > { %v3395_v46 = vmax.f32 %v2795_v42, 0.0 }
 0x1d9   : > { %v8730_v42 = vunpack.c.0.s8 %v3429_v16 }
 0x1db   : > { %v2890_v54 = vpop.f32.mrf.mxu0  ;;  %v2920_v51 = vpop.f32.mrf.mxu1 }
 0x1dc   : > { %v2953_v8 = vpop.f32.mrf.mxu2  ;;  %v2891_v18 = vadd.f32 %v2890_v54, %v2861_v30 }
 0x1dd   : > { %v2980_v6 = vpop.f32.mrf.mxu3 }
 0x1de   : > { %v2921_v14 = vadd.f32 %v2920_v51, %v2891_v18 }
 0x1e3   : > { %v2895_v25 = vpop.f32.mrf.mxu0  ;;  %v2926_v50 = vpop.f32.mrf.mxu1 }
 0x1e4   : > { %v8715_v35 = vpop.f32.mrf.mxu2  ;;  %v2896_v54 = vadd.f32 %v2895_v25, %v2865_v49 }
 0x1e5   : > { %v8717_v62 = vpop.f32.mrf.mxu3 }
 0x1eb   : > { %v3011_v19 = vpop.f32.mrf.mxu0  ;;  %v3050_v59 = vpop.f32.mrf.mxu1 }
 0x1ec   : > { %v3080_v57 = vpop.f32.mrf.mxu2  ;;  %v3012_v27 = vadd.f32 %v3011_v19, %v8187_v53  ;;  %v2954_v19 = vadd.f32 %v2953_v8, %v2921_v14 }
 0x1ed   : > { %v3110_v3 = vpop.f32.mrf.mxu3 }
 0x1ee   : > { %v3051_v47 = vadd.f32 %v3050_v59, %v3012_v27  ;;  %v2981_v51 = vadd.f32 %v2980_v6, %v2954_v19 }
 0x1f0   : > { %v3081_v60 = vadd.f32 %v3080_v57, %v3051_v47  ;;  %v3380_v25 = vmax.f32 %v2981_v51, 0.0 }
 0x1f2   : > { %v3111_v13 = vadd.f32 %v3110_v3, %v3081_v60 }
 0x1f3   : > { %v3019_v36 = vpop.f32.mrf.mxu0  ;;  %v3054_v4 = vpop.f32.mrf.mxu1 }
 0x1f4   : > { %v3085_v5 = vpop.f32.mrf.mxu2  ;;  %v3020_v52 = vadd.f32 %v3019_v36, %v8197_v1  ;;  %v2927_v36 = vadd.f32 %v2926_v50, %v2896_v54 }
 0x1f5   : > { %v3116_v45 = vpop.f32.mrf.mxu3 }
 0x1f6   : > { %v3055_v43 = vadd.f32 %v3054_v4, %v3020_v52  ;;  %v2958_v52 = vadd.f32 %v8715_v35, %v2927_v36 }
 0x1f8   : > { %v3086_v22 = vadd.f32 %v3085_v5, %v3055_v43  ;;  %v3420_v5 = vrot.slane %v8629_v9, 4  ;;  %v2985_v32 = vadd.f32 %v8717_v62, %v2958_v52 }
 0x1fa   : > { %v3117_v61 = vadd.f32 %v3116_v45, %v3086_v22 }
 0x1fb   : > { %v3143_v37 = vpop.f32.mrf.mxu0  ;;  %v3170_v26 = vpop.f32.mrf.mxu1 }
 0x1fc   : > { %v3144_v48 = vadd.f32 %v3143_v37, %v3111_v13  ;;  %v3201_v15 = vpop.f32.mrf.mxu2  ;;  %v8739_v13 = vperm.slane %v3420_v5, %v8730_v42 }
 0x1fd   : > { %v3240_v34 = vpop.f32.mrf.mxu3  ;;  %v3202_v56 = vadd.f32 %v3201_v15, %v8187_v53 }
 0x1fe   : > { %v3171_v29 = vadd.f32 %v3170_v26, %v3144_v48  ;;  %v3500_v30 = vperm.slane %v8739_v13, 0  ;;  %v3503_v62 = vperm.slane %v8739_v13, 3 }
 0x1ff   : > { %v3241_v20 = vadd.f32 %v3240_v34, %v3202_v56 }
 0x200   : > { %v3381_v38 = vmax.f32 %v3171_v29, 0.0 }
 0x202   : > { %v3448_v28 = vmax.f32 %v3379_v10, %v3381_v38 }
 0x203   : > { %v3147_v41 = vpop.f32.mrf.mxu0  ;;  %v3174_v63 = vpop.f32.mrf.mxu1 }
 0x204   : > { %v8723_v44 = vmax.f32 %v8700_v33, %v3448_v28  ;;  %v3148_v24 = vadd.f32 %v3147_v41, %v3117_v61  ;;  %v3209_v7 = vpop.f32.mrf.mxu2  ;;  %v3501_v61 = vperm.slane %v8739_v13, 1  ;;  %v3423_v28 = vrot.slane %v8651_v0, 4 }
 0x205   : > { %v3244_v17 = vpop.f32.mrf.mxu3  ;;  %v3210_v53 = vadd.f32 %v3209_v7, %v8197_v1  ;;  %v3396_v7 = vmax.f32 %v2985_v32, 0.0  ;;  %v3506_v0 = vperm.slane %v8739_v13, 6 }
 0x206   : > { %v3175_v2 = vadd.f32 %v3174_v63, %v3148_v24  ;;  %v3502_v24 = vperm.slane %v8739_v13, 2  ;;  %v3505_v63 = vperm.slane %v8739_v13, 5 }
 0x207   : > { %v3245_v60 = vadd.f32 %v3244_v17, %v3210_v53 }
 0x208   : > { %v3397_v23 = vmax.f32 %v3175_v2, 0.0 }
 0x20a   : > { %v3450_v40 = vmax.f32 %v3395_v46, %v3397_v23  ;;  %v3507_v46 = vperm.slane %v8739_v13, 7 }
 0x20b   : > { %v3270_v31 = vpop.f32.mrf.mxu0  ;;  %v3300_v57 = vpop.f32.mrf.mxu1 }
 0x20c   : > { %v8727_v33 = vmax.f32 %v8704_v11, %v3450_v40  ;;  %v3271_v59 = vadd.f32 %v3270_v31, %v3241_v20  ;;  %v3333_v27 = vpop.f32.mrf.mxu2  ;;  %v8735_v11 = vperm.slane %v8625_v55, %v8730_v42  ;;  %v8767_v20 = vperm.slane %v8647_v12, %v8730_v42 }
 0x20d   : > { %v3360_v47 = vpop.f32.mrf.mxu3  ;;  %v8770_v40 = vperm.slane %v3423_v28, %v8730_v42 }
 0x20e   : > { %v3301_v3 = vadd.f32 %v3300_v57, %v3271_v59  ;;  %v3492_v9 = vperm.slane %v8735_v11, 0  ;;  %v3493_v48 = vperm.slane %v8735_v11, 1  ;;  %v3494_v55 = vperm.slane %v8735_v11, 2 }
 0x20f   : > { %v3495_v26 = vperm.slane %v8735_v11, 3  ;;  %v3496_v35 = vperm.slane %v8735_v11, 4  ;;  %v3497_v34 = vperm.slane %v8735_v11, 5  ;;  %v3498_v10 = vperm.slane %v8735_v11, 6 }
 0x210   : > { %v3334_v4 = vadd.f32 %v3333_v27, %v3301_v3  ;;  %v3499_v38 = vperm.slane %v8735_v11, 7 }
 0x212   : > { %v3361_v8 = vadd.f32 %v3360_v47, %v3334_v4 }
 0x213   : > { %v3275_v49 = vpop.f32.mrf.mxu0  ;;  %v3306_v6 = vpop.f32.mrf.mxu1 }
 0x214   : > { %v3382_v1 = vmax.f32 %v3361_v8, 0.0  ;;  %v3276_v45 = vadd.f32 %v3275_v49, %v3245_v60  ;;  %v3337_v50 = vpop.f32.mrf.mxu2 }
 0x215   : > { %v3364_v15 = vpop.f32.mrf.mxu3 }
 0x216   : > { %v3449_v43 = vmax.f32 %v3380_v25, %v3382_v1  ;;  %v3307_v37 = vadd.f32 %v3306_v6, %v3276_v45 }
 0x218   : > { %v3453_v22 = vmax.f32 %v8707_v21, %v3449_v43  ;;  %v3338_v29 = vadd.f32 %v3337_v50, %v3307_v37  ;;  %v3504_v21 = vperm.slane %v8739_v13, 4 }
 0x21a   : > { %v3460_v41 = vrot.slane %v3453_v22, 4  ;;  %v3365_v18 = vadd.f32 %v3364_v15, %v3338_v29 }
 0x21c   : > { %v3462_v56 = vsel %vm3417_vm1, %v8723_v44, %v3460_v41  ;;  %v3463_v2 = vsel %vm3417_vm1, %v3460_v41, %v8723_v44  ;;  %v3398_v17 = vmax.f32 %v3365_v18, 0.0 }
 0x21d   : > { %v3464_v14 = vrot.slane %v3463_v2, 4  ;;  %v3475_v23 = vperm.slane %v3462_v56, %v8730_v42 }
 0x21e   : > { %v8772_v39 = vmax.f32 %v3396_v7, %v3398_v17 }
 0x21f   : > { %v3479_v44 = vperm.slane %v3464_v14, %v8730_v42  ;;  %v3560_v16 = vperm.slane %v3475_v23, 0  ;;  %v3561_v31 = vperm.slane %v3475_v23, 1  ;;  %v3562_v19 = vperm.slane %v3475_v23, 2 }
 0x220   : > { %v3563_v54 = vperm.slane %v3475_v23, 3  ;;  %v3564_v59 = vperm.slane %v3475_v23, 4  ;;  %v3565_v57 = vperm.slane %v3475_v23, 5  ;;  %v3566_v27 = vperm.slane %v3475_v23, 6 }
 0x221   : > { %v3567_v53 = vperm.slane %v3475_v23, 7  ;;  %v3568_v3 = vperm.slane %v3479_v44, 0  ;;  %v3569_v47 = vperm.slane %v3479_v44, 1  ;;  %v3570_v12 = vperm.slane %v3479_v44, 2 }
 0x222   : > { %v3571_v51 = vperm.slane %v3479_v44, 3  ;;  %v3572_v36 = vperm.slane %v3479_v44, 4  ;;  %v3573_v4 = vperm.slane %v3479_v44, 5  ;;  %v3574_v5 = vperm.slane %v3479_v44, 6 }
 0x223   : > { %v3575_v60 = vperm.slane %v3479_v44, 7  ;;  %v3625_v8 = vsel %vm3624_vm2, %v3492_v9, %v3560_v16  ;;  %v3626_v11 = vsel %vm3624_vm2, %v3493_v48, %v3561_v31  ;;  %v3627_v49 = vsel %vm3624_vm2, %v3494_v55, %v3562_v19 }
 0x224   : > { %v3628_v25 = vsel %vm3624_vm2, %v3495_v26, %v3563_v54  ;;  %v3629_v52 = vsel %vm3624_vm2, %v3496_v35, %v3564_v59  ;;  %v3630_v1 = vsel %vm3624_vm2, %v3497_v34, %v3565_v57  ;;  %v3631_v45 = vsel %vm3624_vm2, %v3498_v10, %v3566_v27 }
 0x225   : > { %v3632_v13 = vsel %vm3624_vm2, %v3499_v38, %v3567_v53  ;;  %v3633_v6 = vsel %vm3624_vm2, %v3500_v30, %v3568_v3  ;;  %v3634_v50 = vsel %vm3624_vm2, %v3501_v61, %v3569_v47  ;;  %v3635_v43 = vsel %vm3624_vm2, %v3502_v24, %v3570_v12 }
 0x226   : > { %v3636_v37 = vsel %vm3624_vm2, %v3503_v62, %v3571_v51  ;;  %v3637_v9 = vsel %vm3624_vm2, %v3504_v21, %v3572_v36  ;;  %v3638_v48 = vsel %vm3624_vm2, %v3505_v63, %v3573_v4  ;;  %v3639_v55 = vsel %vm3624_vm2, %v3506_v0, %v3574_v5 }
 0x227   : > { %v3640_v26 = vsel %vm3624_vm2, %v3507_v46, %v3575_v60  ;;  %v3657_v15 = vpack.c.bf16 %v3626_v11, %v3625_v8  ;;  %v3658_v35 = vpack.c.bf16 %v3628_v25, %v3627_v49  ;;  %v3659_v32 = vpack.c.bf16 %v3630_v1, %v3629_v52 }
 0x228   : > { %v3660_v22 = vpack.c.bf16 %v3632_v13, %v3631_v45  ;;  %v3661_v29 = vpack.c.bf16 %v3634_v50, %v3633_v6  ;;  %v3662_v34 = vpack.c.bf16 %v3636_v37, %v3635_v43  ;;  %v3663_v10 = vpack.c.bf16 %v3638_v48, %v3637_v9 }
 0x229   : > { %v3664_v38 = vpack.c.bf16 %v3640_v26, %v3639_v55  ;;  %v3689_v30 = vrot.slane %v3657_v15, 3  ;;  %v3690_v61 = vrot.slane %v3658_v35, 6  ;;  %v3691_v28 = vrot.slane %v3658_v35, 1 }
 0x22a   : > { %v3692_v41 = vrot.slane %v3659_v32, 4  ;;  %v3693_v18 = vrot.slane %v3659_v32, 7  ;;  %v3694_v24 = vrot.slane %v3660_v22, 2  ;;  %v3695_v62 = vrot.slane %v3660_v22, 5 }
 0x22b   : > { %v3696_v21 = vrot.slane %v3661_v29, 3  ;;  %v3697_v63 = vrot.slane %v3662_v34, 6  ;;  %v3698_v7 = vrot.slane %v3662_v34, 1  ;;  %v3699_v56 = vrot.slane %v3663_v10, 4 }
 0x22c   : > { %v3700_v2 = vrot.slane %v3663_v10, 7  ;;  %v3701_v17 = vrot.slane %v3664_v38, 2  ;;  %v3702_v0 = vrot.slane %v3664_v38, 5  ;;  %v3719_v46 = vsel %vm3624_vm2, %v3657_v15, %v3689_v30 }
 0x22d   : > { %v3723_v14 = vsel %vm3720_vm3, %v3690_v61, %v3691_v28  ;;  %v3729_v23 = vsel %vm3726_vm4, %v3692_v41, %v3693_v18  ;;  %v3733_v44 = vsel %vm3730_vm5, %v3694_v24, %v3695_v62  ;;  %v3739_v16 = vsel %vm3624_vm2, %v3661_v29, %v3696_v21 }
 0x22e   : > { %v3725_v31 = vsel %vm3724_vm6, %v3719_v46, %v3723_v14  ;;  %v3735_v19 = vsel %vm3734_vm7, %v3729_v23, %v3733_v44  ;;  %v3742_v54 = vsel %vm3720_vm3, %v3697_v63, %v3698_v7  ;;  %v3746_v59 = vsel %vm3726_vm4, %v3699_v56, %v3700_v2 }
 0x22f   : > { %v3736_v57 = vsel %vm3417_vm1, %v3725_v31, %v3735_v19  ;;  %v3743_v27 = vsel %vm3724_vm6, %v3739_v16, %v3742_v54  ;;  %v3749_v53 = vsel %vm3730_vm5, %v3701_v17, %v3702_v0  ;;  %v3455_v3 = vmax.f32 %v8711_v58, %v8772_v39 }
 0x230   : > { %v3508_v47 = vperm.slane %v8767_v20, 0  ;;  %v3509_v12 = vperm.slane %v8767_v20, 1  ;;  %v3750_v51 = vsel %vm3734_vm7, %v3746_v59, %v3749_v53  ;;  %3786 = vst [vmem:[#allocation2] sm:$0xff] %v3736_v57  ;;  %v3510_v36 = vperm.slane %v8767_v20, 2 }
 0x231   : > { %v3511_v4 = vperm.slane %v8767_v20, 3  ;;  %v3751_v5 = vsel %vm3417_vm1, %v3743_v27, %v3750_v51  ;;  %v3461_v60 = vrot.slane %v3455_v3, 4  ;;  %v7948_v8 = vmov 0.0  }
 0x232   : > { %3790 = vst [vmem:[#allocation3] sm:$0xf] %v7948_v8  ;;  %v3512_v11 = vperm.slane %v8767_v20, 4  ;;  %v3513_v58 = vperm.slane %v8767_v20, 5  ;;  %v3514_v39 = vperm.slane %v8767_v20, 6  ;;  %v3515_v49 = vperm.slane %v8767_v20, 7 }
 0x233   : > { %3787 = vst [vmem:[#allocation2 + $0x8] sm:$0xff] %v3751_v5  ;;  %v3516_v25 = vperm.slane %v8770_v40, 0  ;;  %v3517_v52 = vperm.slane %v8770_v40, 1  ;;  %v3465_v1 = vsel %vm3417_vm1, %v8727_v33, %v3461_v60  ;;  %v3466_v45 = vsel %vm3417_vm1, %v3461_v60, %v8727_v33 }
 0x234   : > { %v3518_v13 = vperm.slane %v8770_v40, 2  ;;  %v3519_v6 = vperm.slane %v8770_v40, 3  ;;  %v3467_v50 = vrot.slane %v3466_v45, 4  ;;  %v3483_v43 = vperm.slane %v3465_v1, %v8730_v42 }
 0x235   : > { %v3520_v20 = vperm.slane %v8770_v40, 4  ;;  %v3521_v37 = vperm.slane %v8770_v40, 5  ;;  %v3522_v9 = vperm.slane %v8770_v40, 6  ;;  %v3523_v48 = vperm.slane %v8770_v40, 7 }
 0x236   : > { %v3487_v55 = vperm.slane %v3467_v50, %v8730_v42  ;;  %v3576_v26 = vperm.slane %v3483_v43, 0  ;;  %v3577_v15 = vperm.slane %v3483_v43, 1  ;;  %v3578_v33 = vperm.slane %v3483_v43, 2 }
 0x237   : > { %v3579_v35 = vperm.slane %v3483_v43, 3  ;;  %v3580_v32 = vperm.slane %v3483_v43, 4  ;;  %v3581_v22 = vperm.slane %v3483_v43, 5  ;;  %v3582_v29 = vperm.slane %v3483_v43, 6 }
 0x238   : > { %v3583_v34 = vperm.slane %v3483_v43, 7  ;;  %v3584_v10 = vperm.slane %v3487_v55, 0  ;;  %v3585_v38 = vperm.slane %v3487_v55, 1  ;;  %v3586_v30 = vperm.slane %v3487_v55, 2 }
 0x239   : > { %v3587_v61 = vperm.slane %v3487_v55, 3  ;;  %v3588_v28 = vperm.slane %v3487_v55, 4  ;;  %v3589_v41 = vperm.slane %v3487_v55, 5  ;;  %v3590_v18 = vperm.slane %v3487_v55, 6 }
 0x23a   : > { %v3591_v24 = vperm.slane %v3487_v55, 7  ;;  %v3641_v40 = vsel %vm3624_vm2, %v3508_v47, %v3576_v26  ;;  %v3642_v42 = vsel %vm3624_vm2, %v3509_v12, %v3577_v15  ;;  %v3643_v62 = vsel %vm3624_vm2, %v3510_v36, %v3578_v33 }
 0x23b   : > { %v3644_v21 = vsel %vm3624_vm2, %v3511_v4, %v3579_v35  ;;  %v3645_v63 = vsel %vm3624_vm2, %v3512_v11, %v3580_v32  ;;  %v3646_v7 = vsel %vm3624_vm2, %v3513_v58, %v3581_v22  ;;  %v3647_v56 = vsel %vm3624_vm2, %v3514_v39, %v3582_v29 }
 0x23c   : > { %v3648_v2 = vsel %vm3624_vm2, %v3515_v49, %v3583_v34  ;;  %v3649_v17 = vsel %vm3624_vm2, %v3516_v25, %v3584_v10  ;;  %v3650_v0 = vsel %vm3624_vm2, %v3517_v52, %v3585_v38  ;;  %v3651_v46 = vsel %vm3624_vm2, %v3518_v13, %v3586_v30 }
 0x23d   : > { %v3652_v14 = vsel %vm3624_vm2, %v3519_v6, %v3587_v61  ;;  %v3653_v23 = vsel %vm3624_vm2, %v3520_v20, %v3588_v28  ;;  %v3654_v44 = vsel %vm3624_vm2, %v3521_v37, %v3589_v41  ;;  %v3655_v16 = vsel %vm3624_vm2, %v3522_v9, %v3590_v18 }
 0x23e   : > { %v3656_v31 = vsel %vm3624_vm2, %v3523_v48, %v3591_v24  ;;  %v3665_v19 = vpack.c.bf16 %v3642_v42, %v3641_v40  ;;  %v3666_v54 = vpack.c.bf16 %v3644_v21, %v3643_v62  ;;  %v3667_v59 = vpack.c.bf16 %v3646_v7, %v3645_v63 }
 0x23f   : > { %v3668_v57 = vpack.c.bf16 %v3648_v2, %v3647_v56  ;;  %v3669_v27 = vpack.c.bf16 %v3650_v0, %v3649_v17  ;;  %v3670_v53 = vpack.c.bf16 %v3652_v14, %v3651_v46  ;;  %v3671_v3 = vpack.c.bf16 %v3654_v44, %v3653_v23 }
 0x240   : > { %v3672_v47 = vpack.c.bf16 %v3656_v31, %v3655_v16  ;;  %v3703_v12 = vrot.slane %v3665_v19, 3  ;;  %v3704_v51 = vrot.slane %v3666_v54, 6  ;;  %v3705_v36 = vrot.slane %v3666_v54, 1 }
 0x241   : > { %v3706_v4 = vrot.slane %v3667_v59, 4  ;;  %v3707_v5 = vrot.slane %v3667_v59, 7  ;;  %v3708_v60 = vrot.slane %v3668_v57, 2  ;;  %v3709_v8 = vrot.slane %v3668_v57, 5 }
 0x242   : > { %v3710_v11 = vrot.slane %v3669_v27, 3  ;;  %v3711_v58 = vrot.slane %v3670_v53, 6  ;;  %v3712_v39 = vrot.slane %v3670_v53, 1  ;;  %v3713_v49 = vrot.slane %v3671_v3, 4 }
 0x243   : > { %v3714_v25 = vrot.slane %v3671_v3, 7  ;;  %v3715_v52 = vrot.slane %v3672_v47, 2  ;;  %v3716_v1 = vrot.slane %v3672_v47, 5  ;;  %v3754_v45 = vsel %vm3624_vm2, %v3665_v19, %v3703_v12 }
 0x244   : > { %v3757_v13 = vsel %vm3720_vm3, %v3704_v51, %v3705_v36  ;;  %v3761_v6 = vsel %vm3726_vm4, %v3706_v4, %v3707_v5  ;;  %v3764_v50 = vsel %vm3730_vm5, %v3708_v60, %v3709_v8  ;;  %v3769_v43 = vsel %vm3624_vm2, %v3669_v27, %v3710_v11 }
 0x245   : > { %v3758_v20 = vsel %vm3724_vm6, %v3754_v45, %v3757_v13  ;;  %v3765_v37 = vsel %vm3734_vm7, %v3761_v6, %v3764_v50  ;;  %v3772_v9 = vsel %vm3720_vm3, %v3711_v58, %v3712_v39  ;;  %v3776_v48 = vsel %vm3726_vm4, %v3713_v49, %v3714_v25 }
 0x246   : > { %v3766_v55 = vsel %vm3417_vm1, %v3758_v20, %v3765_v37  ;;  %v3773_v26 = vsel %vm3724_vm6, %v3769_v43, %v3772_v9  ;;  %v3779_v15 = vsel %vm3730_vm5, %v3715_v52, %v3716_v1 }
 0x247   : > { %v3780_v33 = vsel %vm3734_vm7, %v3776_v48, %v3779_v15  ;;  %3788 = vst [vmem:[#allocation2 + $0x10] sm:$0xff] %v3766_v55 }
 0x248   : > { %v3781_v35 = vsel %vm3417_vm1, %v3773_v26, %v3780_v33 }
 0x249   : > { %3789 = vst [vmem:[#allocation2 + $0x18] sm:$0xff] %v3781_v35 }
 0x24a PF: > { %v6650_v32 = vld [vmem:[%s8004_s30 + $0x70] sm:$0xf]  ;;  %v7637_v22 = vld [vmem:[%s8004_s30 + $0x74] sm:$0xf0]  ;;  %v6642_v24 = vld [vmem:[%s8004_s30 + $0x60] sm:$0xf] }
 0x24b   : > { %v6714_v29 = vld [vmem:[%s8004_s30 + $0xf0] sm:$0xf]  ;;  %v6651_v34 = vor.u32 %v7637_v22, %v6650_v32  ;;  %v7653_v10 = vld [vmem:[%s8004_s30 + $0xf4] sm:$0xf0]  ;;  %v7635_v42 = vld [vmem:[%s8004_s30 + $0x64] sm:$0xf0] }
 0x24c   : > { %v6778_v38 = vld [vmem:[%s8004_s30 + $0x170] sm:$0xf]  ;;  %v7669_v30 = vld [vmem:[%s8004_s30 + $0x174] sm:$0xf0]  ;;  %v6715_v61 = vor.u32 %v7653_v10, %v6714_v29  ;;  %v6706_v62 = vld [vmem:[%s8004_s30 + $0xe0] sm:$0xf]  ;;  %v6643_v63 = vor.u32 %v7635_v42, %v6642_v24 }
 0x24d   : > { %v6779_v28 = vor.u32 %v7669_v30, %v6778_v38  ;;  %v6842_v41 = vld [vmem:[%s8004_s30 + $0x1f0] sm:$0xf]  ;;  %v7685_v18 = vld [vmem:[%s8004_s30 + $0x1f4] sm:$0xf0]  ;;  %5370 = vmatpush.bf16.msra.mxu0 %v6651_v34  ;;  %v7651_v21 = vld [vmem:[%s8004_s30 + $0xe4] sm:$0xf0] }
 0x24e   : > { %v6843_v40 = vor.u32 %v7685_v18, %v6842_v41  ;;  %5383 = vmatpush.bf16.msra.mxu1 %v6715_v61  ;;  %v6707_v7 = vor.u32 %v7651_v21, %v6706_v62  ;;  %v6770_v56 = vld [vmem:[%s8004_s30 + $0x160] sm:$0xf]  ;;  %v7667_v2 = vld [vmem:[%s8004_s30 + $0x164] sm:$0xf0]  ;;  %v6634_v14 = vld [vmem:[%s8004_s30 + $0x50] sm:$0xf] }
 0x24f   : > { %5396 = vmatpush.bf16.msra.mxu2 %v6779_v28  ;;  %v6834_v17 = vld [vmem:[%s8004_s30 + $0x1e0] sm:$0xf]  ;;  %v6771_v0 = vor.u32 %v7667_v2, %v6770_v56  ;;  %v7683_v46 = vld [vmem:[%s8004_s30 + $0x1e4] sm:$0xf0]  ;;  %v7633_v23 = vld [vmem:[%s8004_s30 + $0x54] sm:$0xf0] }
 0x250   : > { %5409 = vmatpush.bf16.msra.mxu3 %v6843_v40  ;;  %v6835_v44 = vor.u32 %v7683_v46, %v6834_v17  ;;  %v6698_v16 = vld [vmem:[%s8004_s30 + $0xd0] sm:$0xf]  ;;  %v7649_v31 = vld [vmem:[%s8004_s30 + $0xd4] sm:$0xf0]  ;;  %v6635_v54 = vor.u32 %v7633_v23, %v6634_v14  ;;  %v6626_v47 = vld [vmem:[%s8004_s30 + $0x40] sm:$0xf] }
 0x251   : > { %v6762_v19 = vld [vmem:[%s8004_s30 + $0x150] sm:$0xf]  ;;  %5371 = vmatpush.bf16.msra.mxu0 %v6643_v63  ;;  %v7665_v59 = vld [vmem:[%s8004_s30 + $0x154] sm:$0xf0]  ;;  %v6699_v53 = vor.u32 %v7649_v31, %v6698_v16  ;;  %v7631_v12 = vld [vmem:[%s8004_s30 + $0x44] sm:$0xf0] }
 0x252   : > { %v6826_v57 = vld [vmem:[%s8004_s30 + $0x1d0] sm:$0xf]  ;;  %v7681_v27 = vld [vmem:[%s8004_s30 + $0x1d4] sm:$0xf0]  ;;  %5384 = vmatpush.bf16.msra.mxu1 %v6707_v7  ;;  %v6763_v3 = vor.u32 %v7665_v59, %v6762_v19  ;;  %v6690_v51 = vld [vmem:[%s8004_s30 + $0xc0] sm:$0xf]  ;;  %v6627_v58 = vor.u32 %v7631_v12, %v6626_v47 }
 0x253   : > { %5397 = vmatpush.bf16.msra.mxu2 %v6771_v0  ;;  %v6827_v36 = vor.u32 %v7681_v27, %v6826_v57  ;;  %v7647_v4 = vld [vmem:[%s8004_s30 + $0xc4] sm:$0xf0]  ;;  %v6754_v5 = vld [vmem:[%s8004_s30 + $0x140] sm:$0xf]  ;;  %v6618_v25 = vld [vmem:[%s8004_s30 + $0x30] sm:$0xf] }
 0x254   : > { %5410 = vmatpush.bf16.msra.mxu3 %v6835_v44  ;;  %v7663_v60 = vld [vmem:[%s8004_s30 + $0x144] sm:$0xf0]  ;;  %v6818_v8 = vld [vmem:[%s8004_s30 + $0x1c0] sm:$0xf]  ;;  %v6691_v39 = vor.u32 %v7647_v4, %v6690_v51  ;;  %v7629_v52 = vld [vmem:[%s8004_s30 + $0x34] sm:$0xf0] }
 0x255   : > { %v7679_v11 = vld [vmem:[%s8004_s30 + $0x1c4] sm:$0xf0]  ;;  %5372 = vmatpush.bf16.msra.mxu0 %v6635_v54  ;;  %v6755_v49 = vor.u32 %v7663_v60, %v6754_v5  ;;  %v6682_v1 = vld [vmem:[%s8004_s30 + $0xb0] sm:$0xf]  ;;  %v7645_v13 = vld [vmem:[%s8004_s30 + $0xb4] sm:$0xf0]  ;;  %v6619_v37 = vor.u32 %v7629_v52, %v6618_v25 }
 0x256   : > { %5385 = vmatpush.bf16.msra.mxu1 %v6699_v53  ;;  %v6819_v45 = vor.u32 %v7679_v11, %v6818_v8  ;;  %v6746_v6 = vld [vmem:[%s8004_s30 + $0x130] sm:$0xf]  ;;  %v7661_v50 = vld [vmem:[%s8004_s30 + $0x134] sm:$0xf0]  ;;  %v6683_v9 = vor.u32 %v7645_v13, %v6682_v1  ;;  %v6610_v55 = vld [vmem:[%s8004_s30 + $0x20] sm:$0xf] }
 0x257   : > { %5398 = vmatpush.bf16.msra.mxu2 %v6763_v3  ;;  %v6810_v43 = vld [vmem:[%s8004_s30 + $0x1b0] sm:$0xf]  ;;  %v7677_v20 = vld [vmem:[%s8004_s30 + $0x1b4] sm:$0xf0]  ;;  %v6747_v48 = vor.u32 %v7661_v50, %v6746_v6  ;;  %v7627_v26 = vld [vmem:[%s8004_s30 + $0x24] sm:$0xf0] }
 0x258   : > { %5411 = vmatpush.bf16.msra.mxu3 %v6827_v36  ;;  %v6674_v15 = vld [vmem:[%s8004_s30 + $0xa0] sm:$0xf]  ;;  %v6811_v33 = vor.u32 %v7677_v20, %v6810_v43  ;;  %v7643_v35 = vld [vmem:[%s8004_s30 + $0xa4] sm:$0xf0]  ;;  %v6611_v10 = vor.u32 %v7627_v26, %v6610_v55  ;;  %v6602_v61 = vld [vmem:[%s8004_s30 + $0x10] sm:$0xf] }
 0x259   : > { %5373 = vmatpush.bf16.msra.mxu0 %v6627_v58  ;;  %v6738_v32 = vld [vmem:[%s8004_s30 + $0x120] sm:$0xf]  ;;  %v7659_v22 = vld [vmem:[%s8004_s30 + $0x124] sm:$0xf0]  ;;  %v6675_v38 = vor.u32 %v7643_v35, %v6674_v15  ;;  %v7625_v28 = vld [vmem:[%s8004_s30 + $0x14] sm:$0xf0] }
 0x25a   : > { %5386 = vmatpush.bf16.msra.mxu1 %v6691_v39  ;;  %v6802_v29 = vld [vmem:[%s8004_s30 + $0x1a0] sm:$0xf]  ;;  %v7675_v34 = vld [vmem:[%s8004_s30 + $0x1a4] sm:$0xf0]  ;;  %v6739_v30 = vor.u32 %v7659_v22, %v6738_v32  ;;  %v6666_v41 = vld [vmem:[%s8004_s30 + $0x90] sm:$0xf]  ;;  %v6603_v63 = vor.u32 %v7625_v28, %v6602_v61 }
 0x25b   : > { %5399 = vmatpush.bf16.msra.mxu2 %v6755_v49  ;;  %v6803_v18 = vor.u32 %v7675_v34, %v6802_v29  ;;  %v7641_v24 = vld [vmem:[%s8004_s30 + $0x94] sm:$0xf0]  ;;  %v6730_v40 = vld [vmem:[%s8004_s30 + $0x110] sm:$0xf]  ;;  %v6594_v7 = vld [vmem:[%s8004_s30] sm:$0xf] }
 0x25c   : > { %5412 = vmatpush.bf16.msra.mxu3 %v6819_v45  ;;  %v7657_v42 = vld [vmem:[%s8004_s30 + $0x114] sm:$0xf0]  ;;  %v6794_v62 = vld [vmem:[%s8004_s30 + $0x190] sm:$0xf]  ;;  %v7623_v56 = vld [vmem:[%s8004_s30 + $0x4] sm:$0xf0]  ;;  %v6667_v2 = vor.u32 %v7641_v24, %v6666_v41 }
 0x25d   : > { %5374 = vmatpush.bf16.msra.mxu0 %v6619_v37  ;;  %v7673_v21 = vld [vmem:[%s8004_s30 + $0x194] sm:$0xf0]  ;;  %v6731_v17 = vor.u32 %v7657_v42, %v6730_v40  ;;  %v6658_v0 = vld [vmem:[%s8004_s30 + $0x80] sm:$0xf]  ;;  %v7639_v46 = vld [vmem:[%s8004_s30 + $0x84] sm:$0xf0]  ;;  %v6595_v57 = vor.u32 %v7623_v56, %v6594_v7 }
 0x25e   : > { %5387 = vmatpush.bf16.msra.mxu1 %v6683_v9  ;;  %v6722_v14 = vld [vmem:[%s8004_s30 + $0x100] sm:$0xf]  ;;  %v6795_v23 = vor.u32 %v7673_v21, %v6794_v62  ;;  %v7655_v44 = vld [vmem:[%s8004_s30 + $0x104] sm:$0xf0]  ;;  %v6906_v19 = vld [vmem:[%s8004_s30 + $0x270] sm:$0xf]  ;;  %v6659_v47 = vor.u32 %v7639_v46, %v6658_v0 }
 0x25f   : > { %5400 = vmatpush.bf16.msra.mxu2 %v6747_v48  ;;  %v6786_v16 = vld [vmem:[%s8004_s30 + $0x180] sm:$0xf]  ;;  %v7671_v31 = vld [vmem:[%s8004_s30 + $0x184] sm:$0xf0]  ;;  %v7701_v54 = vld [vmem:[%s8004_s30 + $0x274] sm:$0xf0]  ;;  %v6723_v12 = vor.u32 %v7655_v44, %v6722_v14 }
 0x260   : > { %5413 = vmatpush.bf16.msra.mxu3 %v6811_v33  ;;  %v6970_v59 = vld [vmem:[%s8004_s30 + $0x2f0] sm:$0xf]  ;;  %v7717_v27 = vld [vmem:[%s8004_s30 + $0x2f4] sm:$0xf0]  ;;  %v6787_v4 = vor.u32 %v7671_v31, %v6786_v16  ;;  %v6907_v5 = vor.u32 %v7701_v54, %v6906_v19  ;;  %v6898_v11 = vld [vmem:[%s8004_s30 + $0x260] sm:$0xf] }
 0x261   : > { %5375 = vmatpush.bf16.msra.mxu0 %v6611_v10  ;;  %v7034_v53 = vld [vmem:[%s8004_s30 + $0x370] sm:$0xf]  ;;  %v7733_v3 = vld [vmem:[%s8004_s30 + $0x374] sm:$0xf0]  ;;  %v6971_v60 = vor.u32 %v7717_v27, %v6970_v59  ;;  %v7699_v58 = vld [vmem:[%s8004_s30 + $0x264] sm:$0xf0] }
 0x262   : > { %5388 = vmatpush.bf16.msra.mxu1 %v6675_v38  ;;  %v7098_v51 = vld [vmem:[%s8004_s30 + $0x3f0] sm:$0xf]  ;;  %v7749_v36 = vld [vmem:[%s8004_s30 + $0x3f4] sm:$0xf0]  ;;  %v7035_v8 = vor.u32 %v7733_v3, %v7034_v53  ;;  %v6962_v39 = vld [vmem:[%s8004_s30 + $0x2e0] sm:$0xf]  ;;  %v6899_v6 = vor.u32 %v7699_v58, %v6898_v11 }
 0x263   : > { %5401 = vmatpush.bf16.msra.mxu2 %v6739_v30  ;;  %v7099_v49 = vor.u32 %v7749_v36, %v7098_v51  ;;  %v7715_v25 = vld [vmem:[%s8004_s30 + $0x2e4] sm:$0xf0]  ;;  %v7026_v52 = vld [vmem:[%s8004_s30 + $0x360] sm:$0xf]  ;;  %v6890_v50 = vld [vmem:[%s8004_s30 + $0x250] sm:$0xf] }
 0x264   : > { %5414 = vmatpush.bf16.msra.mxu3 %v6803_v18  ;;  %v7731_v1 = vld [vmem:[%s8004_s30 + $0x364] sm:$0xf0]  ;;  %v7090_v45 = vld [vmem:[%s8004_s30 + $0x3e0] sm:$0xf]  ;;  %v7697_v43 = vld [vmem:[%s8004_s30 + $0x254] sm:$0xf0]  ;;  %v6963_v20 = vor.u32 %v7715_v25, %v6962_v39 }
 0x265   : > { %5376 = vmatpush.bf16.msra.mxu0 %v6603_v63  ;;  %v7747_v13 = vld [vmem:[%s8004_s30 + $0x3e4] sm:$0xf0]  ;;  %v7027_v37 = vor.u32 %v7731_v1, %v7026_v52  ;;  %v6954_v9 = vld [vmem:[%s8004_s30 + $0x2d0] sm:$0xf]  ;;  %v7713_v48 = vld [vmem:[%s8004_s30 + $0x2d4] sm:$0xf0]  ;;  %v6891_v32 = vor.u32 %v7697_v43, %v6890_v50 }
 0x266   : > { %5389 = vmatpush.bf16.msra.mxu1 %v6667_v2  ;;  %s6591_s20 = sshll.u32 %s7996_s25, 11  ;;  %v7091_v55 = vor.u32 %v7747_v13, %v7090_v45  ;;  %v7018_v26 = vld [vmem:[%s8004_s30 + $0x350] sm:$0xf]  ;;  %v7729_v15 = vld [vmem:[%s8004_s30 + $0x354] sm:$0xf0]  ;;  %v6955_v34 = vor.u32 %v7713_v48, %v6954_v9  ;;  %vm5789_vm8 = vcmask 1041408  }
 0x267   : > { %5402 = vmatpush.bf16.msra.mxu2 %v6731_v17  ;;  %s8946_s21 = sshra.s32 %s6591_s20, 7  ;;  %v7082_v33 = vld [vmem:[%s8004_s30 + $0x3d0] sm:$0xf]  ;;  %v7745_v35 = vld [vmem:[%s8004_s30 + $0x3d4] sm:$0xf0]  ;;  %v7019_v10 = vor.u32 %v7729_v15, %v7018_v26  ;;  %p7616_p5 = scmp.ne.s32.totalorder %s7996_s25, 1 }
 0x268   : > { %5415 = vmatpush.bf16.msra.mxu3 %v6795_v23  ;;  %v6882_v22 = vld [vmem:[%s8004_s30 + $0x240] sm:$0xf]  ;;  %s3795_s22 = scalar_lea.vmem [#allocation2], %s8946_s21  ;;  %v7695_v38 = vld [vmem:[%s8004_s30 + $0x244] sm:$0xf0]  ;;  %v7083_v61 = vor.u32 %v7745_v35, %v7082_v33 }
 0x269   : > { %5377 = vmatpush.bf16.msra.mxu0 %v6595_v57  ;;  %v3796_v29 = vld [vmem:[%s3795_s22] sm:$0xff]  ;;  %v7711_v28 = vld [vmem:[%s8004_s30 + $0x2c4] sm:$0xf0]  ;;  %v6883_v42 = vor.u32 %v7695_v38, %v6882_v22  ;;  %v6874_v63 = vld [vmem:[%s8004_s30 + $0x230] sm:$0xf] }
 0x26a   : > { %5390 = vmatpush.bf16.msra.mxu1 %v6659_v47  ;;  %v6946_v30 = vld [vmem:[%s8004_s30 + $0x2c0] sm:$0xf]  ;;  %4055 = vst [vmem:[#allocation1] ss:$9 sm:$0xff] %v3796_v29  ;;  %v7727_v18 = vld [vmem:[%s8004_s30 + $0x344] sm:$0xf0] }
 0x26b   : > { %5403 = vmatpush.bf16.msra.mxu2 %v6723_v12  ;;  %v7010_v41 = vld [vmem:[%s8004_s30 + $0x340] sm:$0xf]  ;;  %v7743_v40 = vld [vmem:[%s8004_s30 + $0x3c4] sm:$0xf0]  ;;  %v6947_v62 = vor.u32 %v7711_v28, %v6946_v30  ;;  %v7693_v7 = vld [vmem:[%s8004_s30 + $0x234] sm:$0xf0] }
 0x26c   : > { %5416 = vmatpush.bf16.msra.mxu3 %v6787_v4  ;;  %v7074_v24 = vld [vmem:[%s8004_s30 + $0x3c0] sm:$0xf]  ;;  %v7011_v21 = vor.u32 %v7727_v18, %v7010_v41  ;;  %v6938_v56 = vld [vmem:[%s8004_s30 + $0x2b0] sm:$0xf]  ;;  %v7709_v17 = vld [vmem:[%s8004_s30 + $0x2b4] sm:$0xf0]  ;;  %v6875_v16 = vor.u32 %v7693_v7, %v6874_v63 }
 0x26d   : > { %5422 = vmatpush.bf16.msrb.mxu0 %v6907_v5  ;;  %v7075_v2 = vor.u32 %v7743_v40, %v7074_v24  ;;  %v7002_v0 = vld [vmem:[%s8004_s30 + $0x330] sm:$0xf]  ;;  %v7725_v46 = vld [vmem:[%s8004_s30 + $0x334] sm:$0xf0]  ;;  %v6866_v44 = vld [vmem:[%s8004_s30 + $0x220] sm:$0xf]  ;;  %v6939_v59 = vor.u32 %v7709_v17, %v6938_v56 }
 0x26e   : > { %5435 = vmatpush.bf16.msrb.mxu1 %v6971_v60  ;;  %v7066_v14 = vld [vmem:[%s8004_s30 + $0x3b0] sm:$0xf]  ;;  %v7741_v23 = vld [vmem:[%s8004_s30 + $0x3b4] sm:$0xf0]  ;;  %v7003_v57 = vor.u32 %v7725_v46, %v7002_v0  ;;  %v7691_v27 = vld [vmem:[%s8004_s30 + $0x224] sm:$0xf0] }
 0x26f   : > { %5448 = vmatpush.bf16.msrb.mxu2 %v7035_v8  ;;  %v6930_v53 = vld [vmem:[%s8004_s30 + $0x2a0] sm:$0xf]  ;;  %v7067_v47 = vor.u32 %v7741_v23, %v7066_v14  ;;  %v7707_v12 = vld [vmem:[%s8004_s30 + $0x2a4] sm:$0xf0]  ;;  %v6867_v60 = vor.u32 %v7691_v27, %v6866_v44  ;;  %v6858_v8 = vld [vmem:[%s8004_s30 + $0x210] sm:$0xf] }
 0x270   : > { %5461 = vmatpush.bf16.msrb.mxu3 %v7099_v49  ;;  %v6994_v51 = vld [vmem:[%s8004_s30 + $0x320] sm:$0xf]  ;;  %v7723_v36 = vld [vmem:[%s8004_s30 + $0x324] sm:$0xf0]  ;;  %v6931_v11 = vor.u32 %v7707_v12, %v6930_v53  ;;  %v7689_v39 = vld [vmem:[%s8004_s30 + $0x214] sm:$0xf0] }
 0x271   : > { %5423 = vmatpush.bf16.msrb.mxu0 %v6899_v6  ;;  %v8970_v31 = vld [vmem:[#allocation1 + $0x12] sm:$0xff]  ;;  %v8972_v19 = vld [vmem:[#allocation1] sm:$0xff]  ;;  %v8978_v3 = vld [vmem:[#allocation1 + $0x9] sm:$0xff]  ;;  %v6995_v58 = vor.u32 %v7723_v36, %v6994_v51 }
 0x272   : > { %5436 = vmatpush.bf16.msrb.mxu1 %v6963_v20  ;;  %v8974_v54 = vld [vmem:[#allocation1 + $0x1b] sm:$0xff]  ;;  %5404 = vmatmul.bf16.vlgmr.msra.gmra.mxu2 %v8970_v31  ;;  %v7739_v5 = vld [vmem:[%s8004_s30 + $0x3a4] sm:$0xf0]  ;;  %v6922_v49 = vld [vmem:[%s8004_s30 + $0x290] sm:$0xf] }
 0x273   : > { %5449 = vmatpush.bf16.msrb.mxu2 %v7027_v37  ;;  %v7058_v4 = vld [vmem:[%s8004_s30 + $0x3a0] sm:$0xf]  ;;  %5378 = vmatmul.bf16.vlgmr.msra.gmra.mxu0 %v8972_v19  ;;  %v7705_v25 = vld [vmem:[%s8004_s30 + $0x294] sm:$0xf0]  ;;  %v3797_v52 = vld [vmem:[%s3795_s22 + $0x8] sm:$0xff]  ;;  %v6859_v37 = vor.u32 %v7689_v39, %v6858_v8 }
 0x274   : > { %5462 = vmatpush.bf16.msrb.mxu3 %v7091_v55  ;;  %5391 = vmatmul.bf16.vlgmr.msra.gmra.mxu1 %v8978_v3  ;;  %v7059_v1 = vor.u32 %v7739_v5, %v7058_v4  ;;  %v6986_v45 = vld [vmem:[%s8004_s30 + $0x310] sm:$0xf]  ;;  %v7721_v13 = vld [vmem:[%s8004_s30 + $0x314] sm:$0xf0]  ;;  %v6850_v43 = vld [vmem:[%s8004_s30 + $0x200] sm:$0xf]  ;;  %v6923_v15 = vor.u32 %v7705_v25, %v6922_v49 }
 0x275   : > { %5424 = vmatpush.bf16.msrb.mxu0 %v6891_v32  ;;  %5417 = vmatmul.bf16.vlgmr.msra.gmra.mxu3 %v8974_v54  ;;  %v7050_v6 = vld [vmem:[%s8004_s30 + $0x390] sm:$0xf]  ;;  %v7737_v50 = vld [vmem:[%s8004_s30 + $0x394] sm:$0xf0]  ;;  %v7687_v20 = vld [vmem:[%s8004_s30 + $0x204] sm:$0xf0]  ;;  %v6987_v33 = vor.u32 %v7721_v13, %v6986_v45 }
 0x276   : > { %5437 = vmatpush.bf16.msrb.mxu1 %v6955_v34  ;;  %v6914_v9 = vld [vmem:[%s8004_s30 + $0x280] sm:$0xf]  ;;  %v7703_v48 = vld [vmem:[%s8004_s30 + $0x284] sm:$0xf0]  ;;  %v7162_v22 = vld [vmem:[%s8004_s30 + $0x470] sm:$0xf]  ;;  %v7051_v34 = vor.u32 %v7737_v50, %v7050_v6  ;;  %v6851_v41 = vor.u32 %v7687_v20, %v6850_v43 }
 0x277   : > { %5450 = vmatpush.bf16.msrb.mxu2 %v7019_v10  ;;  %v6978_v55 = vld [vmem:[%s8004_s30 + $0x300] sm:$0xf]  ;;  %v7719_v26 = vld [vmem:[%s8004_s30 + $0x304] sm:$0xf0]  ;;  %v9008_v29 = vld [vmem:[#allocation1 + $0x36] sm:$0xff] }
 0x278   : > { %5463 = vmatpush.bf16.msrb.mxu3 %v7083_v61  ;;  %v7042_v35 = vld [vmem:[%s8004_s30 + $0x380] sm:$0xf]  ;;  %v7735_v32 = vld [vmem:[%s8004_s30 + $0x384] sm:$0xf0]  ;;  %v9014_v30 = vld [vmem:[#allocation1 + $0x2d] sm:$0xff] }
 0x279   : > { %5425 = vmatpush.bf16.msrb.mxu0 %v6883_v42  ;;  %v9010_v10 = vld [vmem:[#allocation1 + $0x24] sm:$0xff]  ;;  %v7765_v61 = vld [vmem:[%s8004_s30 + $0x474] sm:$0xf0]  ;;  %v7226_v28 = vld [vmem:[%s8004_s30 + $0x4f0] sm:$0xf]  ;;  %v6915_v42 = vor.u32 %v7703_v48, %v6914_v9  ;;  %v7043_v7 = vor.u32 %v7735_v32, %v7042_v35 }
 0x27a   : > { %5438 = vmatpush.bf16.msrb.mxu1 %v6947_v62  ;;  %v9012_v38 = vld [vmem:[#allocation1 + $0x3f] sm:$0xff]  ;;  %v7781_v18 = vld [vmem:[%s8004_s30 + $0x4f4] sm:$0xf0]  ;;  %v7290_v24 = vld [vmem:[%s8004_s30 + $0x570] sm:$0xf]  ;;  %v6979_v62 = vor.u32 %v7719_v26, %v6978_v55  ;;  %v7163_v56 = vor.u32 %v7765_v61, %v7162_v22 }
 0x27b   : > { %5451 = vmatpush.bf16.msrb.mxu2 %v7011_v21  ;;  %4065 = vst [vmem:[#allocation1] ss:$9 sm:$0xff] %v3797_v52  ;;  %v7797_v40 = vld [vmem:[%s8004_s30 + $0x574] sm:$0xf0]  ;;  %v7354_v21 = vld [vmem:[%s8004_s30 + $0x5f0] sm:$0xf] }
 0x27c   : > { %5464 = vmatpush.bf16.msrb.mxu3 %v7075_v2  ;;  %v7813_v63 = vld [vmem:[%s8004_s30 + $0x5f4] sm:$0xf0]  ;;  %v7227_v2 = vor.u32 %v7781_v18, %v7226_v28  ;;  %v7291_v17 = vor.u32 %v7797_v40, %v7290_v24  ;;  %v7154_v0 = vld [vmem:[%s8004_s30 + $0x460] sm:$0xf]  ;;  %v7763_v46 = vld [vmem:[%s8004_s30 + $0x464] sm:$0xf0] }
 0x27d   : > { %5426 = vmatpush.bf16.msrb.mxu0 %v6875_v16  ;;  %v7218_v14 = vld [vmem:[%s8004_s30 + $0x4e0] sm:$0xf]  ;;  %v7355_v23 = vor.u32 %v7813_v63, %v7354_v21  ;;  %v7779_v44 = vld [vmem:[%s8004_s30 + $0x4e4] sm:$0xf0]  ;;  %v7155_v53 = vor.u32 %v7763_v46, %v7154_v0  ;;  %v7146_v51 = vld [vmem:[%s8004_s30 + $0x450] sm:$0xf] }
 0x27e   : > { %5439 = vmatpush.bf16.msrb.mxu1 %v6939_v59  ;;  %v7282_v16 = vld [vmem:[%s8004_s30 + $0x560] sm:$0xf]  ;;  %v7795_v59 = vld [vmem:[%s8004_s30 + $0x564] sm:$0xf0]  ;;  %v7761_v36 = vld [vmem:[%s8004_s30 + $0x454] sm:$0xf0] }
 0x27f   : > { %5452 = vmatpush.bf16.msrb.mxu2 %v7003_v57  ;;  %v7346_v57 = vld [vmem:[%s8004_s30 + $0x5e0] sm:$0xf]  ;;  %v7811_v27 = vld [vmem:[%s8004_s30 + $0x5e4] sm:$0xf0]  ;;  %v7283_v12 = vor.u32 %v7795_v59, %v7282_v16  ;;  %v7210_v4 = vld [vmem:[%s8004_s30 + $0x4d0] sm:$0xf]  ;;  %v7147_v49 = vor.u32 %v7761_v36, %v7146_v51 }
 0x280   : > { %5465 = vmatpush.bf16.msrb.mxu3 %v7067_v47  ;;  %v7219_v47 = vor.u32 %v7779_v44, %v7218_v14  ;;  %v7347_v5 = vor.u32 %v7811_v27, %v7346_v57  ;;  %v7274_v8 = vld [vmem:[%s8004_s30 + $0x550] sm:$0xf]  ;;  %v7809_v39 = vld [vmem:[%s8004_s30 + $0x5d4] sm:$0xf0]  ;;  %v7759_v45 = vld [vmem:[%s8004_s30 + $0x444] sm:$0xf0] }
 0x281   : > { %5427 = vmatpush.bf16.msrb.mxu0 %v6867_v60  ;;  %v7777_v60 = vld [vmem:[%s8004_s30 + $0x4d4] sm:$0xf0]  ;;  %v7202_v13 = vld [vmem:[%s8004_s30 + $0x4c0] sm:$0xf]  ;;  %v7775_v50 = vld [vmem:[%s8004_s30 + $0x4c4] sm:$0xf0] }
 0x282   : > { %5440 = vmatpush.bf16.msrb.mxu1 %v6931_v11  ;;  %v7793_v11 = vld [vmem:[%s8004_s30 + $0x554] sm:$0xf0]  ;;  %v7211_v25 = vor.u32 %v7777_v60, %v7210_v4  ;;  %v7266_v43 = vld [vmem:[%s8004_s30 + $0x540] sm:$0xf]  ;;  %v7791_v20 = vld [vmem:[%s8004_s30 + $0x544] sm:$0xf0]  ;;  %v7203_v55 = vor.u32 %v7775_v50, %v7202_v13 }
 0x283   : > { %5453 = vmatpush.bf16.msrb.mxu2 %v6995_v58  ;;  %v7338_v58 = vld [vmem:[%s8004_s30 + $0x5d0] sm:$0xf]  ;;  %v7275_v52 = vor.u32 %v7793_v11, %v7274_v8  ;;  %v7807_v9 = vld [vmem:[%s8004_s30 + $0x5c4] sm:$0xf0]  ;;  %v7267_v26 = vor.u32 %v7791_v20, %v7266_v43  ;;  %v7773_v22 = vld [vmem:[%s8004_s30 + $0x4b4] sm:$0xf0] }
 0x284   : > { %5466 = vmatpush.bf16.msrb.mxu3 %v7059_v1  ;;  %v7138_v1 = vld [vmem:[%s8004_s30 + $0x440] sm:$0xf]  ;;  %v7339_v6 = vor.u32 %v7809_v39, %v7338_v58  ;;  %v7194_v35 = vld [vmem:[%s8004_s30 + $0x4b0] sm:$0xf]  ;;  %v7789_v61 = vld [vmem:[%s8004_s30 + $0x534] sm:$0xf0] }
 0x285   : > { %5428 = vmatpush.bf16.msrb.mxu0 %v6859_v37  ;;  %v7330_v37 = vld [vmem:[%s8004_s30 + $0x5c0] sm:$0xf]  ;;  %v7139_v48 = vor.u32 %v7759_v45, %v7138_v1  ;;  %v7322_v28 = vld [vmem:[%s8004_s30 + $0x5b0] sm:$0xf]  ;;  %v7195_v24 = vor.u32 %v7773_v22, %v7194_v35  ;;  %v7803_v0 = vld [vmem:[%s8004_s30 + $0x5a4] sm:$0xf0] }
 0x286   : > { %5441 = vmatpush.bf16.msrb.mxu1 %v6923_v15  ;;  %v7130_v15 = vld [vmem:[%s8004_s30 + $0x430] sm:$0xf]  ;;  %v7331_v32 = vor.u32 %v7807_v9, %v7330_v37  ;;  %v7186_v21 = vld [vmem:[%s8004_s30 + $0x4a0] sm:$0xf]  ;;  %v7753_v16 = vld [vmem:[%s8004_s30 + $0x414] sm:$0xf0] }
 0x287   : > { %5454 = vmatpush.bf16.msrb.mxu2 %v6987_v33  ;;  %v7757_v33 = vld [vmem:[%s8004_s30 + $0x434] sm:$0xf0]  ;;  %v7114_v44 = vld [vmem:[%s8004_s30 + $0x410] sm:$0xf]  ;;  %v7106_v4 = vld [vmem:[%s8004_s30 + $0x400] sm:$0xf] }
 0x288   : > { %5467 = vmatpush.bf16.msrb.mxu3 %v7051_v34  ;;  %v7258_v34 = vld [vmem:[%s8004_s30 + $0x530] sm:$0xf]  ;;  %v7131_v18 = vor.u32 %v7757_v33, %v7130_v15  ;;  %v7769_v27 = vld [vmem:[%s8004_s30 + $0x494] sm:$0xf0]  ;;  %v7115_v36 = vor.u32 %v7753_v16, %v7114_v44  ;;  %v7170_v11 = vld [vmem:[%s8004_s30 + $0x480] sm:$0xf] }
 0x289   : > { %5429 = vmatpush.bf16.msrb.mxu0 %v6851_v41  ;;  %v7805_v41 = vld [vmem:[%s8004_s30 + $0x5b4] sm:$0xf0]  ;;  %v7259_v40 = vor.u32 %v7789_v61, %v7258_v34  ;;  %v7178_v59 = vld [vmem:[%s8004_s30 + $0x490] sm:$0xf]  ;;  %v7767_v58 = vld [vmem:[%s8004_s30 + $0x484] sm:$0xf0] }
 0x28a   : > { %5442 = vmatpush.bf16.msrb.mxu1 %v6915_v42  ;;  %v7122_v42 = vld [vmem:[%s8004_s30 + $0x420] sm:$0xf]  ;;  %v7323_v63 = vor.u32 %v7805_v41, %v7322_v28  ;;  %v7801_v51 = vld [vmem:[%s8004_s30 + $0x594] sm:$0xf0]  ;;  %v7179_v60 = vor.u32 %v7769_v27, %v7178_v59  ;;  %v7799_v1 = vld [vmem:[%s8004_s30 + $0x584] sm:$0xf0]  ;;  %v7171_v9 = vor.u32 %v7767_v58, %v7170_v11 }
 0x28b   : > { %5455 = vmatpush.bf16.msrb.mxu2 %v6979_v62  ;;  %v7755_v62 = vld [vmem:[%s8004_s30 + $0x424] sm:$0xf0]  ;;  %v7234_v39 = vld [vmem:[%s8004_s30 + $0x500] sm:$0xf]  ;;  %v7418_v45 = vld [vmem:[%s8004_s30 + $0x670] sm:$0xf] }
 0x28c   : > { %5468 = vmatpush.bf16.msrb.mxu3 %v7043_v7  ;;  %5430 = vmatmul.bf16.vlgmr.msrb.gmra.mxu0 %v9010_v10  ;;  %v7771_v7 = vld [vmem:[%s8004_s30 + $0x4a4] sm:$0xf0]  ;;  %v7123_v46 = vor.u32 %v7755_v62, %v7122_v42  ;;  %v7829_v13 = vld [vmem:[%s8004_s30 + $0x674] sm:$0xf0]  ;;  %v7546_v20 = vld [vmem:[%s8004_s30 + $0x770] sm:$0xf] }
 0x28d   : > { %5474 = vmatpush.bf16.msra.mxu0 %v7163_v56  ;;  %5443 = vmatmul.bf16.vlgmr.msrb.gmra.mxu1 %v9014_v30  ;;  %v7250_v56 = vld [vmem:[%s8004_s30 + $0x520] sm:$0xf]  ;;  %v7187_v14 = vor.u32 %v7771_v7, %v7186_v21  ;;  %v7845_v43 = vld [vmem:[%s8004_s30 + $0x6f4] sm:$0xf0]  ;;  %v7419_v33 = vor.u32 %v7829_v13, %v7418_v45  ;;  %v7827_v34 = vld [vmem:[%s8004_s30 + $0x664] sm:$0xf0] }
 0x28e   : > { %5487 = vmatpush.bf16.msra.mxu1 %v7227_v2  ;;  %5456 = vmatmul.bf16.vlgmr.msrb.gmra.mxu2 %v9008_v29  ;;  %v7787_v2 = vld [vmem:[%s8004_s30 + $0x524] sm:$0xf0]  ;;  %v7861_v37 = vld [vmem:[%s8004_s30 + $0x774] sm:$0xf0]  ;;  %v7410_v22 = vld [vmem:[%s8004_s30 + $0x660] sm:$0xf] }
 0x28f   : > { %5500 = vmatpush.bf16.msra.mxu2 %v7291_v17  ;;  %5469 = vmatmul.bf16.vlgmr.msrb.gmra.mxu3 %v9012_v38  ;;  %v7314_v17 = vld [vmem:[%s8004_s30 + $0x5a0] sm:$0xf]  ;;  %v7843_v41 = vld [vmem:[%s8004_s30 + $0x6e4] sm:$0xf0]  ;;  %v4068_v21 = vld [vmem:[#allocation1 + $0x12] sm:$0xff] }
 0x290   : > { %5513 = vmatpush.bf16.msra.mxu3 %v7355_v23  ;;  %v7251_v23 = vor.u32 %v7787_v2, %v7250_v56  ;;  %v7315_v57 = vor.u32 %v7803_v0, %v7314_v17  ;;  %v7474_v61 = vld [vmem:[%s8004_s30 + $0x6e0] sm:$0xf]  ;;  %v7875_v62 = vld [vmem:[%s8004_s30 + $0x7e4] sm:$0xf0]  ;;  %v7411_v56 = vor.u32 %v7827_v34, %v7410_v22  ;;  %v7402_v0 = vld [vmem:[%s8004_s30 + $0x650] sm:$0xf] }
 0x291   : > { %5475 = vmatpush.bf16.msra.mxu0 %v7155_v53  ;;  %v7242_v53 = vld [vmem:[%s8004_s30 + $0x510] sm:$0xf]  ;;  %v7602_v42 = vld [vmem:[%s8004_s30 + $0x7e0] sm:$0xf]  ;;  %v7475_v2 = vor.u32 %v7843_v41, %v7474_v61  ;;  %v7841_v44 = vld [vmem:[%s8004_s30 + $0x6d4] sm:$0xf0] }
 0x292   : > { %5488 = vmatpush.bf16.msra.mxu1 %v7219_v47  ;;  %v7785_v47 = vld [vmem:[%s8004_s30 + $0x514] sm:$0xf0]  ;;  %v7530_v16 = vld [vmem:[%s8004_s30 + $0x750] sm:$0xf]  ;;  %v7855_v11 = vld [vmem:[%s8004_s30 + $0x744] sm:$0xf0] }
 0x293   : > { %5501 = vmatpush.bf16.msra.mxu2 %v7283_v12  ;;  %v7306_v12 = vld [vmem:[%s8004_s30 + $0x590] sm:$0xf]  ;;  %v7243_v8 = vor.u32 %v7785_v47, %v7242_v53  ;;  %v4069_v7 = vld [vmem:[#allocation1 + $0x1b] sm:$0xff]  ;;  %v7835_v22 = vld [vmem:[%s8004_s30 + $0x6a4] sm:$0xf0] }
 0x294   : > { %5514 = vmatpush.bf16.msra.mxu3 %v7347_v5  ;;  %v7751_v5 = vld [vmem:[%s8004_s30 + $0x404] sm:$0xf0]  ;;  %v7857_v59 = vld [vmem:[%s8004_s30 + $0x754] sm:$0xf0]  ;;  %v7586_v58 = vld [vmem:[%s8004_s30 + $0x7c0] sm:$0xf] }
 0x295   : > { %5476 = vmatpush.bf16.msra.mxu0 %v7147_v49  ;;  %v7307_v49 = vor.u32 %v7801_v51, %v7306_v12  ;;  %v7107_v50 = vor.u32 %v7751_v5, %v7106_v4  ;;  %v7873_v27 = vld [vmem:[%s8004_s30 + $0x7d4] sm:$0xf0]  ;;  %v7531_v12 = vor.u32 %v7857_v59, %v7530_v16  ;;  %v7394_v51 = vld [vmem:[%s8004_s30 + $0x640] sm:$0xf]  ;;  %v7450_v13 = vld [vmem:[%s8004_s30 + $0x6b0] sm:$0xf] }
 0x296   : > { %5489 = vmatpush.bf16.msra.mxu1 %v7211_v25  ;;  %v7783_v25 = vld [vmem:[%s8004_s30 + $0x504] sm:$0xf0]  ;;  %v7458_v4 = vld [vmem:[%s8004_s30 + $0x6c0] sm:$0xf]  ;;  %v7821_v45 = vld [vmem:[%s8004_s30 + $0x634] sm:$0xf0] }
 0x297   : > { %5502 = vmatpush.bf16.msra.mxu2 %v7275_v52  ;;  %v7298_v52 = vld [vmem:[%s8004_s30 + $0x580] sm:$0xf]  ;;  %v7851_v61 = vld [vmem:[%s8004_s30 + $0x724] sm:$0xf0] }
 0x298   : > { %5515 = vmatpush.bf16.msra.mxu3 %v7339_v6  ;;  %v7482_v6 = vld [vmem:[%s8004_s30 + $0x6f0] sm:$0xf]  ;;  %v7299_v15 = vor.u32 %v7799_v1, %v7298_v52  ;;  %v7506_v34 = vld [vmem:[%s8004_s30 + $0x720] sm:$0xf]  ;;  %v7867_v41 = vld [vmem:[%s8004_s30 + $0x7a4] sm:$0xf0] }
 0x299   : > { %5477 = vmatpush.bf16.msra.mxu0 %v7139_v48  ;;  %v7235_v48 = vor.u32 %v7783_v25, %v7234_v39  ;;  %v7483_v35 = vor.u32 %v7845_v43, %v7482_v6  ;;  %v7871_v39 = vld [vmem:[%s8004_s30 + $0x7c4] sm:$0xf0]  ;;  %v7386_v1 = vld [vmem:[%s8004_s30 + $0x630] sm:$0xf]  ;;  %v7426_v59 = vld [vmem:[%s8004_s30 + $0x680] sm:$0xf] }
 0x29a   : > { %5490 = vmatpush.bf16.msra.mxu1 %v7203_v55  ;;  %v7610_v55 = vld [vmem:[%s8004_s30 + $0x7f0] sm:$0xf]  ;;  %v7587_v6 = vor.u32 %v7871_v39, %v7586_v58  ;;  %v6780_v58 = vld [vmem:[%s8004_s30 + $0x178] sm:$0xf0] }
 0x29b   : > { %5503 = vmatpush.bf16.msra.mxu2 %v7267_v26  ;;  %v7877_v26 = vld [vmem:[%s8004_s30 + $0x7f4] sm:$0xf0]  ;;  %v7514_v43 = vld [vmem:[%s8004_s30 + $0x730] sm:$0xf] }
 0x29c   : > { %5516 = vmatpush.bf16.msra.mxu3 %v7331_v32  ;;  %v7547_v32 = vor.u32 %v7861_v37, %v7546_v20  ;;  %v7611_v28 = vor.u32 %v7877_v26, %v7610_v55  ;;  %v7853_v20 = vld [vmem:[%s8004_s30 + $0x734] sm:$0xf0]  ;;  %v7578_v37 = vld [vmem:[%s8004_s30 + $0x7b0] sm:$0xf] }
 0x29d   : > { %5478 = vmatpush.bf16.msra.mxu0 %v7131_v18  ;;  %v7538_v18 = vld [vmem:[%s8004_s30 + $0x760] sm:$0xf]  ;;  %v7515_v26 = vor.u32 %v7853_v20, %v7514_v43  ;;  %v6644_v43 = vld [vmem:[%s8004_s30 + $0x68] sm:$0xf0]  ;;  %v7650_v20 = vld [vmem:[%s8004_s30 + $0xe4] sm:$0xf] }
 0x29e   : > { %5491 = vmatpush.bf16.msra.mxu1 %v7195_v24  ;;  %v7859_v24 = vld [vmem:[%s8004_s30 + $0x764] sm:$0xf0] }
 0x29f   : > { %5504 = vmatpush.bf16.msra.mxu2 %v7259_v40  ;;  %v4066_v40 = vld [vmem:[#allocation1] sm:$0xff]  ;;  %v7539_v17 = vor.u32 %v7859_v24, %v7538_v18 }
 0x2a0   : > { %5517 = vmatpush.bf16.msra.mxu3 %v7323_v63  ;;  %v4067_v63 = vld [vmem:[#allocation1 + $0x9] sm:$0xff] }
 0x2a1   : > { %5479 = vmatpush.bf16.msra.mxu0 %v7123_v46  ;;  %v7825_v46 = vld [vmem:[%s8004_s30 + $0x654] sm:$0xf0] }
 0x2a2   : > { %5492 = vmatpush.bf16.msra.mxu1 %v7187_v14  ;;  %v7466_v14 = vld [vmem:[%s8004_s30 + $0x6d0] sm:$0xf]  ;;  %v7403_v53 = vor.u32 %v7825_v46, %v7402_v0  ;;  %v7865_v0 = vld [vmem:[%s8004_s30 + $0x794] sm:$0xf0] }
 0x2a3   : > { %5505 = vmatpush.bf16.msra.mxu2 %v7251_v23  ;;  %v7603_v23 = vor.u32 %v7875_v62, %v7602_v42  ;;  %v7467_v47 = vor.u32 %v7841_v44, %v7466_v14  ;;  %v7370_v42 = vld [vmem:[%s8004_s30 + $0x610] sm:$0xf]  ;;  %v7817_v62 = vld [vmem:[%s8004_s30 + $0x614] sm:$0xf0]  ;;  %v7362_v14 = vld [vmem:[%s8004_s30 + $0x600] sm:$0xf] }
 0x2a4   : > { %5518 = vmatpush.bf16.msra.mxu3 %v7315_v57  ;;  %v7594_v57 = vld [vmem:[%s8004_s30 + $0x7d0] sm:$0xf]  ;;  %v7371_v46 = vor.u32 %v7817_v62, %v7370_v42  ;;  %v6700_v42 = vld [vmem:[%s8004_s30 + $0xd8] sm:$0xf0]  ;;  %v7664_v62 = vld [vmem:[%s8004_s30 + $0x154] sm:$0xf] }
 0x2a5   : > { %5480 = vmatpush.bf16.msra.mxu0 %v7115_v36  ;;  %v7823_v36 = vld [vmem:[%s8004_s30 + $0x644] sm:$0xf0]  ;;  %v7595_v5 = vor.u32 %v7873_v27, %v7594_v57  ;;  %v7490_v27 = vld [vmem:[%s8004_s30 + $0x700] sm:$0xf] }
 0x2a6   : > { %5493 = vmatpush.bf16.msra.mxu1 %v7179_v60  ;;  %v7839_v60 = vld [vmem:[%s8004_s30 + $0x6c4] sm:$0xf0] }
 0x2a7   : > { %5506 = vmatpush.bf16.msra.mxu2 %v7243_v8  ;;  %v7522_v8 = vld [vmem:[%s8004_s30 + $0x740] sm:$0xf]  ;;  %v7459_v25 = vor.u32 %v7839_v60, %v7458_v4  ;;  %v7831_v57 = vld [vmem:[%s8004_s30 + $0x684] sm:$0xf0]  ;;  %v6652_v4 = vld [vmem:[%s8004_s30 + $0x78] sm:$0xf0] }
 0x2a8   : > { %5519 = vmatpush.bf16.msra.mxu3 %v7307_v49  ;;  %v7395_v49 = vor.u32 %v7823_v36, %v7394_v51  ;;  %v7523_v52 = vor.u32 %v7855_v11, %v7522_v8  ;;  %v7863_v51 = vld [vmem:[%s8004_s30 + $0x784] sm:$0xf0]  ;;  %v7636_v36 = vld [vmem:[%s8004_s30 + $0x74] sm:$0xf]  ;;  %v6716_v8 = vld [vmem:[%s8004_s30 + $0xf8] sm:$0xf0]  ;;  %v7427_v39 = vor.u32 %v7831_v57, %v7426_v59 }
 0x2a9   : > { %5481 = vmatpush.bf16.msra.mxu0 %v7107_v50  ;;  %v7837_v50 = vld [vmem:[%s8004_s30 + $0x6b4] sm:$0xf0]  ;;  %v7668_v11 = vld [vmem:[%s8004_s30 + $0x174] sm:$0xf]  ;;  %v6756_v59 = vld [vmem:[%s8004_s30 + $0x148] sm:$0xf0] }
 0x2aa   : > { %5494 = vmatpush.bf16.msra.mxu1 %v7171_v9  ;;  %v7869_v9 = vld [vmem:[%s8004_s30 + $0x7b4] sm:$0xf0]  ;;  %v7451_v55 = vor.u32 %v7837_v50, %v7450_v13  ;;  %v7634_v50 = vld [vmem:[%s8004_s30 + $0x64] sm:$0xf] }
 0x2ab   : > { %5507 = vmatpush.bf16.msra.mxu2 %v7235_v48  ;;  %v7387_v48 = vor.u32 %v7821_v45, %v7386_v1  ;;  %v6655_v45 = vor.u32 %v7636_v36, %v6652_v4  ;;  %v7678_v57 = vld [vmem:[%s8004_s30 + $0x1c4] sm:$0xf]  ;;  %v6620_v36 = vld [vmem:[%s8004_s30 + $0x38] sm:$0xf0]  ;;  %v7644_v4 = vld [vmem:[%s8004_s30 + $0xb4] sm:$0xf] }
 0x2ac   : > { %5520 = vmatpush.bf16.msra.mxu3 %v7299_v15  ;;  %5482 = vmatmul.bf16.vlgmr.msra.gmra.mxu0 %v4066_v40  ;;  %v7378_v15 = vld [vmem:[%s8004_s30 + $0x620] sm:$0xf]  ;;  %v7507_v40 = vor.u32 %v7851_v61, %v7506_v34  ;;  %v6647_v34 = vor.u32 %v7634_v50, %v6644_v43  ;;  %v6676_v50 = vld [vmem:[%s8004_s30 + $0xa8] sm:$0xf0]  ;;  %v7658_v43 = vld [vmem:[%s8004_s30 + $0x124] sm:$0xf] }
 0x2ad   : > { %5526 = vmatpush.bf16.msrb.mxu0 %v7419_v33  ;;  %5495 = vmatmul.bf16.vlgmr.msra.gmra.mxu1 %v4067_v63  ;;  %v7819_v33 = vld [vmem:[%s8004_s30 + $0x624] sm:$0xf0] }
 0x2ae   : > { %5539 = vmatpush.bf16.msrb.mxu1 %v7483_v35  ;;  %5508 = vmatmul.bf16.vlgmr.msra.gmra.mxu2 %v4068_v21  ;;  %v7442_v35 = vld [vmem:[%s8004_s30 + $0x6a0] sm:$0xf]  ;;  %v7379_v18 = vor.u32 %v7819_v33, %v7378_v15  ;;  %v7434_v21 = vld [vmem:[%s8004_s30 + $0x690] sm:$0xf]  ;;  %v7682_v15 = vld [vmem:[%s8004_s30 + $0x1e4] sm:$0xf] }
 0x2af   : > { %5552 = vmatpush.bf16.msrb.mxu2 %v7547_v32  ;;  %5521 = vmatmul.bf16.vlgmr.msra.gmra.mxu3 %v4069_v7  ;;  %v7579_v32 = vor.u32 %v7869_v9, %v7578_v37  ;;  %v7443_v24 = vor.u32 %v7835_v22, %v7442_v35  ;;  %v7833_v7 = vld [vmem:[%s8004_s30 + $0x694] sm:$0xf0]  ;;  %v6708_v9 = vld [vmem:[%s8004_s30 + $0xe8] sm:$0xf0]  ;;  %v4073_v22 = vld [vmem:[#allocation1 + $0x3f] sm:$0xff] }
 0x2b0   : > { %5565 = vmatpush.bf16.msrb.mxu3 %v7611_v28  ;;  %v7570_v28 = vld [vmem:[%s8004_s30 + $0x7a0] sm:$0xf]  ;;  %v7435_v44 = vor.u32 %v7833_v7, %v7434_v21  ;;  %v6836_v33 = vld [vmem:[%s8004_s30 + $0x1e8] sm:$0xf0]  ;;  %v4072_v35 = vld [vmem:[#allocation1 + $0x36] sm:$0xff]  ;;  %v6711_v61 = vor.u32 %v7650_v20, %v6708_v9 }
 0x2b1   : > { %5527 = vmatpush.bf16.msrb.mxu0 %v7411_v56  ;;  %v7571_v63 = vor.u32 %v7867_v41, %v7570_v28  ;;  %v7498_v56 = vld [vmem:[%s8004_s30 + $0x710] sm:$0xf]  ;;  %v7632_v41 = vld [vmem:[%s8004_s30 + $0x54] sm:$0xf]  ;;  %v6764_v21 = vld [vmem:[%s8004_s30 + $0x158] sm:$0xf0] }
 0x2b2   : > { %5540 = vmatpush.bf16.msrb.mxu1 %v7475_v2  ;;  %v7849_v2 = vld [vmem:[%s8004_s30 + $0x714] sm:$0xf0]  ;;  %v6828_v7 = vld [vmem:[%s8004_s30 + $0x1d8] sm:$0xf0]  ;;  %v6740_v20 = vld [vmem:[%s8004_s30 + $0x128] sm:$0xf0] }
 0x2b3   : > { %5553 = vmatpush.bf16.msrb.mxu2 %v7539_v17  ;;  %v7562_v17 = vld [vmem:[%s8004_s30 + $0x790] sm:$0xf]  ;;  %v7499_v16 = vor.u32 %v7849_v2, %v7498_v56  ;;  %v6804_v9 = vld [vmem:[%s8004_s30 + $0x1a8] sm:$0xf0] }
 0x2b4   : > { %5566 = vmatpush.bf16.msrb.mxu3 %v7603_v23  ;;  %v7815_v23 = vld [vmem:[%s8004_s30 + $0x604] sm:$0xf0] }
 0x2b5   : > { %5528 = vmatpush.bf16.msrb.mxu0 %v7403_v53  ;;  %v7563_v53 = vor.u32 %v7865_v0, %v7562_v17  ;;  %v7363_v60 = vor.u32 %v7815_v23, %v7362_v14  ;;  %v6767_v17 = vor.u32 %v7664_v62, %v6764_v21  ;;  %v7630_v0 = vld [vmem:[%s8004_s30 + $0x44] sm:$0xf] }
 0x2b6   : > { %5541 = vmatpush.bf16.msrb.mxu1 %v7467_v47  ;;  %v7847_v47 = vld [vmem:[%s8004_s30 + $0x704] sm:$0xf0]  ;;  %v7646_v14 = vld [vmem:[%s8004_s30 + $0xc4] sm:$0xf] }
 0x2b7   : > { %5554 = vmatpush.bf16.msrb.mxu2 %v7531_v12  ;;  %v7554_v12 = vld [vmem:[%s8004_s30 + $0x780] sm:$0xf]  ;;  %v7638_v21 = vld [vmem:[%s8004_s30 + $0x84] sm:$0xf] }
 0x2b8   : > { %5567 = vmatpush.bf16.msrb.mxu3 %v7595_v5  ;;  %v7652_v5 = vld [vmem:[%s8004_s30 + $0xf4] sm:$0xf]  ;;  %v7555_v1 = vor.u32 %v7863_v51, %v7554_v12 }
 0x2b9   : > { %5529 = vmatpush.bf16.msrb.mxu0 %v7395_v49  ;;  %v7491_v49 = vor.u32 %v7847_v47, %v7490_v27  ;;  %v6719_v13 = vor.u32 %v7652_v5, %v6716_v8  ;;  %v6820_v27 = vld [vmem:[%s8004_s30 + $0x1c8] sm:$0xf0]  ;;  %v7628_v51 = vld [vmem:[%s8004_s30 + $0x34] sm:$0xf] }
 0x2ba   : > { %5542 = vmatpush.bf16.msrb.mxu1 %v7459_v25  ;;  %v7684_v25 = vld [vmem:[%s8004_s30 + $0x1f4] sm:$0xf]  ;;  %v6823_v5 = vor.u32 %v7678_v57, %v6820_v27  ;;  %v7036_v57 = vld [vmem:[%s8004_s30 + $0x378] sm:$0xf0] }
 0x2bb   : > { %5555 = vmatpush.bf16.msrb.mxu2 %v7523_v52  ;;  %v6844_v52 = vld [vmem:[%s8004_s30 + $0x1f8] sm:$0xf0]  ;;  %v7660_v8 = vld [vmem:[%s8004_s30 + $0x134] sm:$0xf] }
 0x2bc   : > { %5568 = vmatpush.bf16.msrb.mxu3 %v7587_v6  ;;  %v6783_v6 = vor.u32 %v7668_v11, %v6780_v58  ;;  %v6847_v37 = vor.u32 %v7684_v25, %v6844_v52  ;;  %v6748_v11 = vld [vmem:[%s8004_s30 + $0x138] sm:$0xf0]  ;;  %v7676_v58 = vld [vmem:[%s8004_s30 + $0x1b4] sm:$0xf] }
 0x2bd   : > { %5530 = vmatpush.bf16.msrb.mxu0 %v7387_v48  ;;  %v7666_v48 = vld [vmem:[%s8004_s30 + $0x164] sm:$0xf]  ;;  %v6751_v52 = vor.u32 %v7660_v8, %v6748_v11  ;;  %v6900_v8 = vld [vmem:[%s8004_s30 + $0x268] sm:$0xf0] }
 0x2be   : > { %5543 = vmatpush.bf16.msrb.mxu1 %v7451_v55  ;;  %v6772_v55 = vld [vmem:[%s8004_s30 + $0x168] sm:$0xf0]  ;;  %v7714_v11 = vld [vmem:[%s8004_s30 + $0x2e4] sm:$0xf] }
 0x2bf   : > { %5556 = vmatpush.bf16.msrb.mxu2 %v7515_v26  ;;  %v4070_v26 = vld [vmem:[#allocation1 + $0x24] sm:$0xff]  ;;  %v6775_v28 = vor.u32 %v7666_v48, %v6772_v55 }
 0x2c0   : > { %5569 = vmatpush.bf16.msrb.mxu3 %v7579_v32  ;;  %v4071_v32 = vld [vmem:[#allocation1 + $0x2d] sm:$0xff] }
 0x2c1   : > { %5531 = vmatpush.bf16.msrb.mxu0 %v7379_v18  ;;  %v6636_v18 = vld [vmem:[%s8004_s30 + $0x58] sm:$0xf0] }
 0x2c2   : > { %5544 = vmatpush.bf16.msrb.mxu1 %v7443_v24  ;;  %v7648_v24 = vld [vmem:[%s8004_s30 + $0xd4] sm:$0xf]  ;;  %v6639_v56 = vor.u32 %v7632_v41, %v6636_v18  ;;  %v6796_v41 = vld [vmem:[%s8004_s30 + $0x198] sm:$0xf0] }
 0x2c3   : > { %5557 = vmatpush.bf16.msrb.mxu2 %v7507_v40  ;;  %v6839_v40 = vor.u32 %v7682_v15, %v6836_v33  ;;  %v6703_v2 = vor.u32 %v7648_v24, %v6700_v42  ;;  %v7624_v15 = vld [vmem:[%s8004_s30 + $0x14] sm:$0xf]  ;;  %v6604_v33 = vld [vmem:[%s8004_s30 + $0x18] sm:$0xf0]  ;;  %v7622_v24 = vld [vmem:[%s8004_s30 + $0x4] sm:$0xf] }
 0x2c4   : > { %5570 = vmatpush.bf16.msrb.mxu3 %v7571_v63  ;;  %v7680_v63 = vld [vmem:[%s8004_s30 + $0x1d4] sm:$0xf]  ;;  %v6607_v18 = vor.u32 %v7624_v15, %v6604_v33  ;;  %v7084_v15 = vld [vmem:[%s8004_s30 + $0x3d8] sm:$0xf0] }
 0x2c5   : > { %5532 = vmatpush.bf16.msrb.mxu0 %v7371_v46  ;;  %v6628_v46 = vld [vmem:[%s8004_s30 + $0x48] sm:$0xf0]  ;;  %v6831_v23 = vor.u32 %v7680_v63, %v6828_v7  ;;  %v7654_v7 = vld [vmem:[%s8004_s30 + $0x104] sm:$0xf] }
 0x2c6   : > { %5545 = vmatpush.bf16.msrb.mxu1 %v7435_v44  ;;  %v6692_v44 = vld [vmem:[%s8004_s30 + $0xc8] sm:$0xf0] }
 0x2c7   : > { %5558 = vmatpush.bf16.msrb.mxu2 %v7499_v16  ;;  %v7662_v16 = vld [vmem:[%s8004_s30 + $0x144] sm:$0xf]  ;;  %v6695_v47 = vor.u32 %v7646_v14, %v6692_v44  ;;  %v6660_v63 = vld [vmem:[%s8004_s30 + $0x88] sm:$0xf0]  ;;  %v6908_v14 = vld [vmem:[%s8004_s30 + $0x278] sm:$0xf0] }
 0x2c8   : > { %5571 = vmatpush.bf16.msrb.mxu3 %v7563_v53  ;;  %v6631_v53 = vor.u32 %v7630_v0, %v6628_v46  ;;  %v6759_v12 = vor.u32 %v7662_v16, %v6756_v59  ;;  %v6788_v0 = vld [vmem:[%s8004_s30 + $0x188] sm:$0xf0]  ;;  %v7700_v46 = vld [vmem:[%s8004_s30 + $0x274] sm:$0xf]  ;;  %v6972_v16 = vld [vmem:[%s8004_s30 + $0x2f8] sm:$0xf0]  ;;  %v6663_v27 = vor.u32 %v7638_v21, %v6660_v63 }
 0x2c9   : > { %5533 = vmatpush.bf16.msrb.mxu0 %v7363_v60  ;;  %v6684_v60 = vld [vmem:[%s8004_s30 + $0xb8] sm:$0xf0]  ;;  %v7732_v59 = vld [vmem:[%s8004_s30 + $0x374] sm:$0xf] }
 0x2ca   : > { %5546 = vmatpush.bf16.msrb.mxu1 %v7427_v39  ;;  %v6812_v39 = vld [vmem:[%s8004_s30 + $0x1b8] sm:$0xf0]  ;;  %v6687_v25 = vor.u32 %v7644_v4, %v6684_v60  ;;  %v7698_v60 = vld [vmem:[%s8004_s30 + $0x264] sm:$0xf]  ;;  %v7708_v21 = vld [vmem:[%s8004_s30 + $0x2b4] sm:$0xf] }
 0x2cb   : > { %5559 = vmatpush.bf16.msrb.mxu2 %v7491_v49  ;;  %v6623_v49 = vor.u32 %v7628_v51, %v6620_v36  ;;  %v6911_v36 = vor.u32 %v7700_v46, %v6908_v14 }
 0x2cc   : > { %5572 = vmatpush.bf16.msrb.mxu3 %v7555_v1  ;;  %5534 = vmatmul.bf16.vlgmr.msrb.gmra.mxu0 %v4070_v26  ;;  %v7626_v1 = vld [vmem:[%s8004_s30 + $0x24] sm:$0xf]  ;;  %v6743_v26 = vor.u32 %v7658_v43, %v6740_v20  ;;  %v6892_v43 = vld [vmem:[%s8004_s30 + $0x258] sm:$0xf0]  ;;  %v7712_v20 = vld [vmem:[%s8004_s30 + $0x2d4] sm:$0xf] }
 0x2cd   : > { %5578 = vmatpush.bf16.msra.mxu0 %v6655_v45  ;;  %5547 = vmatmul.bf16.vlgmr.msrb.gmra.mxu1 %v4071_v32  ;;  %v6612_v45 = vld [vmem:[%s8004_s30 + $0x28] sm:$0xf0] }
 0x2ce   : > { %5591 = vmatpush.bf16.msra.mxu1 %v6719_v13  ;;  %5560 = vmatmul.bf16.vlgmr.msrb.gmra.mxu2 %v4072_v35  ;;  %v7642_v13 = vld [vmem:[%s8004_s30 + $0xa4] sm:$0xf]  ;;  %v6615_v48 = vor.u32 %v7626_v1, %v6612_v45  ;;  %v7640_v35 = vld [vmem:[%s8004_s30 + $0x94] sm:$0xf]  ;;  %v7092_v1 = vld [vmem:[%s8004_s30 + $0x3e8] sm:$0xf0]  ;;  %v6903_v45 = vor.u32 %v7698_v60, %v6900_v8 }
 0x2cf   : > { %5604 = vmatpush.bf16.msra.mxu2 %v6783_v6  ;;  %5573 = vmatmul.bf16.vlgmr.msrb.gmra.mxu3 %v4073_v22  ;;  %v6815_v6 = vor.u32 %v7676_v58, %v6812_v39  ;;  %v6679_v55 = vor.u32 %v7642_v13, %v6676_v50  ;;  %v6668_v22 = vld [vmem:[%s8004_s30 + $0x98] sm:$0xf0]  ;;  %v6964_v39 = vld [vmem:[%s8004_s30 + $0x2e8] sm:$0xf0]  ;;  %v7696_v50 = vld [vmem:[%s8004_s30 + $0x254] sm:$0xf] }
 0x2d0   : > { %5617 = vmatpush.bf16.msra.mxu3 %v6847_v37  ;;  %v7674_v37 = vld [vmem:[%s8004_s30 + $0x1a4] sm:$0xf]  ;;  %v6671_v42 = vor.u32 %v7640_v35, %v6668_v22  ;;  %v6967_v13 = vor.u32 %v7714_v11, %v6964_v39  ;;  %v6895_v33 = vor.u32 %v7696_v50, %v6892_v43  ;;  %v6884_v22 = vld [vmem:[%s8004_s30 + $0x248] sm:$0xf0]  ;;  %v7688_v60 = vld [vmem:[%s8004_s30 + $0x214] sm:$0xf] }
 0x2d1   : > { %5579 = vmatpush.bf16.msra.mxu0 %v6647_v34  ;;  %v6807_v32 = vor.u32 %v7674_v37, %v6804_v9  ;;  %v7656_v34 = vld [vmem:[%s8004_s30 + $0x114] sm:$0xf]  ;;  %v6956_v9 = vld [vmem:[%s8004_s30 + $0x2d8] sm:$0xf0] }
 0x2d2   : > { %5592 = vmatpush.bf16.msra.mxu1 %v6711_v61  ;;  %v6732_v61 = vld [vmem:[%s8004_s30 + $0x118] sm:$0xf0]  ;;  %v6959_v35 = vor.u32 %v7712_v20, %v6956_v9  ;;  %v7704_v11 = vld [vmem:[%s8004_s30 + $0x294] sm:$0xf]  ;;  %v6916_v9 = vld [vmem:[%s8004_s30 + $0x288] sm:$0xf0] }
 0x2d3   : > { %5605 = vmatpush.bf16.msra.mxu2 %v6775_v28  ;;  %v7672_v28 = vld [vmem:[%s8004_s30 + $0x194] sm:$0xf]  ;;  %v6735_v62 = vor.u32 %v7656_v34, %v6732_v61  ;;  %v7710_v34 = vld [vmem:[%s8004_s30 + $0x2c4] sm:$0xf]  ;;  %v6948_v61 = vld [vmem:[%s8004_s30 + $0x2c8] sm:$0xf0] }
 0x2d4   : > { %5618 = vmatpush.bf16.msra.mxu3 %v6839_v40  ;;  %v6596_v40 = vld [vmem:[%s8004_s30 + $0x8] sm:$0xf0]  ;;  %v6860_v8 = vld [vmem:[%s8004_s30 + $0x218] sm:$0xf0] }
 0x2d5   : > { %5580 = vmatpush.bf16.msra.mxu0 %v6639_v56  ;;  %v6799_v56 = vor.u32 %v7672_v28, %v6796_v41  ;;  %v6599_v44 = vor.u32 %v7622_v24, %v6596_v40  ;;  %v7012_v28 = vld [vmem:[%s8004_s30 + $0x348] sm:$0xf0]  ;;  %v7742_v41 = vld [vmem:[%s8004_s30 + $0x3c4] sm:$0xf]  ;;  %v6951_v24 = vor.u32 %v7710_v34, %v6948_v61  ;;  %v6924_v39 = vld [vmem:[%s8004_s30 + $0x298] sm:$0xf0] }
 0x2d6   : > { %5593 = vmatpush.bf16.msra.mxu1 %v6703_v2  ;;  %v6724_v2 = vld [vmem:[%s8004_s30 + $0x108] sm:$0xf0]  ;;  %v6927_v43 = vor.u32 %v7704_v11, %v6924_v39  ;;  %v7780_v34 = vld [vmem:[%s8004_s30 + $0x4f4] sm:$0xf]  ;;  %v7228_v61 = vld [vmem:[%s8004_s30 + $0x4f8] sm:$0xf0] }
 0x2d7   : > { %5606 = vmatpush.bf16.msra.mxu2 %v6767_v17  ;;  %v7670_v17 = vld [vmem:[%s8004_s30 + $0x184] sm:$0xf]  ;;  %v7792_v11 = vld [vmem:[%s8004_s30 + $0x554] sm:$0xf] }
 0x2d8   : > { %5619 = vmatpush.bf16.msra.mxu3 %v6831_v23  ;;  %v7716_v23 = vld [vmem:[%s8004_s30 + $0x2f4] sm:$0xf]  ;;  %v6791_v51 = vor.u32 %v7670_v17, %v6788_v0  ;;  %v7068_v0 = vld [vmem:[%s8004_s30 + $0x3b8] sm:$0xf0] }
 0x2d9   : > { %5581 = vmatpush.bf16.msra.mxu0 %v6631_v53  ;;  %v6727_v53 = vor.u32 %v7654_v7, %v6724_v2  ;;  %v6975_v4 = vor.u32 %v7716_v23, %v6972_v16  ;;  %v6940_v7 = vld [vmem:[%s8004_s30 + $0x2b8] sm:$0xf0]  ;;  %v7740_v17 = vld [vmem:[%s8004_s30 + $0x3b4] sm:$0xf]  ;;  %v6868_v16 = vld [vmem:[%s8004_s30 + $0x228] sm:$0xf0] }
 0x2da   : > { %5594 = vmatpush.bf16.msra.mxu1 %v6695_v47  ;;  %v7748_v47 = vld [vmem:[%s8004_s30 + $0x3f4] sm:$0xf]  ;;  %v7004_v2 = vld [vmem:[%s8004_s30 + $0x338] sm:$0xf0]  ;;  %v6943_v14 = vor.u32 %v7708_v21, %v6940_v7  ;;  %v7231_v7 = vor.u32 %v7780_v34, %v7228_v61 }
 0x2db   : > { %5607 = vmatpush.bf16.msra.mxu2 %v6759_v12  ;;  %v7100_v12 = vld [vmem:[%s8004_s30 + $0x3f8] sm:$0xf0]  ;;  %v7808_v39 = vld [vmem:[%s8004_s30 + $0x5d4] sm:$0xf] }
 0x2dc   : > { %5620 = vmatpush.bf16.msra.mxu3 %v6823_v5  ;;  %v7039_v5 = vor.u32 %v7732_v59, %v7036_v57  ;;  %v7103_v58 = vor.u32 %v7748_v47, %v7100_v12  ;;  %v7706_v59 = vld [vmem:[%s8004_s30 + $0x2a4] sm:$0xf]  ;;  %v7071_v57 = vor.u32 %v7740_v17, %v7068_v0  ;;  %v6996_v47 = vld [vmem:[%s8004_s30 + $0x328] sm:$0xf0]  ;;  %v7196_v34 = vld [vmem:[%s8004_s30 + $0x4b8] sm:$0xf0] }
 0x2dd   : > { %5582 = vmatpush.bf16.msra.mxu0 %v6623_v49  ;;  %v7730_v49 = vld [vmem:[%s8004_s30 + $0x364] sm:$0xf]  ;;  %v7156_v17 = vld [vmem:[%s8004_s30 + $0x468] sm:$0xf0]  ;;  %v7260_v61 = vld [vmem:[%s8004_s30 + $0x538] sm:$0xf0] }
 0x2de   : > { %5595 = vmatpush.bf16.msra.mxu1 %v6687_v25  ;;  %v7028_v25 = vld [vmem:[%s8004_s30 + $0x368] sm:$0xf0]  ;;  %v7738_v12 = vld [vmem:[%s8004_s30 + $0x3a4] sm:$0xf] }
 0x2df   : > { %5608 = vmatpush.bf16.msra.mxu2 %v6751_v52  ;;  %v7746_v52 = vld [vmem:[%s8004_s30 + $0x3e4] sm:$0xf] }
 0x2e0   : > { %5621 = vmatpush.bf16.msra.mxu3 %v6815_v6  ;;  %v7031_v6 = vor.u32 %v7730_v49, %v7028_v25  ;;  %v7095_v37 = vor.u32 %v7746_v52, %v7092_v1  ;;  %v7720_v49 = vld [vmem:[%s8004_s30 + $0x314] sm:$0xf]  ;;  %v6988_v25 = vld [vmem:[%s8004_s30 + $0x318] sm:$0xf0]  ;;  %v7778_v0 = vld [vmem:[%s8004_s30 + $0x4e4] sm:$0xf] }
 0x2e1   : > { %5583 = vmatpush.bf16.msra.mxu0 %v6615_v48  ;;  %v7728_v48 = vld [vmem:[%s8004_s30 + $0x354] sm:$0xf]  ;;  %v7052_v1 = vld [vmem:[%s8004_s30 + $0x398] sm:$0xf0]  ;;  %v6991_v20 = vor.u32 %v7720_v49, %v6988_v25 }
 0x2e2   : > { %5596 = vmatpush.bf16.msra.mxu1 %v6679_v55  ;;  %v7020_v55 = vld [vmem:[%s8004_s30 + $0x358] sm:$0xf0]  ;;  %v7736_v52 = vld [vmem:[%s8004_s30 + $0x394] sm:$0xf] }
 0x2e3   : > { %5609 = vmatpush.bf16.msra.mxu2 %v6743_v26  ;;  %v7744_v26 = vld [vmem:[%s8004_s30 + $0x3d4] sm:$0xf]  ;;  %v7340_v49 = vld [vmem:[%s8004_s30 + $0x5d8] sm:$0xf0] }
 0x2e4   : > { %5622 = vmatpush.bf16.msra.mxu3 %v6807_v32  ;;  %v7023_v32 = vor.u32 %v7728_v48, %v7020_v55  ;;  %v7718_v48 = vld [vmem:[%s8004_s30 + $0x304] sm:$0xf] }
 0x2e5   : > { %5584 = vmatpush.bf16.msra.mxu0 %v6607_v18 }
 0x2e6   : > { %5597 = vmatpush.bf16.msra.mxu1 %v6671_v42  ;;  %v7692_v42 = vld [vmem:[%s8004_s30 + $0x234] sm:$0xf] }
 0x2e7   : > { %5610 = vmatpush.bf16.msra.mxu2 %v6735_v62  ;;  %v6876_v62 = vld [vmem:[%s8004_s30 + $0x238] sm:$0xf0] }
 0x2e8   : > { %5623 = vmatpush.bf16.msra.mxu3 %v6799_v56  ;;  %v7724_v56 = vld [vmem:[%s8004_s30 + $0x334] sm:$0xf]  ;;  %v6879_v46 = vor.u32 %v7692_v42, %v6876_v62 }
 0x2e9   : > { %5585 = vmatpush.bf16.msra.mxu0 %v6599_v44  ;;  %v7007_v23 = vor.u32 %v7724_v56, %v7004_v2  ;;  %v7690_v44 = vld [vmem:[%s8004_s30 + $0x224] sm:$0xf] }
 0x2ea   : > { %5598 = vmatpush.bf16.msra.mxu1 %v6663_v27  ;;  %v6932_v27 = vld [vmem:[%s8004_s30 + $0x2a8] sm:$0xf0]  ;;  %v7762_v2 = vld [vmem:[%s8004_s30 + $0x464] sm:$0xf] }
 0x2eb   : > { %5611 = vmatpush.bf16.msra.mxu2 %v6727_v53  ;;  %v7722_v53 = vld [vmem:[%s8004_s30 + $0x324] sm:$0xf] }
 0x2ec   : > { %5624 = vmatpush.bf16.msra.mxu3 %v6791_v51  ;;  %5586 = vmatmul.bf16.vlgmr.msra.gmra.mxu0 %v8972_v19  ;;  %v7087_v19 = vor.u32 %v7744_v26, %v7084_v15  ;;  %v7060_v51 = vld [vmem:[%s8004_s30 + $0x3a8] sm:$0xf0]  ;;  %v7055_v26 = vor.u32 %v7736_v52, %v7052_v1 }
 0x2ed   : > { %5630 = vmatpush.bf16.msrb.mxu0 %v6911_v36  ;;  %5599 = vmatmul.bf16.vlgmr.msra.gmra.mxu1 %v8978_v3  ;;  %v7076_v3 = vld [vmem:[%s8004_s30 + $0x3c8] sm:$0xf0]  ;;  %v6871_v36 = vor.u32 %v7690_v44, %v6868_v16 }
 0x2ee   : > { %5643 = vmatpush.bf16.msrb.mxu1 %v6975_v4  ;;  %5612 = vmatmul.bf16.vlgmr.msra.gmra.mxu2 %v8970_v31  ;;  %v7694_v31 = vld [vmem:[%s8004_s30 + $0x244] sm:$0xf]  ;;  %v7079_v63 = vor.u32 %v7742_v41, %v7076_v3  ;;  %v6935_v4 = vor.u32 %v7706_v59, %v6932_v27  ;;  %v6980_v15 = vld [vmem:[%s8004_s30 + $0x308] sm:$0xf0] }
 0x2ef   : > { %5656 = vmatpush.bf16.msrb.mxu2 %v7039_v5  ;;  %5625 = vmatmul.bf16.vlgmr.msra.gmra.mxu3 %v8974_v54  ;;  %v7726_v54 = vld [vmem:[%s8004_s30 + $0x344] sm:$0xf]  ;;  %v6887_v18 = vor.u32 %v7694_v31, %v6884_v22  ;;  %v6999_v5 = vor.u32 %v7722_v53, %v6996_v47  ;;  %v7764_v31 = vld [vmem:[%s8004_s30 + $0x474] sm:$0xf]  ;;  %v7164_v22 = vld [vmem:[%s8004_s30 + $0x478] sm:$0xf0]  ;;  %v6983_v3 = vor.u32 %v7718_v48, %v6980_v15 }
 0x2f0   : > { %5669 = vmatpush.bf16.msrb.mxu3 %v7103_v58  ;;  %v7015_v40 = vor.u32 %v7726_v54, %v7012_v28  ;;  %v7063_v58 = vor.u32 %v7738_v12, %v7060_v51  ;;  %v5379_v50 = vpop.f32.mrf.mxu0  ;;  %v7796_v54 = vld [vmem:[%s8004_s30 + $0x574] sm:$0xf]  ;;  %v7292_v28 = vld [vmem:[%s8004_s30 + $0x578] sm:$0xf0]  ;;  %v7167_v62 = vor.u32 %v7764_v31, %v7164_v22  ;;  %v7284_v44 = vld [vmem:[%s8004_s30 + $0x568] sm:$0xf0]  ;;  %v7159_v47 = vor.u32 %v7762_v2, %v7156_v17 }
 0x2f1   : > { %5631 = vmatpush.bf16.msrb.mxu0 %v6903_v45  ;;  %v6863_v45 = vor.u32 %v7688_v60, %v6860_v8  ;;  %v5392_v55 = vpop.f32.mrf.mxu1  ;;  %v7295_v56 = vor.u32 %v7796_v54, %v7292_v28  ;;  %v7348_v27 = vld [vmem:[%s8004_s30 + $0x5e8] sm:$0xf0]  ;;  %v7212_v8 = vld [vmem:[%s8004_s30 + $0x4d8] sm:$0xf0]  ;;  %v7756_v15 = vld [vmem:[%s8004_s30 + $0x434] sm:$0xf] }
 0x2f2   : > { %5644 = vmatpush.bf16.msrb.mxu1 %v6967_v13  ;;  %v7686_v13 = vld [vmem:[%s8004_s30 + $0x204] sm:$0xf]  ;;  %v7804_v54 = vld [vmem:[%s8004_s30 + $0x5b4] sm:$0xf]  ;;  %v7324_v28 = vld [vmem:[%s8004_s30 + $0x5b8] sm:$0xf0] }
 0x2f3   : > { %5657 = vmatpush.bf16.msrb.mxu2 %v7031_v6  ;;  %v6852_v6 = vld [vmem:[%s8004_s30 + $0x208] sm:$0xf0] }
 0x2f4   : > { %5670 = vmatpush.bf16.msrb.mxu3 %v7095_v37  ;;  %v7702_v37 = vld [vmem:[%s8004_s30 + $0x284] sm:$0xf]  ;;  %v7252_v2 = vld [vmem:[%s8004_s30 + $0x528] sm:$0xf0] }
 0x2f5   : > { %5632 = vmatpush.bf16.msrb.mxu0 %v6895_v33  ;;  %v7734_v33 = vld [vmem:[%s8004_s30 + $0x384] sm:$0xf]  ;;  %v6919_v41 = vor.u32 %v7702_v37, %v6916_v9  ;;  %v7332_v9 = vld [vmem:[%s8004_s30 + $0x5c8] sm:$0xf0] }
 0x2f6   : > { %5645 = vmatpush.bf16.msrb.mxu1 %v6959_v35  ;;  %v7044_v35 = vld [vmem:[%s8004_s30 + $0x388] sm:$0xf0]  ;;  %v7806_v37 = vld [vmem:[%s8004_s30 + $0x5c4] sm:$0xf] }
 0x2f7   : > { %5658 = vmatpush.bf16.msrb.mxu2 %v7023_v32  ;;  %v5393_v32 = vadd.f32 %v5392_v55, %v5379_v50  ;;  %v7047_v42 = vor.u32 %v7734_v33, %v7044_v35  ;;  %v7204_v50 = vld [vmem:[%s8004_s30 + $0x4c8] sm:$0xf0]  ;;  %v7132_v33 = vld [vmem:[%s8004_s30 + $0x438] sm:$0xf0]  ;;  %v7772_v35 = vld [vmem:[%s8004_s30 + $0x4b4] sm:$0xf]  ;;  %v7335_v22 = vor.u32 %v7806_v37, %v7332_v9 }
 0x2f8   : > { %5671 = vmatpush.bf16.msrb.mxu3 %v7087_v19  ;;  %v6855_v19 = vor.u32 %v7686_v13, %v6852_v6  ;;  %v5381_v59 = vpop.f32.mrf.mxu0  ;;  %v7140_v13 = vld [vmem:[%s8004_s30 + $0x448] sm:$0xf0]  ;;  %v7343_v6 = vor.u32 %v7808_v39, %v7340_v49  ;;  %v7844_v37 = vld [vmem:[%s8004_s30 + $0x6f4] sm:$0xf] }
 0x2f9   : > { %5633 = vmatpush.bf16.msrb.mxu0 %v6887_v18  ;;  %v7812_v18 = vld [vmem:[%s8004_s30 + $0x5f4] sm:$0xf]  ;;  %v5394_v53 = vpop.f32.mrf.mxu1  ;;  %v7108_v39 = vld [vmem:[%s8004_s30 + $0x408] sm:$0xf0] }
 0x2fa   : > { %5646 = vmatpush.bf16.msrb.mxu1 %v6951_v24  ;;  %v7356_v24 = vld [vmem:[%s8004_s30 + $0x5f8] sm:$0xf0] }
 0x2fb   : > { %5659 = vmatpush.bf16.msrb.mxu2 %v7015_v40  ;;  %v5405_v40 = vpop.f32.mrf.mxu2  ;;  %v7116_v53 = vld [vmem:[%s8004_s30 + $0x418] sm:$0xf0] }
 0x2fc   : > { %5672 = vmatpush.bf16.msrb.mxu3 %v7079_v63  ;;  %v5406_v21 = vadd.f32 %v5405_v40, %v5393_v32  ;;  %v5418_v63 = vpop.f32.mrf.mxu3  ;;  %v7754_v40 = vld [vmem:[%s8004_s30 + $0x424] sm:$0xf] }
 0x2fd   : > { %5634 = vmatpush.bf16.msrb.mxu0 %v6879_v46  ;;  %v7359_v46 = vor.u32 %v7812_v18, %v7356_v24  ;;  %v7199_v18 = vor.u32 %v7772_v35, %v7196_v34  ;;  %v7612_v35 = vld [vmem:[%s8004_s30 + $0x7f8] sm:$0xf0] }
 0x2fe   : > { %5647 = vmatpush.bf16.msrb.mxu1 %v6943_v14  ;;  %v7220_v14 = vld [vmem:[%s8004_s30 + $0x4e8] sm:$0xf0]  ;;  %v5419_v16 = vadd.f32 %v5418_v63, %v5406_v21  ;;  %v7327_v63 = vor.u32 %v7804_v54, %v7324_v28  ;;  %v7842_v54 = vld [vmem:[%s8004_s30 + $0x6e4] sm:$0xf] }
 0x2ff   : > { %5660 = vmatpush.bf16.msrb.mxu2 %v7007_v23  ;;  %v7794_v23 = vld [vmem:[%s8004_s30 + $0x564] sm:$0xf]  ;;  %v7223_v12 = vor.u32 %v7778_v0, %v7220_v14  ;;  %v7316_v14 = vld [vmem:[%s8004_s30 + $0x5a8] sm:$0xf0] }
 0x300   : > { %5673 = vmatpush.bf16.msrb.mxu3 %v7071_v57  ;;  %v7810_v57 = vld [vmem:[%s8004_s30 + $0x5e4] sm:$0xf]  ;;  %v7287_v51 = vor.u32 %v7794_v23, %v7284_v44 }
 0x301   : > { %5635 = vmatpush.bf16.msrb.mxu0 %v6871_v36  ;;  %v7760_v36 = vld [vmem:[%s8004_s30 + $0x454] sm:$0xf]  ;;  %v7351_v60 = vor.u32 %v7810_v57, %v7348_v27 }
 0x302   : > { %5648 = vmatpush.bf16.msrb.mxu1 %v6935_v4  ;;  %v7148_v4 = vld [vmem:[%s8004_s30 + $0x458] sm:$0xf0]  ;;  %v7752_v27 = vld [vmem:[%s8004_s30 + $0x414] sm:$0xf] }
 0x303   : > { %5661 = vmatpush.bf16.msrb.mxu2 %v6999_v5  ;;  %v7776_v5 = vld [vmem:[%s8004_s30 + $0x4d4] sm:$0xf]  ;;  %v5407_v25 = vpop.f32.mrf.mxu2  ;;  %v7151_v52 = vor.u32 %v7760_v36, %v7148_v4  ;;  %v7180_v36 = vld [vmem:[%s8004_s30 + $0x498] sm:$0xf0] }
 0x304   : > { %5674 = vmatpush.bf16.msrb.mxu3 %v7063_v58  ;;  %v7276_v58 = vld [vmem:[%s8004_s30 + $0x558] sm:$0xf0]  ;;  %v7215_v1 = vor.u32 %v7776_v5, %v7212_v8  ;;  %v7784_v4 = vld [vmem:[%s8004_s30 + $0x514] sm:$0xf] }
 0x305   : > { %5636 = vmatpush.bf16.msrb.mxu0 %v6863_v45  ;;  %v7279_v45 = vor.u32 %v7792_v11, %v7276_v58  ;;  %v7244_v5 = vld [vmem:[%s8004_s30 + $0x518] sm:$0xf0]  ;;  %v7119_v11 = vor.u32 %v7752_v27, %v7116_v53  ;;  %v7750_v58 = vld [vmem:[%s8004_s30 + $0x404] sm:$0xf] }
 0x306   : > { %5649 = vmatpush.bf16.msrb.mxu1 %v6927_v43  ;;  %v7790_v43 = vld [vmem:[%s8004_s30 + $0x544] sm:$0xf]  ;;  %v7308_v8 = vld [vmem:[%s8004_s30 + $0x598] sm:$0xf0]  ;;  %v7247_v25 = vor.u32 %v7784_v4, %v7244_v5  ;;  %v7111_v9 = vor.u32 %v7750_v58, %v7108_v39 }
 0x307   : > { %5662 = vmatpush.bf16.msrb.mxu2 %v6991_v20  ;;  %v7268_v20 = vld [vmem:[%s8004_s30 + $0x548] sm:$0xf0]  ;;  %v7900_v27 = vld [vmem:[#allocation1 + $0x1b] sm:$0xff]  ;;  %v7838_v4 = vld [vmem:[%s8004_s30 + $0x6c4] sm:$0xf] }
 0x308   : > { %5675 = vmatpush.bf16.msrb.mxu3 %v7055_v26  ;;  %v7271_v26 = vor.u32 %v7790_v43, %v7268_v20  ;;  %v7828_v43 = vld [vmem:[%s8004_s30 + $0x674] sm:$0xf]  ;;  %v7420_v20 = vld [vmem:[%s8004_s30 + $0x678] sm:$0xf0]  ;;  %v7870_v39 = vld [vmem:[%s8004_s30 + $0x7c4] sm:$0xf] }
 0x309   : > { %5637 = vmatpush.bf16.msrb.mxu0 %v6855_v19  ;;  %v5431_v48 = vpop.f32.mrf.mxu0  ;;  %v7788_v19 = vld [vmem:[%s8004_s30 + $0x534] sm:$0xf] }
 0x30a   : > { %5650 = vmatpush.bf16.msrb.mxu1 %v6919_v41  ;;  %v5432_v32 = vadd.f32 %v5431_v48, %v5419_v16  ;;  %v5444_v31 = vpop.f32.mrf.mxu1  ;;  %v7263_v24 = vor.u32 %v7788_v19, %v7260_v61  ;;  %v7860_v48 = vld [vmem:[%s8004_s30 + $0x774] sm:$0xf]  ;;  %v7826_v19 = vld [vmem:[%s8004_s30 + $0x664] sm:$0xf]  ;;  %v7412_v61 = vld [vmem:[%s8004_s30 + $0x668] sm:$0xf0] }
 0x30b   : > { %5663 = vmatpush.bf16.msrb.mxu2 %v6983_v3  ;;  %v7135_v3 = vor.u32 %v7756_v15, %v7132_v33  ;;  %v7876_v33 = vld [vmem:[%s8004_s30 + $0x7f4] sm:$0xf] }
 0x30c   : > { %5676 = vmatpush.bf16.msrb.mxu3 %v7047_v42  ;;  %5638 = vmatmul.bf16.vlgmr.msrb.gmra.mxu0 %v9010_v10  ;;  %v7758_v10 = vld [vmem:[%s8004_s30 + $0x444] sm:$0xf]  ;;  %v5445_v41 = vadd.f32 %v5444_v31, %v5432_v32  ;;  %v7124_v42 = vld [vmem:[%s8004_s30 + $0x428] sm:$0xf0]  ;;  %v7423_v31 = vor.u32 %v7828_v43, %v7420_v20  ;;  %v7615_v28 = vor.u32 %v7876_v33, %v7612_v35  ;;  %v7452_v43 = vld [vmem:[%s8004_s30 + $0x6b8] sm:$0xf0] }
 0x30d   : > { %5682 = vmatpush.bf16.msra.mxu0 %v7167_v62  ;;  %5651 = vmatmul.bf16.vlgmr.msrb.gmra.mxu1 %v9014_v30  ;;  %v7143_v30 = vor.u32 %v7758_v10, %v7140_v13  ;;  %v7770_v62 = vld [vmem:[%s8004_s30 + $0x4a4] sm:$0xf]  ;;  %v7127_v23 = vor.u32 %v7754_v40, %v7124_v42  ;;  %v7236_v13 = vld [vmem:[%s8004_s30 + $0x508] sm:$0xf0]  ;;  %v7415_v42 = vor.u32 %v7826_v19, %v7412_v61  ;;  %v7852_v20 = vld [vmem:[%s8004_s30 + $0x734] sm:$0xf] }
 0x30e   : > { %5695 = vmatpush.bf16.msra.mxu1 %v7231_v7  ;;  %5664 = vmatmul.bf16.vlgmr.msrb.gmra.mxu2 %v9008_v29  ;;  %v5420_v29 = vpop.f32.mrf.mxu3  ;;  %v7188_v7 = vld [vmem:[%s8004_s30 + $0x4a8] sm:$0xf0]  ;;  %v7834_v33 = vld [vmem:[%s8004_s30 + $0x6a4] sm:$0xf] }
 0x30f   : > { %5708 = vmatpush.bf16.msra.mxu2 %v7295_v56  ;;  %5677 = vmatmul.bf16.vlgmr.msrb.gmra.mxu3 %v9012_v38  ;;  %v7774_v38 = vld [vmem:[%s8004_s30 + $0x4c4] sm:$0xf]  ;;  %v7191_v59 = vor.u32 %v7770_v62, %v7188_v7  ;;  %v7172_v29 = vld [vmem:[%s8004_s30 + $0x488] sm:$0xf0]  ;;  %v7404_v7 = vld [vmem:[%s8004_s30 + $0x658] sm:$0xf0] }
 0x310   : > { %5721 = vmatpush.bf16.msra.mxu3 %v7359_v46  ;;  %v7207_v55 = vor.u32 %v7774_v38, %v7204_v50  ;;  %v7786_v56 = vld [vmem:[%s8004_s30 + $0x524] sm:$0xf]  ;;  %v7604_v40 = vld [vmem:[%s8004_s30 + $0x7e8] sm:$0xf0] }
 0x311   : > { %5683 = vmatpush.bf16.msra.mxu0 %v7159_v47  ;;  %v5457_v21 = vpop.f32.mrf.mxu2  ;;  %v7802_v46 = vld [vmem:[%s8004_s30 + $0x5a4] sm:$0xf]  ;;  %v5433_v16 = vpop.f32.mrf.mxu0  ;;  %v7255_v57 = vor.u32 %v7786_v56, %v7252_v2  ;;  %v7768_v47 = vld [vmem:[%s8004_s30 + $0x494] sm:$0xf] }
 0x312   : > { %5696 = vmatpush.bf16.msra.mxu1 %v7223_v12  ;;  %v5458_v17 = vadd.f32 %v5457_v21, %v5445_v41  ;;  %v5446_v12 = vpop.f32.mrf.mxu1  ;;  %v7183_v49 = vor.u32 %v7768_v47, %v7180_v36  ;;  %v7798_v38 = vld [vmem:[%s8004_s30 + $0x584] sm:$0xf]  ;;  %v7476_v41 = vld [vmem:[%s8004_s30 + $0x6e8] sm:$0xf0]  ;;  %v7840_v56 = vld [vmem:[%s8004_s30 + $0x6d4] sm:$0xf] }
 0x313   : > { %5709 = vmatpush.bf16.msra.mxu2 %v7287_v51  ;;  %v7319_v51 = vor.u32 %v7802_v46, %v7316_v14  ;;  %v7479_v62 = vor.u32 %v7842_v54, %v7476_v41  ;;  %v7897_v2 = vld [vmem:[#allocation1] sm:$0xff]  ;;  %v7856_v46 = vld [vmem:[%s8004_s30 + $0x754] sm:$0xf]  ;;  %v7532_v14 = vld [vmem:[%s8004_s30 + $0x758] sm:$0xf0] }
 0x314   : > { %5722 = vmatpush.bf16.msra.mxu3 %v7351_v60  ;;  %v7800_v60 = vld [vmem:[%s8004_s30 + $0x594] sm:$0xf]  ;;  %v7899_v16 = vld [vmem:[#allocation1 + $0x9] sm:$0xff]  ;;  %v7535_v12 = vor.u32 %v7856_v46, %v7532_v14  ;;  %v7866_v54 = vld [vmem:[%s8004_s30 + $0x7a4] sm:$0xf] }
 0x315   : > { %5684 = vmatpush.bf16.msra.mxu0 %v7151_v52  ;;  %v7766_v52 = vld [vmem:[%s8004_s30 + $0x484] sm:$0xf]  ;;  %v7311_v10 = vor.u32 %v7800_v60, %v7308_v8  ;;  %v7396_v36 = vld [vmem:[%s8004_s30 + $0x648] sm:$0xf0]  ;;  %v7564_v46 = vld [vmem:[%s8004_s30 + $0x798] sm:$0xf0] }
 0x316   : > { %5697 = vmatpush.bf16.msra.mxu1 %v7215_v1  ;;  %v5470_v0 = vpop.f32.mrf.mxu3  ;;  %v7782_v1 = vld [vmem:[%s8004_s30 + $0x504] sm:$0xf]  ;;  %v7460_v60 = vld [vmem:[%s8004_s30 + $0x6c8] sm:$0xf0] }
 0x317   : > { %5710 = vmatpush.bf16.msra.mxu2 %v7279_v45  ;;  %v9331_v44 = vadd.f32 %v5470_v0, %v5458_v17  ;;  %v7239_v15 = vor.u32 %v7782_v1, %v7236_v13  ;;  %v7468_v0 = vld [vmem:[%s8004_s30 + $0x6d8] sm:$0xf0]  ;;  %v7854_v8 = vld [vmem:[%s8004_s30 + $0x744] sm:$0xf]  ;;  %v7463_v1 = vor.u32 %v7838_v4, %v7460_v60 }
 0x318   : > { %5723 = vmatpush.bf16.msra.mxu3 %v7343_v6  ;;  %v7300_v6 = vld [vmem:[%s8004_s30 + $0x588] sm:$0xf0]  ;;  %v7471_v47 = vor.u32 %v7840_v56, %v7468_v0  ;;  %v7388_v13 = vld [vmem:[%s8004_s30 + $0x638] sm:$0xf0]  ;;  %v7864_v0 = vld [vmem:[%s8004_s30 + $0x794] sm:$0xf] }
 0x319   : > { %5685 = vmatpush.bf16.msra.mxu0 %v7143_v30  ;;  %v5459_v45 = vpop.f32.mrf.mxu2  ;;  %v7484_v30 = vld [vmem:[%s8004_s30 + $0x6f8] sm:$0xf0]  ;;  %v7303_v32 = vor.u32 %v7798_v38, %v7300_v6  ;;  %v7836_v38 = vld [vmem:[%s8004_s30 + $0x6b4] sm:$0xf]  ;;  %v7862_v4 = vld [vmem:[%s8004_s30 + $0x784] sm:$0xf] }
 0x31a   : > { %5698 = vmatpush.bf16.msra.mxu1 %v7207_v55  ;;  %v7548_v55 = vld [vmem:[%s8004_s30 + $0x778] sm:$0xf0] }
 0x31b   : > { %5711 = vmatpush.bf16.msra.mxu2 %v7271_v26  ;;  %v7175_v26 = vor.u32 %v7766_v52, %v7172_v29  ;;  %v7551_v34 = vor.u32 %v7860_v48, %v7548_v55  ;;  %v7455_v48 = vor.u32 %v7836_v38, %v7452_v43  ;;  %v7436_v56 = vld [vmem:[%s8004_s30 + $0x698] sm:$0xf0] }
 0x31c   : > { %5724 = vmatpush.bf16.msra.mxu3 %v7335_v22  ;;  %v7487_v22 = vor.u32 %v7844_v37, %v7484_v30  ;;  %v7868_v37 = vld [vmem:[%s8004_s30 + $0x7b4] sm:$0xf] }
 0x31d   : > { %5686 = vmatpush.bf16.msra.mxu0 %v7135_v3  ;;  %v7858_v3 = vld [vmem:[%s8004_s30 + $0x764] sm:$0xf] }
 0x31e   : > { %5699 = vmatpush.bf16.msra.mxu1 %v7199_v18  ;;  %v5472_v50 = vpop.f32.mrf.mxu3  ;;  %v7540_v18 = vld [vmem:[%s8004_s30 + $0x768] sm:$0xf0] }
 0x31f   : > { %5712 = vmatpush.bf16.msra.mxu2 %v7263_v24  ;;  %v7874_v24 = vld [vmem:[%s8004_s30 + $0x7e4] sm:$0xf]  ;;  %v7543_v21 = vor.u32 %v7858_v3, %v7540_v18 }
 0x320   : > { %5725 = vmatpush.bf16.msra.mxu3 %v7327_v63  ;;  %v7824_v63 = vld [vmem:[%s8004_s30 + $0x654] sm:$0xf]  ;;  %v7607_v17 = vor.u32 %v7874_v24, %v7604_v40 }
 0x321   : > { %5687 = vmatpush.bf16.msra.mxu0 %v7127_v23  ;;  %v7898_v23 = vld [vmem:[#allocation1 + $0x12] sm:$0xff]  ;;  %v7407_v53 = vor.u32 %v7824_v63, %v7404_v7 }
 0x322   : > { %5700 = vmatpush.bf16.msra.mxu1 %v7191_v59  ;;  %v7872_v59 = vld [vmem:[%s8004_s30 + $0x7d4] sm:$0xf] }
 0x323   : > { %5713 = vmatpush.bf16.msra.mxu2 %v7255_v57  ;;  %v7596_v57 = vld [vmem:[%s8004_s30 + $0x7d8] sm:$0xf0]  ;;  %v7832_v63 = vld [vmem:[%s8004_s30 + $0x694] sm:$0xf] }
 0x324   : > { %5726 = vmatpush.bf16.msra.mxu3 %v7319_v51  ;;  %v7822_v51 = vld [vmem:[%s8004_s30 + $0x644] sm:$0xf]  ;;  %v7599_v5 = vor.u32 %v7872_v59, %v7596_v57  ;;  %v7364_v57 = vld [vmem:[%s8004_s30 + $0x608] sm:$0xf0] }
 0x325   : > { %5688 = vmatpush.bf16.msra.mxu0 %v7119_v11  ;;  %v7524_v11 = vld [vmem:[%s8004_s30 + $0x748] sm:$0xf0]  ;;  %v7399_v52 = vor.u32 %v7822_v51, %v7396_v36  ;;  %v7814_v59 = vld [vmem:[%s8004_s30 + $0x604] sm:$0xf] }
 0x326   : > { %5701 = vmatpush.bf16.msra.mxu1 %v7183_v49  ;;  %v7588_v49 = vld [vmem:[%s8004_s30 + $0x7c8] sm:$0xf0]  ;;  %v7527_v45 = vor.u32 %v7854_v8, %v7524_v11  ;;  %v7367_v8 = vor.u32 %v7814_v59, %v7364_v57 }
 0x327   : > { %5714 = vmatpush.bf16.msra.mxu2 %v7247_v25  ;;  %v7591_v6 = vor.u32 %v7870_v39, %v7588_v49  ;;  %v7492_v51 = vld [vmem:[%s8004_s30 + $0x708] sm:$0xf0]  ;;  %v7901_v49 = vld [vmem:[#allocation1 + $0x24] sm:$0xff] }
 0x328   : > { %5727 = vmatpush.bf16.msra.mxu3 %v7311_v10  ;;  %v7820_v10 = vld [vmem:[%s8004_s30 + $0x634] sm:$0xf] }
 0x329   : > { %5689 = vmatpush.bf16.msra.mxu0 %v7111_v9  ;;  %v5483_v58 = vpop.f32.mrf.mxu0  ;;  %v7580_v9 = vld [vmem:[%s8004_s30 + $0x7b8] sm:$0xf0]  ;;  %v7391_v30 = vor.u32 %v7820_v10, %v7388_v13 }
 0x32a   : > { %5702 = vmatpush.bf16.msra.mxu1 %v7175_v26  ;;  %v5484_v25 = vadd.f32 %v5483_v58, %v9331_v44  ;;  %v5496_v29 = vpop.f32.mrf.mxu1  ;;  %v7516_v44 = vld [vmem:[%s8004_s30 + $0x738] sm:$0xf0]  ;;  %v7818_v26 = vld [vmem:[%s8004_s30 + $0x624] sm:$0xf]  ;;  %v7583_v35 = vor.u32 %v7868_v37, %v7580_v9 }
 0x32b   : > { %5715 = vmatpush.bf16.msra.mxu2 %v7239_v15  ;;  %v7519_v55 = vor.u32 %v7852_v20, %v7516_v44  ;;  %v7380_v15 = vld [vmem:[%s8004_s30 + $0x628] sm:$0xf0] }
 0x32c   : > { %5728 = vmatpush.bf16.msra.mxu3 %v7303_v32  ;;  %5690 = vmatmul.bf16.vlgmr.msra.gmra.mxu0 %v7897_v2  ;;  %v5497_v50 = vadd.f32 %v5496_v29, %v5484_v25  ;;  %v7383_v3 = vor.u32 %v7818_v26, %v7380_v15  ;;  %v7848_v2 = vld [vmem:[%s8004_s30 + $0x714] sm:$0xf]  ;;  %v7904_v29 = vld [vmem:[#allocation1 + $0x3f] sm:$0xff] }
 0x32d   : > { %5734 = vmatpush.bf16.msrb.mxu0 %v7423_v31  ;;  %5703 = vmatmul.bf16.vlgmr.msra.gmra.mxu1 %v7899_v16  ;;  %v7444_v31 = vld [vmem:[%s8004_s30 + $0x6a8] sm:$0xf0] }
 0x32e   : > { %5747 = vmatpush.bf16.msrb.mxu1 %v7487_v22  ;;  %5716 = vmatmul.bf16.vlgmr.msra.gmra.mxu2 %v7898_v23  ;;  %v7850_v22 = vld [vmem:[%s8004_s30 + $0x724] sm:$0xf]  ;;  %v7447_v40 = vor.u32 %v7834_v33, %v7444_v31  ;;  %v7439_v23 = vor.u32 %v7832_v63, %v7436_v56  ;;  %v7902_v25 = vld [vmem:[#allocation1 + $0x2d] sm:$0xff] }
 0x32f   : > { %5760 = vmatpush.bf16.msrb.mxu2 %v7551_v34  ;;  %5729 = vmatmul.bf16.vlgmr.msra.gmra.mxu3 %v7900_v27  ;;  %v7508_v34 = vld [vmem:[%s8004_s30 + $0x728] sm:$0xf0]  ;;  %v7830_v27 = vld [vmem:[%s8004_s30 + $0x684] sm:$0xf] }
 0x330   : > { %5773 = vmatpush.bf16.msrb.mxu3 %v7615_v28  ;;  %v7572_v28 = vld [vmem:[%s8004_s30 + $0x7a8] sm:$0xf0] }
 0x331   : > { %5735 = vmatpush.bf16.msrb.mxu0 %v7415_v42  ;;  %v5509_v32 = vpop.f32.mrf.mxu2  ;;  %v5485_v41 = vpop.f32.mrf.mxu0  ;;  %v7511_v42 = vor.u32 %v7850_v22, %v7508_v34  ;;  %v7575_v7 = vor.u32 %v7866_v54, %v7572_v28 }
 0x332   : > { %5748 = vmatpush.bf16.msrb.mxu1 %v7479_v62  ;;  %v5510_v19 = vadd.f32 %v5509_v32, %v5497_v50  ;;  %v5522_v61 = vpop.f32.mrf.mxu3  ;;  %v5498_v18 = vpop.f32.mrf.mxu1  ;;  %v7816_v62 = vld [vmem:[%s8004_s30 + $0x614] sm:$0xf] }
 0x333   : > { %5761 = vmatpush.bf16.msrb.mxu2 %v7543_v21  ;;  %v7372_v21 = vld [vmem:[%s8004_s30 + $0x618] sm:$0xf0] }
 0x334   : > { %5774 = vmatpush.bf16.msrb.mxu3 %v7607_v17  ;;  %v5523_v24 = vadd.f32 %v5522_v61, %v5510_v19  ;;  %v7500_v17 = vld [vmem:[%s8004_s30 + $0x718] sm:$0xf0]  ;;  %v7375_v14 = vor.u32 %v7816_v62, %v7372_v21 }
 0x335   : > { %5736 = vmatpush.bf16.msrb.mxu0 %v7407_v53  ;;  %v7503_v16 = vor.u32 %v7848_v2, %v7500_v17  ;;  %v7567_v53 = vor.u32 %v7864_v0, %v7564_v46 }
 0x336   : > { %5749 = vmatpush.bf16.msrb.mxu1 %v7471_v47  ;;  %v7428_v47 = vld [vmem:[%s8004_s30 + $0x688] sm:$0xf0] }
 0x337   : > { %5762 = vmatpush.bf16.msrb.mxu2 %v7535_v12  ;;  %v7846_v12 = vld [vmem:[%s8004_s30 + $0x704] sm:$0xf]  ;;  %v7431_v11 = vor.u32 %v7830_v27, %v7428_v47 }
 0x338   : > { %5775 = vmatpush.bf16.msrb.mxu3 %v7599_v5  ;;  %v7556_v5 = vld [vmem:[%s8004_s30 + $0x788] sm:$0xf0]  ;;  %v7495_v58 = vor.u32 %v7846_v12, %v7492_v51 }
 0x339   : > { %5737 = vmatpush.bf16.msrb.mxu0 %v7399_v52  ;;  %v5511_v36 = vpop.f32.mrf.mxu2  ;;  %v7559_v39 = vor.u32 %v7862_v4, %v7556_v5  ;;  %v7903_v52 = vld [vmem:[#allocation1 + $0x36] sm:$0xff] }
 0x33a   : > { %5750 = vmatpush.bf16.msrb.mxu1 %v7463_v1  ;;  %v5524_v60 = vpop.f32.mrf.mxu3 }
 0x33b   : > { %5763 = vmatpush.bf16.msrb.mxu2 %v7527_v45 }
 0x33c   : > { %5776 = vmatpush.bf16.msrb.mxu3 %v7591_v6 }
 0x33d   : > { %5738 = vmatpush.bf16.msrb.mxu0 %v7391_v30 }
 0x33e   : > { %5751 = vmatpush.bf16.msrb.mxu1 %v7455_v48 }
 0x33f   : > { %5764 = vmatpush.bf16.msrb.mxu2 %v7519_v55 }
 0x340   : > { %5777 = vmatpush.bf16.msrb.mxu3 %v7583_v35 }
 0x341   : > { %5739 = vmatpush.bf16.msrb.mxu0 %v7383_v3 }
 0x342   : > { %5752 = vmatpush.bf16.msrb.mxu1 %v7447_v40 }
 0x343   : > { %5765 = vmatpush.bf16.msrb.mxu2 %v7511_v42 }
 0x344   : > { %5778 = vmatpush.bf16.msrb.mxu3 %v7575_v7 }
 0x345   : > { %5740 = vmatpush.bf16.msrb.mxu0 %v7375_v14 }
 0x346   : > { %5753 = vmatpush.bf16.msrb.mxu1 %v7439_v23 }
 0x347   : > { %5766 = vmatpush.bf16.msrb.mxu2 %v7503_v16 }
 0x348   : > { %5779 = vmatpush.bf16.msrb.mxu3 %v7567_v53 }
 0x349   : > { %5741 = vmatpush.bf16.msrb.mxu0 %v7367_v8  ;;  %v5535_v1 = vpop.f32.mrf.mxu0 }
 0x34a   : > { %5754 = vmatpush.bf16.msrb.mxu1 %v7431_v11  ;;  %v5536_v45 = vadd.f32 %v5535_v1, %v5523_v24  ;;  %v5548_v10 = vpop.f32.mrf.mxu1  ;;  %v3792_v11 = vld [vmem:[#allocation3] sm:$0xf] }
 0x34b   : > { %5767 = vmatpush.bf16.msrb.mxu2 %v7495_v58 }
 0x34c   : > { %5780 = vmatpush.bf16.msrb.mxu3 %v7559_v39  ;;  %5742 = vmatmul.bf16.vlgmr.msrb.gmra.mxu0 %v7901_v49  ;;  %v5549_v13 = vadd.f32 %v5548_v10, %v5536_v45 }
 0x34d   : > { %5755 = vmatmul.bf16.vlgmr.msrb.gmra.mxu1 %v7902_v25 }
 0x34e   : > { %5768 = vmatmul.bf16.vlgmr.msrb.gmra.mxu2 %v7903_v52 }
 0x34f   : > { %5781 = vmatmul.bf16.vlgmr.msrb.gmra.mxu3 %v7904_v29 }
 0x351   : > { %v5561_v38 = vpop.f32.mrf.mxu2  ;;  %v5537_v43 = vpop.f32.mrf.mxu0 }
 0x352   : > { %v5562_v6 = vadd.f32 %v5561_v38, %v5549_v13  ;;  %v5574_v50 = vpop.f32.mrf.mxu3  ;;  %v5550_v20 = vpop.f32.mrf.mxu1 }
 0x354   : > { %v5575_v44 = vadd.f32 %v5574_v50, %v5562_v6 }
 0x359   : > { %v5563_v37 = vpop.f32.mrf.mxu2 }
 0x35a   : > { %v5576_v9 = vpop.f32.mrf.mxu3 }
 0x369   : > { %v5587_v30 = vpop.f32.mrf.mxu0 }
 0x36a   : > { %v5600_v48 = vpop.f32.mrf.mxu1 }
 0x36b   : > { %v5601_v55 = vadd.f32 %v5600_v48, %v5587_v30 }
 0x371   : > { %v5613_v26 = vpop.f32.mrf.mxu2  ;;  %v5589_v32 = vpop.f32.mrf.mxu0 }
 0x372   : > { %v5614_v15 = vadd.f32 %v5613_v26, %v5601_v55  ;;  %v5626_v33 = vpop.f32.mrf.mxu3  ;;  %v5602_v31 = vpop.f32.mrf.mxu1 }
 0x374   : > { %v5627_v35 = vadd.f32 %v5626_v33, %v5614_v15 }
 0x379   : > { %v5615_v22 = vpop.f32.mrf.mxu2 }
 0x37a   : > { %v5628_v34 = vpop.f32.mrf.mxu3 }
 0x389   : > { %v5639_v19 = vpop.f32.mrf.mxu0 }
 0x38a   : > { %v5652_v61 = vpop.f32.mrf.mxu1  ;;  %v5640_v62 = vadd.f32 %v5639_v19, %v5627_v35 }
 0x38c   : > { %v5653_v56 = vadd.f32 %v5652_v61, %v5640_v62 }
 0x391   : > { %v5665_v54 = vpop.f32.mrf.mxu2  ;;  %v5641_v41 = vpop.f32.mrf.mxu0 }
 0x392   : > { %v5678_v28 = vpop.f32.mrf.mxu3  ;;  %v5654_v3 = vpop.f32.mrf.mxu1  ;;  %v5666_v17 = vadd.f32 %v5665_v54, %v5653_v56 }
 0x394   : > { %v5679_v14 = vadd.f32 %v5678_v28, %v5666_v17 }
 0x399   : > { %v5667_v18 = vpop.f32.mrf.mxu2 }
 0x39a   : > { %v5680_v24 = vpop.f32.mrf.mxu3 }
 0x3a9   : > { %v5691_v40 = vpop.f32.mrf.mxu0 }
 0x3aa   : > { %v5704_v42 = vpop.f32.mrf.mxu1  ;;  %v5692_v23 = vadd.f32 %v5691_v40, %v5679_v14 }
 0x3ac   : > { %v5705_v16 = vadd.f32 %v5704_v42, %v5692_v23 }
 0x3b1   : > { %v5717_v21 = vpop.f32.mrf.mxu2  ;;  %v5693_v7 = vpop.f32.mrf.mxu0 }
 0x3b2   : > { %v5730_v63 = vpop.f32.mrf.mxu3  ;;  %v5706_v2 = vpop.f32.mrf.mxu1  ;;  %v5718_v59 = vadd.f32 %v5717_v21, %v5705_v16 }
 0x3b4   : > { %v5731_v57 = vadd.f32 %v5730_v63, %v5718_v59 }
 0x3b9   : > { %v5719_v0 = vpop.f32.mrf.mxu2 }
 0x3ba   : > { %v5732_v46 = vpop.f32.mrf.mxu3 }
 0x3c9   : > { %v5743_v27 = vpop.f32.mrf.mxu0 }
 0x3ca   : > { %v5756_v53 = vpop.f32.mrf.mxu1  ;;  %v5744_v47 = vadd.f32 %v5743_v27, %v5731_v57 }
 0x3cc   : > { %v5757_v12 = vadd.f32 %v5756_v53, %v5744_v47 }
 0x3d1   : > { %v5769_v51 = vpop.f32.mrf.mxu2  ;;  %v5745_v5 = vpop.f32.mrf.mxu0 }
 0x3d2   : > { %v5770_v36 = vadd.f32 %v5769_v51, %v5757_v12  ;;  %v5782_v4 = vpop.f32.mrf.mxu3  ;;  %v5758_v60 = vpop.f32.mrf.mxu1 }
 0x3d4   : > { %v5783_v8 = vadd.f32 %v5782_v4, %v5770_v36 }
 0x3d6   : > { %v5788_v58 = vrot.slane %v5783_v8, 6 }
 0x3d7   : > { %5797 = sbr.rel (%p7616_p5) target bundleno = 1230 (0x4ce), region = 56 }
 0x3d8   : > { %v5790_v39 = vsel %vm5789_vm8, %v5575_v44, %v5788_v58 }
 0x3d9   : > { %v5792_v49 = vadd.f32 %v5790_v39, %v3792_v11  ;;  %v5771_v25 = vpop.f32.mrf.mxu2 }
 0x3da   : > { %v5784_v52 = vpop.f32.mrf.mxu3 }
 0x3db   : > { %5793 = vst [vmem:[#allocation3] sm:$0xf] %v5792_v49 }
 0x3dc   : > { %v5823_v29 = vld [vmem:[%s10032_s5 + $0x78] sm:$0xff]  ;;  %v5822_v1 = vld [vmem:[%s10032_s5 + $0x70] sm:$0xff]  ;;  %v5821_v45 = vld [vmem:[%s10032_s5 + $0x68] sm:$0xff]  ;;  %vm6532_vm9 = vcmask 74752  }
 0x3dd   : > { %v9425_v10 = vand.u32 4294901760, %v5823_v29  ;;  %v9427_v13 = vand.u32 4294901760, %v5822_v1  ;;  %v9429_v38 = vand.u32 4294901760, %v5821_v45  ;;  %v5820_v6 = vld [vmem:[%s10032_s5 + $0x60] sm:$0xff]  ;;  %v5819_v50 = vld [vmem:[%s10032_s5 + $0x58] sm:$0xff]  ;;  %v5818_v43 = vld [vmem:[%s10032_s5 + $0x50] sm:$0xff] }
 0x3de   : > { %v9440_v20 = vand.u32 4294901760, %v5820_v6  ;;  %v9442_v44 = vand.u32 4294901760, %v5819_v50  ;;  %v9444_v37 = vand.u32 4294901760, %v5818_v43  ;;  %v5817_v9 = vld [vmem:[%s10032_s5 + $0x48] sm:$0xff]  ;;  %v5816_v30 = vld [vmem:[%s10032_s5 + $0x40] sm:$0xff]  ;;  %v5815_v33 = vld [vmem:[%s10032_s5 + $0x38] sm:$0xff] }
 0x3df   : > { %5851 = vmatpush.msra.mxu0 %v9425_v10  ;;  %v9454_v48 = vsub.f32 %v5823_v29, %v9425_v10  ;;  %v9457_v55 = vsub.f32 %v5822_v1, %v9427_v13  ;;  %6047 = vmatpush.msra.mxu3 %v9425_v10  ;;  %v9461_v26 = vsub.f32 %v5821_v45, %v9429_v38  ;;  %v9463_v15 = vand.u32 4294901760, %v5817_v9  ;;  %v5814_v54 = vld [vmem:[%s10032_s5 + $0x30] sm:$0xff]  ;;  %v5813_v63 = vld [vmem:[%s10032_s5 + $0x28] sm:$0xff]  ;;  %v5812_v46 = vld [vmem:[%s10032_s5 + $0x20] sm:$0xff] }
 0x3e0   : > { %v9469_v35 = vsub.f32 %v5820_v6, %v9440_v20  ;;  %v9472_v32 = vsub.f32 %v5819_v50, %v9442_v44  ;;  %v9474_v31 = vand.u32 4294901760, %v5816_v30  ;;  %v9482_v61 = vsub.f32 %v5818_v43, %v9444_v37  ;;  %v5811_v27 = vld [vmem:[%s10032_s5 + $0x18] sm:$0xff]  ;;  %v5810_v4 = vld [vmem:[%s10032_s5 + $0x10] sm:$0xff]  ;;  %v5809_v58 = vld [vmem:[%s10032_s5 + $0x8] sm:$0xff] }
 0x3e1   : > { %5853 = vmatpush.msra.mxu0 %v9427_v13  ;;  %5994 = vmatpush.msra.mxu2 %v9454_v48  ;;  %v5893_v22 = vand.u32 4294901760, %v9454_v48  ;;  %v10051_v34 = vand.u32 4294901760, %v9457_v55  ;;  %v10049_v19 = vand.u32 4294901760, %v9461_v26  ;;  %v9489_v41 = vand.u32 4294901760, %v5815_v33  ;;  %v5839_v39 = vld [vmem:[%s10032_s5 + $0xf8] sm:$0xff]  ;;  %v5838_v25 = vld [vmem:[%s10032_s5 + $0xf0] sm:$0xff] }
 0x3e2   : > { %6049 = vmatpush.msra.mxu3 %v9427_v13  ;;  %v10048_v28 = vand.u32 4294901760, %v9469_v35  ;;  %v9492_v3 = vsub.f32 %v5817_v9, %v9463_v15  ;;  %v10045_v42 = vand.u32 4294901760, %v9472_v32  ;;  %v9507_v62 = vand.u32 4294901760, %v5814_v54  ;;  %v5808_v43 = vld [vmem:[%s10032_s5] sm:$0xff] }
 0x3e3   : > { %5855 = vmatpush.msra.mxu0 %v9429_v38  ;;  %5997 = vmatpush.msra.mxu2 %v9457_v55  ;;  %v5894_v18 = vsub.f32 %v9454_v48, %v5893_v22  ;;  %v5900_v24 = vsub.f32 %v9457_v55, %v10051_v34  ;;  %v5906_v40 = vsub.f32 %v9461_v26, %v10049_v19  ;;  %v10043_v17 = vand.u32 4294901760, %v9482_v61  ;;  %v5799_v19 = vld [vmem:[%s10031_s4] sm:$0x3] }
 0x3e4   : > { %6051 = vmatpush.msra.mxu3 %v9429_v38  ;;  %v9510_v21 = vsub.f32 %v5816_v30, %v9474_v31  ;;  %v5912_v2 = vsub.f32 %v9469_v35, %v10048_v28  ;;  %v9523_v0 = vsub.f32 %v5815_v33, %v9489_v41  ;;  %v5918_v23 = vsub.f32 %v9472_v32, %v10045_v42 }
 0x3e5   : > { %5857 = vmatpush.msra.mxu0 %v9440_v20  ;;  %v5895_v7 = vand.u32 4294901760, %v5894_v18  ;;  %6000 = vmatpush.msra.mxu2 %v9461_v26  ;;  %v5901_v56 = vand.u32 4294901760, %v5900_v24  ;;  %v5907_v14 = vand.u32 4294901760, %v5906_v40  ;;  %v9532_v16 = vand.u32 4294901760, %v5813_v63  ;;  %v5837_v40 = vld [vmem:[%s10032_s5 + $0xe8] sm:$0xff] }
 0x3e6   : > { %6053 = vmatpush.msra.mxu3 %v9440_v20  ;;  %v10041_v59 = vand.u32 4294901760, %v9492_v3  ;;  %v10039_v57 = vand.u32 4294901760, %v9510_v21  ;;  %v5913_v53 = vand.u32 4294901760, %v5912_v2  ;;  %v5924_v47 = vsub.f32 %v9482_v61, %v10043_v17 }
 0x3e7   : > { %5859 = vmatpush.msra.mxu0 %v9442_v44  ;;  %5896 = vmatpush.msra.mxu1 %v5895_v7  ;;  %v9545_v12 = vand.u32 4294901760, %v5812_v46  ;;  %v9548_v51 = vsub.f32 %v5814_v54, %v9507_v62  ;;  %v10038_v36 = vand.u32 4294901760, %v9523_v0  ;;  %v5919_v5 = vand.u32 4294901760, %v5918_v23 }
 0x3e8   : > { %6003 = vmatpush.msra.mxu2 %v9469_v35  ;;  %6055 = vmatpush.msra.mxu3 %v9442_v44  ;;  %v5930_v60 = vsub.f32 %v9492_v3, %v10041_v59  ;;  %v9560_v8 = vand.u32 4294901760, %v5811_v27  ;;  %v9563_v11 = vsub.f32 %v5813_v63, %v9532_v16  ;;  %v5936_v49 = vsub.f32 %v9510_v21, %v10039_v57 }
 0x3e9   : > { %5861 = vmatpush.msra.mxu0 %v9444_v37  ;;  %5902 = vmatpush.msra.mxu1 %v5901_v56  ;;  %v5925_v52 = vand.u32 4294901760, %v5924_v47  ;;  %v9580_v29 = vand.u32 4294901760, %v5810_v4  ;;  %v10037_v1 = vand.u32 4294901760, %v9548_v51  ;;  %v9584_v45 = vsub.f32 %v5812_v46, %v9545_v12  ;;  %v5836_v46 = vld [vmem:[%s10032_s5 + $0xe0] sm:$0xff] }
 0x3ea   : > { %6006 = vmatpush.msra.mxu2 %v9472_v32  ;;  %6057 = vmatpush.msra.mxu3 %v9444_v37  ;;  %v5942_v6 = vsub.f32 %v9523_v0, %v10038_v36  ;;  %v9591_v50 = vand.u32 4294901760, %v5809_v58  ;;  %v9596_v9 = vand.u32 4294901760, %v5839_v39  ;;  %v5931_v30 = vand.u32 4294901760, %v5930_v60  ;;  %v5835_v60 = vld [vmem:[%s10032_s5 + $0xd8] sm:$0xff] }
 0x3eb   : > { %5863 = vmatpush.msra.mxu0 %v9463_v15  ;;  %5908 = vmatpush.msra.mxu1 %v5907_v14  ;;  %v10036_v33 = vand.u32 4294901760, %v9563_v11  ;;  %v9601_v54 = vsub.f32 %v5811_v27, %v9560_v8  ;;  %v9603_v18 = vand.u32 4294901760, %v5838_v25  ;;  %v5937_v24 = vand.u32 4294901760, %v5936_v49 }
 0x3ec   : > { %6009 = vmatpush.msra.mxu2 %v9482_v61  ;;  %6059 = vmatpush.msra.mxu3 %v9463_v15  ;;  %10061 = vst [vmem:[#allocation7_spill] sm:$0xff] %v9591_v50  ;;  %v5948_v63 = vsub.f32 %v9548_v51, %v10037_v1  ;;  %v9614_v7 = vand.u32 4294901760, %v5808_v43  ;;  %v10035_v56 = vand.u32 4294901760, %v9584_v45  ;;  %v9618_v2 = vsub.f32 %v5810_v4, %v9580_v29 }
 0x3ed   : > { %5865 = vmatpush.msra.mxu0 %v9474_v31  ;;  %5914 = vmatpush.msra.mxu1 %v5913_v53  ;;  %10062 = vst [vmem:[#allocation8_spill] sm:$0xff] %v9596_v9  ;;  %v5943_v14 = vand.u32 4294901760, %v5942_v6  ;;  %v9626_v23 = vsub.f32 %v5809_v58, %v9591_v50  ;;  %v9629_v27 = vsub.f32 %v5839_v39, %v9596_v9  ;;  %v10040_v47 = vand.u32 4294901760, %v9601_v54  ;;  %v5834_v6 = vld [vmem:[%s10032_s5 + $0xd0] sm:$0xff] }
 0x3ee   : > { %6012 = vmatpush.msra.mxu2 %v9492_v3  ;;  %6061 = vmatpush.msra.mxu3 %v9474_v31  ;;  %10063 = vst [vmem:[#allocation9_spill] sm:$0xff] %v9603_v18  ;;  %v5954_v53 = vsub.f32 %v9563_v11, %v10036_v33  ;;  %v9636_v4 = vand.u32 4294901760, %v5837_v40  ;;  %v9646_v58 = vand.u32 4294901760, %v5836_v46  ;;  %v5949_v39 = vand.u32 4294901760, %v5948_v63 }
 0x3ef   : > { %5867 = vmatpush.msra.mxu0 %v9489_v41  ;;  %5920 = vmatpush.msra.mxu1 %v5919_v5  ;;  %10064 = vst [vmem:[#allocation10_spill] sm:$0xff] %v9614_v7  ;;  %v9639_v5 = vsub.f32 %v5838_v25, %v9603_v18  ;;  %v5960_v49 = vsub.f32 %v9584_v45, %v10035_v56  ;;  %v10042_v25 = vand.u32 4294901760, %v9618_v2  ;;  %v9663_v63 = vand.u32 4294901760, %v5835_v60 }
 0x3f0   : > { %6015 = vmatpush.msra.mxu2 %v9510_v21  ;;  %6063 = vmatpush.msra.mxu3 %v9489_v41  ;;  %v5955_v56 = vand.u32 4294901760, %v5954_v53  ;;  %v9671_v1 = vsub.f32 %v5837_v40, %v9636_v4  ;;  %v9676_v36 = vsub.f32 %v5836_v46, %v9646_v58  ;;  %v9678_v57 = vand.u32 4294901760, %v5834_v6 }
 0x3f1   : > { %5869 = vmatpush.msra.mxu0 %v9507_v62  ;;  %5926 = vmatpush.msra.mxu1 %v5925_v52  ;;  %v9654_v52 = vsub.f32 %v5808_v43, %v9614_v7  ;;  %v5966_v43 = vsub.f32 %v9601_v54, %v10040_v47  ;;  %v10047_v33 = vand.u32 4294901760, %v9639_v5  ;;  %v5961_v53 = vand.u32 4294901760, %v5960_v49  ;;  %v5832_v49 = vld [vmem:[%s10032_s5 + $0xc0] sm:$0xff] }
 0x3f2   : > { %6018 = vmatpush.msra.mxu2 %v9523_v0  ;;  %6065 = vmatpush.msra.mxu3 %v9507_v62  ;;  %v5972_v40 = vsub.f32 %v9618_v2, %v10042_v25  ;;  %v9722_v28 = vand.u32 4294901760, %v5832_v49 }
 0x3f3   : > { %5871 = vmatpush.msra.mxu0 %v9532_v16  ;;  %5932 = vmatpush.msra.mxu1 %v5931_v30  ;;  %v10044_v30 = vand.u32 4294901760, %v9626_v23  ;;  %v10050_v47 = vand.u32 4294901760, %v9654_v52  ;;  %v5967_v25 = vand.u32 4294901760, %v5966_v43  ;;  %v6241_v17 = vsub.f32 %v9639_v5, %v10047_v33 }
 0x3f4   : > { %6021 = vmatpush.msra.mxu2 %v9548_v51  ;;  %6067 = vmatpush.msra.mxu3 %v9532_v16  ;;  %v5973_v43 = vand.u32 4294901760, %v5972_v40  ;;  %v5830_v40 = vld [vmem:[%s10032_s5 + $0xb0] sm:$0xff] }
 0x3f5   : > { %5873 = vmatpush.msra.mxu0 %v9545_v12  ;;  %5938 = vmatpush.msra.mxu1 %v5937_v24  ;;  %v10046_v24 = vand.u32 4294901760, %v9629_v27  ;;  %v5978_v46 = vsub.f32 %v9626_v23, %v10044_v30  ;;  %v10052_v30 = vand.u32 4294901760, %v9671_v1  ;;  %v5984_v33 = vsub.f32 %v9654_v52, %v10050_v47 }
 0x3f6   : > { %6024 = vmatpush.msra.mxu2 %v9563_v11  ;;  %6069 = vmatpush.msra.mxu3 %v9545_v12  ;;  %v6242_v47 = vand.u32 4294901760, %v6241_v17 }
 0x3f7   : > { %5875 = vmatpush.msra.mxu0 %v9560_v8  ;;  %5944 = vmatpush.msra.mxu1 %v5943_v14  ;;  %v5833_v14 = vld [vmem:[%s10032_s5 + $0xc8] sm:$0xff]  ;;  %v6235_v59 = vsub.f32 %v9629_v27, %v10046_v24  ;;  %v9713_v24 = vsub.f32 %v5834_v6, %v9678_v57  ;;  %v5979_v6 = vand.u32 4294901760, %v5978_v46  ;;  %v6247_v34 = vsub.f32 %v9671_v1, %v10052_v30 }
 0x3f8   : > { %6027 = vmatpush.msra.mxu2 %v9584_v45  ;;  %6071 = vmatpush.msra.mxu3 %v9560_v8  ;;  %v9707_v42 = vand.u32 4294901760, %v5833_v14  ;;  %v10067_v46 = vand.u32 4294901760, %v9676_v36  ;;  %v5829_v30 = vld [vmem:[%s10032_s5 + $0xa8] sm:$0xff] }
 0x3f9   : > { %5877 = vmatpush.msra.mxu0 %v9580_v29  ;;  %5950 = vmatpush.msra.mxu1 %v5949_v39  ;;  %v9697_v39 = vsub.f32 %v5835_v60, %v9663_v63  ;;  %v6236_v60 = vand.u32 4294901760, %v6235_v59  ;;  %v10066_v59 = vand.u32 4294901760, %v9457_v55  ;;  %v9755_v55 = vsub.f32 %v5832_v49, %v9722_v28 }
 0x3fa   : > { %6030 = vmatpush.msra.mxu2 %v9601_v54  ;;  %6073 = vmatpush.msra.mxu3 %v9580_v29  ;;  %v9739_v48 = vsub.f32 %v5833_v14, %v9707_v42  ;;  %v5802_v14 = vperm.slane %v5799_v19, 1 }
 0x3fb   : > { %10065 = vst [vmem:[#allocation11_spill] sm:$0xff] %v9697_v39  ;;  %5879 = vmatpush.msra.mxu0 %v9591_v50  ;;  %5956 = vmatpush.msra.mxu1 %v5955_v56  ;;  %v5831_v56 = vld [vmem:[%s10032_s5 + $0xb8] sm:$0xff] }
 0x3fc   : > { %6033 = vmatpush.msra.mxu2 %v9618_v2  ;;  %6075 = vmatpush.msra.mxu3 %v9591_v50  ;;  %v10068_v50 = vand.u32 4294901760, %v9461_v26 }
 0x3fd   : > { %5881 = vmatpush.msra.mxu0 %v9614_v7  ;;  %5962 = vmatpush.msra.mxu1 %v5961_v53  ;;  %v5801_v53 = vperm.slane %v5799_v19, 0  ;;  %v5828_v19 = vld [vmem:[%s10032_s5 + $0xa0] sm:$0xff] }
 0x3fe   : > { %6036 = vmatpush.msra.mxu2 %v9626_v23  ;;  %6077 = vmatpush.msra.mxu3 %v9614_v7  ;;  %v5985_v7 = vand.u32 4294901760, %v5984_v33  ;;  %v6248_v33 = vand.u32 4294901760, %v6247_v34 }
 0x3ff   : > { %6088 = vmatpush.msrb.mxu0 %v5893_v22  ;;  %5968 = vmatpush.msra.mxu1 %v5967_v25  ;;  %v9741_v22 = vand.u32 4294901760, %v5831_v56  ;;  %v6253_v25 = vsub.f32 %v9676_v36, %v10067_v46  ;;  %v10069_v46 = vand.u32 4294901760, %v9697_v39 }
 0x400   : > { %6039 = vmatpush.msra.mxu2 %v9654_v52  ;;  %6237 = vmatpush.msrb.mxu3 %v6236_v60  ;;  %v5827_v60 = vld [vmem:[%s10032_s5 + $0x98] sm:$0xff] }
 0x401   : > { %6092 = vmatpush.msrb.mxu0 %v10066_v59  ;;  %5974 = vmatpush.msra.mxu1 %v5973_v43  ;;  %v9757_v59 = vand.u32 4294901760, %v5830_v40  ;;  %v6259_v17 = vsub.f32 %v9697_v39, %v10069_v46  ;;  %v5798_v43 = vld [vmem:[#allocation3] sm:$0xf]  ;;  %v9770_v26 = vsub.f32 %v5831_v56, %v9741_v22  ;;  %v10070_v46 = vand.u32 4294901760, %v9469_v35 }
 0x402   : > { %6192 = vmatpush.msrb.mxu2 %v9596_v9  ;;  %v5803_v9 = vrot.slane %v5802_v14, 6  ;;  %6243 = vmatpush.msrb.mxu3 %v6242_v47  ;;  %v6254_v14 = vand.u32 4294901760, %v6253_v25  ;;  %v6276_v56 = vand.u32 4294901760, %v9755_v55  ;;  %v9788_v39 = vand.u32 4294901760, %v5828_v19 }
 0x403   : > { %6096 = vmatpush.msrb.mxu0 %v10068_v50  ;;  %5980 = vmatpush.msra.mxu1 %v5979_v6  ;;  %v9772_v50 = vand.u32 4294901760, %v5829_v30  ;;  %v10071_v6 = vand.u32 4294901760, %v9713_v24  ;;  %v10072_v47 = vand.u32 4294901760, %v9472_v32  ;;  %v6260_v25 = vand.u32 4294901760, %v6259_v17 }
 0x404   : > { %6194 = vmatpush.msrb.mxu2 %v9603_v18  ;;  %v5804_v49 = vsel %vm5789_vm8, %v5801_v53, %v5803_v9  ;;  %v9786_v18 = vsub.f32 %v5830_v40, %v9757_v59  ;;  %6249 = vmatpush.msrb.mxu3 %v6248_v33  ;;  %v10073_v9 = vand.u32 4294901760, %v9739_v48  ;;  %v6282_v53 = vand.u32 4294901760, %v9770_v26 }
 0x405   : > { %6100 = vmatpush.msrb.mxu0 %v10070_v46  ;;  %v6265_v34 = vsub.f32 %v9713_v24, %v10071_v6  ;;  %5986 = vmatpush.msra.mxu1 %v5985_v7  ;;  %v5806_v35 = vadd.f32 %v5804_v49, %v5798_v43  ;;  %v9793_v46 = vand.u32 4294901760, %v5827_v60  ;;  %v9801_v40 = vsub.f32 %v5829_v30, %v9772_v50 }
 0x406   : > { %6196 = vmatpush.msrb.mxu2 %v9636_v4  ;;  %v6271_v7 = vsub.f32 %v9739_v48, %v10073_v9  ;;  %v10074_v32 = vand.u32 4294901760, %v9482_v61  ;;  %6255 = vmatpush.msrb.mxu3 %v6254_v14  ;;  %v6277_v33 = vsub.f32 %v9755_v55, %v6276_v56  ;;  %v6288_v30 = vand.u32 4294901760, %v9786_v18  ;;  %v5825_v14 = vld [vmem:[%s10032_s5 + $0x88] sm:$0xff] }
 0x407   : > { %6104 = vmatpush.msrb.mxu0 %v10072_v47  ;;  %6155 = vmatpush.msrb.mxu1 %v9425_v10  ;;  %v5807_v43 = vmax.f32 %v5806_v35, 0.0  ;;  %v5826_v10 = vld [vmem:[%s10032_s5 + $0x90] sm:$0xff]  ;;  %v6266_v17 = vand.u32 4294901760, %v6265_v34  ;;  %v9815_v49 = vsub.f32 %v5828_v19, %v9788_v39  ;;  %v9821_v61 = vsub.f32 %v5827_v60, %v9793_v46  ;;  %v5824_v60 = vld [vmem:[%s10032_s5 + $0x80] sm:$0xff] }
 0x408   : > { %6198 = vmatpush.msrb.mxu2 %v9646_v58  ;;  %6261 = vmatpush.msrb.mxu3 %v6260_v25  ;;  %v6272_v6 = vand.u32 4294901760, %v6271_v7  ;;  %v6283_v19 = vsub.f32 %v9770_v26, %v6282_v53  ;;  %v9831_v34 = vand.u32 4294901760, %v5826_v10  ;;  %v6278_v35 = vand.u32 4294901760, %v6277_v33 }
 0x409   : > { %6108 = vmatpush.msrb.mxu0 %v10074_v32  ;;  %6157 = vmatpush.msrb.mxu1 %v9427_v13  ;;  %5845 = vst [vmem:[#allocation1] ss:$4 sm:$0xff] %v5807_v43  ;;  %v10075_v13 = vand.u32 4294901760, %v9492_v3  ;;  %v6294_v3 = vand.u32 4294901760, %v9801_v40  ;;  %v6289_v47 = vsub.f32 %v9786_v18, %v6288_v30  ;;  %v6300_v25 = vand.u32 4294901760, %v9815_v49 }
 0x40a   : > { %6200 = vmatpush.msrb.mxu2 %v9663_v63  ;;  %6267 = vmatpush.msrb.mxu3 %v6266_v17  ;;  %v9844_v9 = vand.u32 4294901760, %v5825_v14  ;;  %v6284_v7 = vand.u32 4294901760, %v6283_v19  ;;  %v9855_v32 = vsub.f32 %v5826_v10, %v9831_v34  ;;  %v9857_v17 = vand.u32 4294901760, %v5824_v60 }
 0x40b   : > { %6112 = vmatpush.msrb.mxu0 %v10075_v13  ;;  %6159 = vmatpush.msrb.mxu1 %v9429_v38  ;;  %v10076_v38 = vand.u32 4294901760, %v9510_v21  ;;  %v10077_v21 = vand.u32 4294901760, %v9523_v0  ;;  %v6295_v43 = vsub.f32 %v9801_v40, %v6294_v3  ;;  %v10078_v0 = vand.u32 4294901760, %v9548_v51 }
 0x40c   : > { %6202 = vmatpush.msrb.mxu2 %v9678_v57  ;;  %6273 = vmatpush.msrb.mxu3 %v6272_v6  ;;  %v6290_v33 = vand.u32 4294901760, %v6289_v47  ;;  %v6301_v13 = vsub.f32 %v9815_v49, %v6300_v25  ;;  %v9869_v10 = vsub.f32 %v5825_v14, %v9844_v9  ;;  %v10079_v19 = vand.u32 4294901760, %v9563_v11 }
 0x40d   : > { %6116 = vmatpush.msrb.mxu0 %v10076_v38  ;;  %6161 = vmatpush.msrb.mxu1 %v9440_v20  ;;  %v6306_v20 = vand.u32 4294901760, %v9821_v61  ;;  %v6296_v51 = vand.u32 4294901760, %v6295_v43  ;;  %v9881_v14 = vsub.f32 %v5824_v60, %v9857_v17  ;;  %v10080_v11 = vand.u32 4294901760, %v9584_v45 }
 0x40e   : > { %6204 = vmatpush.msrb.mxu2 %v9707_v42  ;;  %6279 = vmatpush.msrb.mxu3 %v6278_v35  ;;  %v6312_v35 = vand.u32 4294901760, %v9855_v32  ;;  %v6302_v47 = vand.u32 4294901760, %v6301_v13  ;;  %v10081_v43 = vand.u32 4294901760, %v9601_v54  ;;  %v10083_v13 = vand.u32 4294901760, %v9626_v23 }
 0x40f   : > { %6120 = vmatpush.msrb.mxu0 %v10077_v21  ;;  %6163 = vmatpush.msrb.mxu1 %v9442_v44 }
 0x410   : > { %6206 = vmatpush.msrb.mxu2 %v9722_v28  ;;  %v5846_v44 = vld.sshfl [vmem:[#allocation1] sm:$0xff pattern:$0x73625140]  ;;  %6285 = vmatpush.msrb.mxu3 %v6284_v7  ;;  %v6318_v7 = vand.u32 4294901760, %v9869_v10 }
 0x411   : > { %6124 = vmatpush.msrb.mxu0 %v10078_v0  ;;  %6165 = vmatpush.msrb.mxu1 %v9444_v37  ;;  %v9866_v6 = vand.u32 4294901760, %v5846_v44  ;;  %v6307_v37 = vsub.f32 %v9821_v61, %v6306_v20  ;;  %v6324_v0 = vand.u32 4294901760, %v9881_v14 }
 0x412   : > { %6208 = vmatpush.msrb.mxu2 %v9741_v22  ;;  %6291 = vmatpush.msrb.mxu3 %v6290_v33  ;;  %v10082_v33 = vand.u32 4294901760, %v9618_v2  ;;  %v6319_v54 = vsub.f32 %v9869_v10, %v6318_v7 }
 0x413   : > { %6128 = vmatpush.msrb.mxu0 %v10079_v19  ;;  %6167 = vmatpush.msrb.mxu1 %v9463_v15  ;;  %v5883_v38 = vsub.f32 %v5846_v44, %v9866_v6  ;;  %v5847_v15 = vld.sshfl [vmem:[#allocation1 + $0x8] sm:$0xff pattern:$0x73625140]  ;;  %v6308_v60 = vand.u32 4294901760, %v6307_v37  ;;  %v10084_v37 = vand.u32 4294901760, %v9654_v52 }
 0x414   : > { %6210 = vmatpush.msrb.mxu2 %v9757_v59  ;;  %6297 = vmatpush.msrb.mxu3 %v6296_v51  ;;  %v9896_v44 = vand.u32 4294901760, %v5847_v15  ;;  %v10086_v52 = vld [vmem:[#allocation7_spill] sm:$0xff] }
 0x415   : > { %6132 = vmatpush.msrb.mxu0 %v10080_v11  ;;  %6169 = vmatpush.msrb.mxu1 %v9474_v31  ;;  %v5884_v21 = vand.u32 4294901760, %v5883_v38  ;;  %v6313_v31 = vsub.f32 %v9855_v32, %v6312_v35  ;;  %v10087_v11 = vand.u32 4294901760, %v9639_v5 }
 0x416   : > { %6212 = vmatpush.msrb.mxu2 %v9772_v50  ;;  %6303 = vmatpush.msrb.mxu3 %v6302_v47  ;;  %v9913_v19 = vsub.f32 %v5847_v15, %v9896_v44  ;;  %v10090_v15 = vld [vmem:[#allocation11_spill] sm:$0xff] }
 0x417   : > { %6136 = vmatpush.msrb.mxu0 %v10081_v43  ;;  %6171 = vmatpush.msrb.mxu1 %v9489_v41  ;;  %v5885_v45 = vsub.f32 %v5883_v38, %v5884_v21  ;;  %v6314_v2 = vand.u32 4294901760, %v6313_v31 }
 0x418   : > { %6214 = vmatpush.msrb.mxu2 %v9788_v39  ;;  %6309 = vmatpush.msrb.mxu3 %v6308_v60  ;;  %v6225_v51 = vand.u32 4294901760, %v9913_v19 }
 0x419   : > { %6140 = vmatpush.msrb.mxu0 %v10082_v33  ;;  %6173 = vmatpush.msrb.mxu1 %v9507_v62  ;;  %v5886_v41 = vand.u32 4294901760, %v5885_v45  ;;  %v6325_v62 = vsub.f32 %v9881_v14, %v6324_v0 }
 0x41a   : > { %6216 = vmatpush.msrb.mxu2 %v9793_v46  ;;  %6315 = vmatpush.msrb.mxu3 %v6314_v2 }
 0x41b   : > { %6144 = vmatpush.msrb.mxu0 %v10083_v13  ;;  %6175 = vmatpush.msrb.mxu1 %v9532_v16  ;;  %v6320_v16 = vand.u32 4294901760, %v6319_v54  ;;  %v6326_v23 = vand.u32 4294901760, %v6325_v62 }
 0x41c   : > { %6218 = vmatpush.msrb.mxu2 %v9831_v34  ;;  %5887 = vmatmul.f32.vlgmr.msra.gmra.mxu0 %v5886_v41 }
 0x41d   : > { %6148 = vmatpush.msrb.mxu0 %v10084_v37  ;;  %6177 = vmatpush.msrb.mxu1 %v9545_v12  ;;  %v10085_v12 = vand.u32 4294901760, %v9629_v27 }
 0x41e   : > { %6220 = vmatpush.msrb.mxu2 %v9844_v9  ;;  %6321 = vmatpush.msrb.mxu3 %v6320_v16 }
 0x41f   : > { %6335 = vmatpush.msra.mxu0 %v9629_v27  ;;  %6179 = vmatpush.msrb.mxu1 %v9560_v8  ;;  %v6226_v8 = vsub.f32 %v9913_v19, %v6225_v51  ;;  %v10091_v27 = vand.u32 4294901760, %v9671_v1 }
 0x420   : > { %6222 = vmatpush.msrb.mxu2 %v9857_v17  ;;  %6327 = vmatpush.msrb.mxu3 %v6326_v23 }
 0x421   : > { %6338 = vmatpush.msra.mxu0 %v9639_v5  ;;  %6181 = vmatpush.msrb.mxu1 %v9580_v29  ;;  %v10088_v29 = vld [vmem:[#allocation8_spill] sm:$0xff]  ;;  %v6227_v47 = vand.u32 4294901760, %v6226_v8  ;;  %v10093_v5 = vand.u32 4294901760, %v9676_v36 }
 0x422   : > { %6042 = vmatmul.f32.vlgmr.msra.gmra.mxu2 %v5883_v38  ;;  %6081 = vmatmul.f32.vlgmr.msra.gmra.mxu3 %v5884_v21  ;;  %v10089_v38 = vld [vmem:[#allocation10_spill] sm:$0xff]  ;;  %v10092_v21 = vld [vmem:[#allocation9_spill] sm:$0xff] }
 0x423   : > { %6341 = vmatpush.msra.mxu0 %v9671_v1  ;;  %6429 = vmatpush.msra.mxu2 %v10085_v12  ;;  %v10094_v1 = vand.u32 4294901760, %v10090_v15 }
 0x424   : > { %6183 = vmatpush.msrb.mxu1 %v10086_v52  ;;  %6496 = vmatpush.msra.mxu3 %v10088_v29 }
 0x425   : > { %6344 = vmatpush.msra.mxu0 %v9676_v36  ;;  %6433 = vmatpush.msra.mxu2 %v10087_v11  ;;  %v10095_v36 = vand.u32 4294901760, %v9713_v24 }
 0x426   : > { %6185 = vmatpush.msrb.mxu1 %v10089_v38  ;;  %6498 = vmatpush.msra.mxu3 %v10092_v21 }
 0x427   : > { %6347 = vmatpush.msra.mxu0 %v10090_v15  ;;  %5988 = vmatmul.f32.vlgmr.msra.gmra.mxu1 %v9866_v6 }
 0x428   : > { %6437 = vmatpush.msra.mxu2 %v10091_v27  ;;  %6388 = vmatpush.msra.mxu1 %v10088_v29 }
 0x429   : > { %6350 = vmatpush.msra.mxu0 %v9713_v24  ;;  %6500 = vmatpush.msra.mxu3 %v9636_v4 }
 0x42a   : > { %6441 = vmatpush.msra.mxu2 %v10093_v5  ;;  %6390 = vmatpush.msra.mxu1 %v10092_v21 }
 0x42b   : > { %6228 = vmatmul.f32.vlgmr.msrb.gmra.mxu2 %v6227_v47  ;;  %6353 = vmatpush.msra.mxu0 %v9739_v48 }
 0x42c   : > { %6392 = vmatpush.msra.mxu1 %v9636_v4  ;;  %6445 = vmatpush.msra.mxu2 %v10094_v1  ;;  %v10096_v4 = vand.u32 4294901760, %v9739_v48 }
 0x42d   : > { %6502 = vmatpush.msra.mxu3 %v9646_v58  ;;  %6150 = vmatmul.f32.vlgmr.msrb.gmra.mxu0 %v9866_v6 }
 0x42e   : > { %6329 = vmatmul.f32.vlgmr.msrb.gmra.mxu3 %v9896_v44  ;;  %6356 = vmatpush.msra.mxu0 %v9755_v55 }
 0x42f   : > { %6394 = vmatpush.msra.mxu1 %v9646_v58  ;;  %6449 = vmatpush.msra.mxu2 %v10095_v36 }
 0x430   : > { %6504 = vmatpush.msra.mxu3 %v9663_v63  ;;  %6187 = vmatmul.f32.vlgmr.msrb.gmra.mxu1 %v9866_v6 }
 0x431   : > { %6359 = vmatpush.msra.mxu0 %v9770_v26  ;;  %6396 = vmatpush.msra.mxu1 %v9663_v63 }
 0x432   : > { %6453 = vmatpush.msra.mxu2 %v10096_v4  ;;  %6506 = vmatpush.msra.mxu3 %v9678_v57 }
 0x433   : > { %6362 = vmatpush.msra.mxu0 %v9786_v18  ;;  %6398 = vmatpush.msra.mxu1 %v9678_v57 }
 0x434   : > { %6457 = vmatpush.msra.mxu2 %v6276_v56  ;;  %6508 = vmatpush.msra.mxu3 %v9707_v42 }
 0x435   : > { %6365 = vmatpush.msra.mxu0 %v9801_v40  ;;  %6400 = vmatpush.msra.mxu1 %v9707_v42 }
 0x436   : > { %6461 = vmatpush.msra.mxu2 %v6282_v53  ;;  %6510 = vmatpush.msra.mxu3 %v9722_v28 }
 0x437   : > { %6368 = vmatpush.msra.mxu0 %v9815_v49  ;;  %6402 = vmatpush.msra.mxu1 %v9722_v28  ;;  %v7905_v28 = vld [vmem:[%s10033_s6] ss:$0 sm:$0xff] }
 0x438   : > { %6465 = vmatpush.msra.mxu2 %v6288_v30  ;;  %6512 = vmatpush.msra.mxu3 %v9741_v22 }
 0x439   : > { %6371 = vmatpush.msra.mxu0 %v9821_v61  ;;  %6404 = vmatpush.msra.mxu1 %v9741_v22 }
 0x43a   : > { %6469 = vmatpush.msra.mxu2 %v6294_v3  ;;  %6514 = vmatpush.msra.mxu3 %v9757_v59 }
 0x43b   : > { %6374 = vmatpush.msra.mxu0 %v9855_v32  ;;  %6406 = vmatpush.msra.mxu1 %v9757_v59 }
 0x43c   : > { %6473 = vmatpush.msra.mxu2 %v6300_v25  ;;  %6516 = vmatpush.msra.mxu3 %v9772_v50 }
 0x43d   : > { %6377 = vmatpush.msra.mxu0 %v9869_v10  ;;  %6408 = vmatpush.msra.mxu1 %v9772_v50 }
 0x43e   : > { %6477 = vmatpush.msra.mxu2 %v6306_v20  ;;  %6518 = vmatpush.msra.mxu3 %v9788_v39 }
 0x43f   : > { %6380 = vmatpush.msra.mxu0 %v9881_v14  ;;  %6410 = vmatpush.msra.mxu1 %v9788_v39 }
 0x440   : > { %6481 = vmatpush.msra.mxu2 %v6312_v35  ;;  %6520 = vmatpush.msra.mxu3 %v9793_v46 }
 0x441   : > { %6383 = vmatmul.f32.vlgmr.msra.gmra.mxu0 %v9913_v19  ;;  %6412 = vmatpush.msra.mxu1 %v9793_v46 }
 0x442   : > { %6485 = vmatpush.msra.mxu2 %v6318_v7  ;;  %6522 = vmatpush.msra.mxu3 %v9831_v34 }
 0x443   : > { %6414 = vmatpush.msra.mxu1 %v9831_v34 }
 0x444   : > { %6489 = vmatpush.msra.mxu2 %v6324_v0  ;;  %6524 = vmatpush.msra.mxu3 %v9844_v9 }
 0x445   : > { %6491 = vmatmul.f32.vlgmr.msra.gmra.mxu2 %v9896_v44  ;;  %6416 = vmatpush.msra.mxu1 %v9844_v9 }
 0x446   : > { %6526 = vmatpush.msra.mxu3 %v9857_v17 }
 0x447   : > { %6528 = vmatmul.f32.vlgmr.msra.gmra.mxu3 %v9896_v44  ;;  %6418 = vmatpush.msra.mxu1 %v9857_v17 }
 0x448   : > { %6422 = vmatmul.f32.vlgmr.msra.gmra.mxu1 %v6225_v51 }
 0x499   : > { %v5888_v42 = vpop.f32.mrf.mxu0 }
 0x49a   : > { %v5889_v57 = vadd.f32 %v7905_v28, %v5888_v42 }
 0x4a4   : > { %v5989_v18 = vpop.f32.mrf.mxu1 }
 0x4a5   : > { %v5990_v58 = vadd.f32 %v5989_v18, %v5889_v57  ;;  %v6043_v24 = vpop.f32.mrf.mxu2  ;;  %v6082_v39 = vpop.f32.mrf.mxu3 }
 0x4a7   : > { %v6044_v63 = vadd.f32 %v6043_v24, %v5990_v58 }
 0x4a9   : > { %v6083_v48 = vadd.f32 %v6082_v39, %v6044_v63 }
 0x4aa   : > { %v6151_v22 = vpop.f32.mrf.mxu0 }
 0x4ab   : > { %v6152_v55 = vadd.f32 %v6151_v22, %v6083_v48 }
 0x4ad   : > { %v6188_v59 = vpop.f32.mrf.mxu1 }
 0x4ae   : > { %v6189_v26 = vadd.f32 %v6188_v59, %v6152_v55  ;;  %v6229_v50 = vpop.f32.mrf.mxu2 }
 0x4b0   : > { %v6230_v56 = vadd.f32 %v6229_v50, %v6189_v26 }
 0x4b1   : > { %v6330_v46 = vpop.f32.mrf.mxu3 }
 0x4b2   : > { %v6331_v40 = vadd.f32 %v6330_v46, %v6230_v56 }
 0x4be   : > { %v6384_v53 = vpop.f32.mrf.mxu0 }
 0x4bf   : > { %v6385_v30 = vadd.f32 %v6384_v53, %v6331_v40 }
 0x4c5   : > { %v6423_v49 = vpop.f32.mrf.mxu1 }
 0x4c6   : > { %v6424_v61 = vadd.f32 %v6423_v49, %v6385_v30 }
 0x4c8   : > { %v6492_v3 = vpop.f32.mrf.mxu2 }
 0x4c9   : > { %v6493_v34 = vadd.f32 %v6492_v3, %v6424_v61 }
 0x4ca   : > { %v6529_v25 = vpop.f32.mrf.mxu3 }
 0x4cb   : > { %v6530_v9 = vadd.f32 %v6529_v25, %v6493_v34 }
 0x4cd   : > { %6533 = vst.msk [vmem:[#allocation4] sm:$0x3] %vm6532_vm9, %v6530_v9 }
 0x4ce PF: > { %p7882_p6 = scmp.eq.s32.totalorder %s7996_s25, 1  ;;  %s7949_s29 = smov [#allocation4]  }
 0x4cf   : > { %s6540_s8 = sshll.u32 %s7949_s29, 4  ;;  %s6542_s11 = sshll.u32 %s10034_s7, 4  ;;  %s6541_s8 = int_to_ptr.vmem [resolvable:$true] %s6540_s8  ;;  %s6543_s11 = int_to_ptr.hbm [resolvable:$true] %s6542_s11 }
 0x4d0   : > { %7879 = dma.vmem_to_hbm [thread:$0]  (%p7882_p6), %s6541_s8, 32, %s6543_s11, [#allocation5]  }
 0x4d1   : > { %7939 = dma.done.wait (%p7882_p6), [#allocation5], 32  }
 0x4d2   : > { %7941 = vsyncadd (%p7882_p6), [#allocation5], 4294967264 }
 0x4d3 PF: > { %s18_s24 = sadd.s32 1, %s7944_s24  }
 0x4d4   : > { %p15_p7 = scmp.ge.s32.totalorder %s18_s24, 4  }
 0x4d6   :  { %17 = sbr.rel (!%p15_p7) target bundleno = 1 (0x1), region = 84 }
 0x4db   :  { %6556 = vsyncpa [#allocation5], 1 }
 0x4dc   :  { %6558 = vsyncpa [#allocation5 + $0x1], 1 }

</bundles_post_ra>
